<compile_context>
chip_gen: v7x
topology: tpu7x:2x2x1
jax: 0.10.0
libtpu: 0.0.40
codegen_flags: <defaults>
</compile_context>

<pallas_src>
import functools

import jax
import jax.numpy as jnp
from jax.experimental import pallas as pl
from jax.experimental.pallas import tpu as pltpu


# ----------------------------- config (small, consistent with the module) ----
class Cfg:
    hidden_size = 64
    intermediate_size = 128
    num_hidden_layers = 2
    num_attention_heads = 4
    num_key_value_heads = 2
    compression_ratio = 8          # latent_dim = hidden_size // 8 = 8
    num_experts = 4
    num_shared_experts = 1         # -> 3 routed experts
    top_k = 2
    vocab_size = 256
    rms_norm_eps = 1e-5
    rope_theta = 10000.0
    initializer_range = 0.041666666666666664


CFG = Cfg()
HEAD_DIM = CFG.hidden_size // CFG.num_attention_heads
LATENT_DIM = CFG.hidden_size // CFG.compression_ratio
NUM_ROUTED = CFG.num_experts - CFG.num_shared_experts
HQ = CFG.num_attention_heads * HEAD_DIM
HK = CFG.num_key_value_heads * HEAD_DIM
# packed up-projection output columns: [q | rot(q) | k | rot(k) | v | pad] -> 128-lane aligned
N_UP = ((2 * HQ + 3 * HK + 127) // 128) * 128


def _vmem():
    return pl.BlockSpec(memory_space=pltpu.MemorySpace.VMEM)


# ----------------------------- fully fused model kernel -----------------------
def _model_kernel(x_ref, cos_ref, sin_ref,
                  ln1_ref, wd_ref, wu_ref, wo_ref,
                  ln2_ref, wr_ref, rb_ref,
                  wgu_ref, wdn_ref, normw_ref,
                  o_ref, attn_scr,
                  *, B, S, n_layers, nh, nkv, hd, inter, eps,
                  n_routed, topk, n_exp):
    Hq = nh * hd
    Hk = nkv * hd
    group = nh // nkv
    scale = hd ** -0.5
    M = B * S

    cos = cos_ref[...]                                               # (S, hd) f32
    sin = sin_ref[...]

    # causal mask (built once, reused every layer/head)
    row = jax.lax.broadcasted_iota(jnp.int32, (S, S), 0)
    col = jax.lax.broadcasted_iota(jnp.int32, (S, S), 1)
    causal = col <= row
    # expert-column index, for the vectorized top-k rank computation
    col_e = jax.lax.broadcasted_iota(jnp.int32, (M, n_routed), 1)

    # column offsets inside the packed qkv projection output
    off_q, off_qr = 0, Hq
    off_k, off_kr, off_v = 2 * Hq, 2 * Hq + Hk, 2 * Hq + 2 * Hk

    x = x_ref[...]                                                   # (M, H) f32

    for li in range(n_layers):
        # --- input RMSNorm (f32) ---
        var = jnp.mean(x * x, axis=-1, keepdims=True)
        h1 = x * jax.lax.rsqrt(var + eps) * ln1_ref[li]
        h1b = h1.astype(jnp.bfloat16)

        # --- fused latent projections (bf16 MXU, f32 accumulate) ---
        lat = jnp.dot(h1b, wd_ref[li], preferred_element_type=jnp.float32)   # (M, 2L)
        qkv = jnp.dot(lat.astype(jnp.bfloat16), wu_ref[li],
                      preferred_element_type=jnp.float32)                    # (M, N_UP)

        # --- causal GQA attention; per-head results go straight to VMEM scratch ---
        for b in range(B):
            r0 = b * S
            for g in range(nkv):
                kh = qkv[r0:r0 + S, off_k + g * hd: off_k + (g + 1) * hd]
                krh = qkv[r0:r0 + S, off_kr + g * hd: off_kr + (g + 1) * hd]
                kb = (kh * cos + krh * sin).astype(jnp.bfloat16)             # RoPE(k)
                vb = qkv[r0:r0 + S, off_v + g * hd: off_v + (g + 1) * hd].astype(jnp.bfloat16)
                for hh in range(group):
                    h = g * group + hh                                        # GQA: reuse kb/vb
                    qh = qkv[r0:r0 + S, off_q + h * hd: off_q + (h + 1) * hd]
                    qrh = qkv[r0:r0 + S, off_qr + h * hd: off_qr + (h + 1) * hd]
                    qb = (qh * cos + qrh * sin).astype(jnp.bfloat16)          # RoPE(q)
                    s = jax.lax.dot_general(
                        qb, kb, (((1,), (1,)), ((), ())),
                        preferred_element_type=jnp.float32) * scale           # (S, S)
                    s = jnp.where(causal, s, -jnp.inf)
                    m = jnp.max(s, axis=-1, keepdims=True)
                    p = jnp.exp(s - m)
                    p = p * pl.reciprocal(jnp.sum(p, axis=-1, keepdims=True), approx=True)
                    attn_scr[r0:r0 + S, h * hd:(h + 1) * hd] = jnp.dot(
                        p.astype(jnp.bfloat16), vb, preferred_element_type=jnp.float32)

        # --- output projection + residual ---
        attn = attn_scr[...]                                                  # (M, Hq)
        x = x + jnp.dot(attn.astype(jnp.bfloat16), wo_ref[li],
                        preferred_element_type=jnp.float32)

        # --- post-attention RMSNorm (f32) ---
        var2 = jnp.mean(x * x, axis=-1, keepdims=True)
        h2 = x * jax.lax.rsqrt(var2 + eps) * ln2_ref[li]
        h2b = h2.astype(jnp.bfloat16)

        # --- router: sigmoid -> vectorized stable top-k -> renormalize (f32) ---
        logits = jnp.dot(h2b, wr_ref[li], preferred_element_type=jnp.float32) + rb_ref[li]
        probs = jax.nn.sigmoid(logits)                                        # (M, n_routed)
        rank = jnp.zeros_like(probs)
        for j in range(n_routed):
            pj = probs[:, j:j + 1]
            gt = (pj > probs).astype(jnp.float32)
            ge = (pj >= probs).astype(jnp.float32)
            # expert j outranks column i: ties broken toward lower index (stable top-k)
            rank = rank + jnp.where(col_e > j, ge, gt)
        gates = jnp.where(rank < topk, probs, 0.0)
        gates_n = gates / jnp.sum(gates, axis=-1, keepdims=True)

        # --- MoE: expert 0 shared (weight 1), experts 1..n_routed gated; residual folded ---
        # Dense weighted dispatch == PyTorch masked scatter loop (mathematically equivalent).
        for e in range(n_exp):
            w_idx = li * n_exp + e
            gu = jnp.dot(h2b, wgu_ref[w_idx], preferred_element_type=jnp.float32)  # (M, 2I)
            gt_ = gu[:, :inter]
            up = gu[:, inter:]
            act = (gt_ * jax.nn.sigmoid(gt_) * up).astype(jnp.bfloat16)             # SiLU*up, f32 math
            eo = jnp.dot(act, wdn_ref[w_idx], preferred_element_type=jnp.float32)   # (M, H)
            if e == 0:
                x = x + eo
            else:
                x = x + eo * gates_n[:, e - 1:e]

    # --- final RMSNorm ---
    var = jnp.mean(x * x, axis=-1, keepdims=True)
    o_ref[...] = x * jax.lax.rsqrt(var + eps) * normw_ref[...]


def model_forward(params, input_ids):
    B, S = input_ids.shape
    M = B * S
    H = CFG.hidden_size
    x = jnp.take(params["embed"], input_ids.reshape(-1), axis=0)    # (M, H) gather (glue)
    cos, sin = rope_tables(S, HEAD_DIM, CFG.rope_theta)             # (S, hd)

    kern = functools.partial(
        _model_kernel,
        B=B, S=S, n_layers=CFG.num_hidden_layers,
        nh=CFG.num_attention_heads, nkv=CFG.num_key_value_heads, hd=HEAD_DIM,
        inter=CFG.intermediate_size, eps=CFG.rms_norm_eps,
        n_routed=NUM_ROUTED, topk=CFG.top_k, n_exp=1 + NUM_ROUTED)

    out = pl.pallas_call(
        kern,
        out_shape=jax.ShapeDtypeStruct((M, H), jnp.float32),
        in_specs=[_vmem()] * 13,
        out_specs=_vmem(),
        scratch_shapes=[pltpu.VMEM((M, HQ), jnp.float32)],
    )(x, cos, sin,
      params["ln1"], params["wd"], params["wu"], params["wo"],
      params["ln2"], params["wr"], params["rb"],
      params["wgu"], params["wdn"], params["norm_w"])
    return out.reshape(B, S, H)


# ----------------------------- JAX glue ---------------------------------------
def rope_tables(seq_len, dim, theta):
    inv_freq = 1.0 / theta ** (jnp.arange(0, dim, 2, dtype=jnp.float32) / dim)
    t = jnp.arange(seq_len, dtype=jnp.float32)
    freqs = jnp.outer(t, inv_freq)
    emb = jnp.concatenate([freqs, freqs], axis=-1)                   # (S, hd)
    return jnp.cos(emb), jnp.sin(emb)


# ----------------------------- host-side weight fusion (one-time prep) --------
def _rot_half_cols(w, n_heads, head_dim):
    """Fold per-head rotate_half into the weight's output columns (exact)."""
    half = head_dim // 2
    w3 = w.reshape(w.shape[0], n_heads, head_dim)
    w3r = jnp.concatenate([-w3[..., half:], w3[..., :half]], axis=-1)
    return w3r.reshape(w.shape[0], n_heads * head_dim)


def prepare_params(raw):
    nh, nkv, hd = CFG.num_attention_heads, CFG.num_key_value_heads, HEAD_DIM
    Hq, Hk, L = HQ, HK, LATENT_DIM
    bf = jnp.bfloat16

    ln1_l, ln2_l, wd_l, wu_l, wo_l, wr_l, rb_l = [], [], [], [], [], [], []
    wgu_l, wdn_l = [], []
    for lp in raw["layers"]:
        wq_u, wk_u, wv_u = lp["q_proj_u"], lp["k_proj_u"], lp["v_proj_u"]
        # block-diagonal, lane-padded up-projection: [q | rot(q) | k | rot(k) | v | pad]
        wu = jnp.zeros((2 * L, N_UP), jnp.float32)
        wu = wu.at[:L, 0:Hq].set(wq_u)
        wu = wu.at[:L, Hq:2 * Hq].set(_rot_half_cols(wq_u, nh, hd))
        wu = wu.at[L:, 2 * Hq:2 * Hq + Hk].set(wk_u)
        wu = wu.at[L:, 2 * Hq + Hk:2 * Hq + 2 * Hk].set(_rot_half_cols(wk_u, nkv, hd))
        wu = wu.at[L:, 2 * Hq + 2 * Hk:2 * Hq + 3 * Hk].set(wv_u)
        wd = jnp.concatenate([lp["q_proj_d"], lp["kv_proj_d"]], axis=1)      # (H, 2L)

        experts = [lp["shared_expert"]] + list(lp["routed_experts"])         # e=0 shared
        for (g, u, d) in experts:
            wgu_l.append(jnp.concatenate([g, u], axis=1).astype(bf))          # (H, 2I)
            wdn_l.append(d.astype(bf))                                        # (I, H)

        ln1_l.append(lp["ln1_w"].reshape(1, -1))
        ln2_l.append(lp["ln2_w"].reshape(1, -1))
        wd_l.append(wd.astype(bf))
        wu_l.append(wu.astype(bf))
        wo_l.append(lp["o_proj"].astype(bf))
        wr_l.append(lp["router_w"].astype(bf))
        rb_l.append(lp["routing_bias"].reshape(1, -1))

    return {
        "embed": raw["embed"],
        "norm_w": raw["norm_w"].reshape(1, -1),
        "ln1": jnp.stack(ln1_l), "ln2": jnp.stack(ln2_l),          # (Lyr, 1, H) f32
        "wd": jnp.stack(wd_l), "wu": jnp.stack(wu_l),              # bf16
        "wo": jnp.stack(wo_l), "wr": jnp.stack(wr_l),              # bf16
        "rb": jnp.stack(rb_l),                                     # (Lyr, 1, nr) f32
        "wgu": jnp.stack(wgu_l), "wdn": jnp.stack(wdn_l),          # (Lyr*E, ., .) bf16
    }


# ----------------------------- deterministic init ------------------------------
def init_params(key):
    std = CFG.initializer_range
    H, I, L = CFG.hidden_size, CFG.intermediate_size, LATENT_DIM
    nh, nkv, hd = CFG.num_attention_heads, CFG.num_key_value_heads, HEAD_DIM

    def lin(k, fan_in, fan_out):
        return jax.random.normal(k, (fan_in, fan_out), jnp.float32) * std

    keys = jax.random.split(key, 1 + CFG.num_hidden_layers)
    params = {
        "embed": jax.random.normal(keys[0], (CFG.vocab_size, H), jnp.float32) * std,
        "norm_w": jnp.ones((H,), jnp.float32),
        "layers": [],
    }
    for li in range(CFG.num_hidden_layers):
        lk = jax.random.split(keys[1 + li], 16)
        routed = []
        for e in range(NUM_ROUTED):
            ek = jax.random.split(lk[9 + e], 3)
            routed.append((lin(ek[0], H, I), lin(ek[1], H, I), lin(ek[2], I, H)))
        lp = {
            "ln1_w": jnp.ones((H,), jnp.float32),
            "ln2_w": jnp.ones((H,), jnp.float32),
            "q_proj_d": lin(lk[0], H, L),
            "kv_proj_d": lin(lk[1], H, L),
            "q_proj_u": lin(lk[2], L, nh * hd),
            "k_proj_u": lin(lk[3], L, nkv * hd),
            "v_proj_u": lin(lk[4], L, nkv * hd),
            "o_proj": lin(lk[5], nh * hd, H),
            "shared_expert": (lin(lk[6], H, I), lin(lk[7], H, I), lin(lk[8], I, H)),
            "routed_experts": routed,
            "router_w": lin(lk[12], H, NUM_ROUTED),
            "routing_bias": jnp.zeros((NUM_ROUTED,), jnp.float32),
        }
        params["layers"].append(lp)
    return params


# ----------------------------- main --------------------------------------------
if __name__ == "__main__":
    key = jax.random.PRNGKey(0)
    pkey, ikey = jax.random.split(key)
    raw_params = init_params(pkey)
    params = prepare_params(raw_params)          # one-time host-side weight fusion

    batch, seq = 2, 8
    input_ids = jax.random.randint(ikey, (batch, seq), 0, CFG.vocab_size, dtype=jnp.int32)

    fwd = jax.jit(model_forward)
    out = fwd(params, input_ids)
    jax.block_until_ready(out)

    assert out.shape == (batch, seq, CFG.hidden_size)
    assert bool(jnp.all(jnp.isfinite(out)))
    print("KERNEL_OK")
</pallas_src>

<mosaic_0001>
module attributes {stable_mosaic.version = 11 : i64} {
  func.func @_model_kernel(%arg0: memref<16x64xf32, #tpu.memory_space<vmem>>, %arg1: memref<8x16xf32, #tpu.memory_space<vmem>>, %arg2: memref<8x16xf32, #tpu.memory_space<vmem>>, %arg3: memref<2x1x64xf32, #tpu.memory_space<vmem>>, %arg4: memref<2x64x16xbf16, #tpu.memory_space<vmem>>, %arg5: memref<2x16x256xbf16, #tpu.memory_space<vmem>>, %arg6: memref<2x64x64xbf16, #tpu.memory_space<vmem>>, %arg7: memref<2x1x64xf32, #tpu.memory_space<vmem>>, %arg8: memref<2x64x3xbf16, #tpu.memory_space<vmem>>, %arg9: memref<2x1x3xf32, #tpu.memory_space<vmem>>, %arg10: memref<8x64x256xbf16, #tpu.memory_space<vmem>>, %arg11: memref<8x128x64xbf16, #tpu.memory_space<vmem>>, %arg12: memref<1x64xf32, #tpu.memory_space<vmem>>, %arg13: memref<16x64xf32, #tpu.memory_space<vmem>>, %arg14: memref<16x64xf32, #tpu.memory_space<vmem>>) attributes {dimension_semantics = [], scalar_prefetch = 0 : i64, scratch_operands = 1 : i64, tpu.core_type = #tpu.core_type<tc>} {
    %c0 = arith.constant 0 : index
    %c0_0 = arith.constant 0 : index
    %0 = vector.load %arg1[%c0, %c0_0] : memref<8x16xf32, #tpu.memory_space<vmem>>, vector<8x16xf32>
    %c0_1 = arith.constant 0 : index
    %c0_2 = arith.constant 0 : index
    %1 = vector.load %arg2[%c0_1, %c0_2] : memref<8x16xf32, #tpu.memory_space<vmem>>, vector<8x16xf32>
    %2 = tpu.iota {dimensions = array<i32: 0>} : vector<8x8xi32>
    %3 = tpu.iota {dimensions = array<i32: 1>} : vector<8x8xi32>
    %4 = arith.cmpi sle, %3, %2 : vector<8x8xi32>
    %5 = tpu.iota {dimensions = array<i32: 1>} : vector<16x3xi32>
    %c0_3 = arith.constant 0 : index
    %c0_4 = arith.constant 0 : index
    %6 = vector.load %arg0[%c0_3, %c0_4] : memref<16x64xf32, #tpu.memory_space<vmem>>, vector<16x64xf32>
    %7 = arith.mulf %6, %6 : vector<16x64xf32>
    %cst = arith.constant dense<0.000000e+00> : vector<16xf32>
    %8 = vector.multi_reduction <add>, %7, %cst [1] : vector<16x64xf32> to vector<16xf32>
    %9 = vector.shape_cast %8 : vector<16xf32> to vector<16x1xf32>
    %cst_5 = arith.constant 6.400000e+01 : f32
    %10 = vector.broadcast %cst_5 : f32 to vector<16x1xf32>
    %11 = arith.divf %9, %10 : vector<16x1xf32>
    %cst_6 = arith.constant 9.99999974E-6 : f32
    %12 = vector.broadcast %cst_6 : f32 to vector<16x1xf32>
    %13 = arith.addf %11, %12 : vector<16x1xf32>
    %14 = math.rsqrt %13 : vector<16x1xf32>
    %15 = vector.broadcast %14 : vector<16x1xf32> to vector<16x64xf32>
    %16 = arith.mulf %6, %15 : vector<16x64xf32>
    %c0_7 = arith.constant 0 : index
    %c0_8 = arith.constant 0 : index
    %c0_9 = arith.constant 0 : index
    %17 = vector.load %arg3[%c0_7, %c0_8, %c0_9] : memref<2x1x64xf32, #tpu.memory_space<vmem>>, vector<1x1x64xf32>
    %18 = vector.shape_cast %17 : vector<1x1x64xf32> to vector<1x64xf32>
    %19 = vector.broadcast %18 : vector<1x64xf32> to vector<16x64xf32>
    %20 = arith.mulf %16, %19 : vector<16x64xf32>
    %21 = arith.truncf %20 : vector<16x64xf32> to vector<16x64xbf16>
    %c0_10 = arith.constant 0 : index
    %c0_11 = arith.constant 0 : index
    %c0_12 = arith.constant 0 : index
    %22 = vector.load %arg4[%c0_10, %c0_11, %c0_12] : memref<2x64x16xbf16, #tpu.memory_space<vmem>>, vector<1x64x16xbf16>
    %23 = vector.shape_cast %22 : vector<1x64x16xbf16> to vector<64x16xbf16>
    %cst_13 = arith.constant dense<0.000000e+00> : vector<16x16xf32>
    %24 = tpu.matmul %21, %23, %cst_13 {dimension_numbers = #tpu.dot_dimension_numbers<[1], [0], [0], [1], [0, 0, 1, 1], [], []>} : vector<16x64xbf16>, vector<64x16xbf16>, vector<16x16xf32> -> vector<16x16xf32>
    %25 = arith.truncf %24 : vector<16x16xf32> to vector<16x16xbf16>
    %c0_14 = arith.constant 0 : index
    %c0_15 = arith.constant 0 : index
    %c0_16 = arith.constant 0 : index
    %26 = vector.load %arg5[%c0_14, %c0_15, %c0_16] : memref<2x16x256xbf16, #tpu.memory_space<vmem>>, vector<1x16x256xbf16>
    %27 = vector.shape_cast %26 : vector<1x16x256xbf16> to vector<16x256xbf16>
    %cst_17 = arith.constant dense<0.000000e+00> : vector<16x256xf32>
    %28 = tpu.matmul %25, %27, %cst_17 {dimension_numbers = #tpu.dot_dimension_numbers<[1], [0], [0], [1], [0, 0, 1, 1], [], []>} : vector<16x16xbf16>, vector<16x256xbf16>, vector<16x256xf32> -> vector<16x256xf32>
    %29 = vector.extract_strided_slice %28 {offsets = [0, 128], sizes = [8, 16], strides = [1, 1]} : vector<16x256xf32> to vector<8x16xf32>
    %30 = vector.extract_strided_slice %28 {offsets = [0, 160], sizes = [8, 16], strides = [1, 1]} : vector<16x256xf32> to vector<8x16xf32>
    %31 = arith.mulf %29, %0 : vector<8x16xf32>
    %32 = arith.mulf %30, %1 : vector<8x16xf32>
    %33 = arith.addf %31, %32 : vector<8x16xf32>
    %34 = arith.truncf %33 : vector<8x16xf32> to vector<8x16xbf16>
    %35 = vector.extract_strided_slice %28 {offsets = [0, 192], sizes = [8, 16], strides = [1, 1]} : vector<16x256xf32> to vector<8x16xf32>
    %36 = arith.truncf %35 : vector<8x16xf32> to vector<8x16xbf16>
    %37 = vector.extract_strided_slice %28 {offsets = [0, 0], sizes = [8, 16], strides = [1, 1]} : vector<16x256xf32> to vector<8x16xf32>
    %38 = vector.extract_strided_slice %28 {offsets = [0, 64], sizes = [8, 16], strides = [1, 1]} : vector<16x256xf32> to vector<8x16xf32>
    %39 = arith.mulf %37, %0 : vector<8x16xf32>
    %40 = arith.mulf %38, %1 : vector<8x16xf32>
    %41 = arith.addf %39, %40 : vector<8x16xf32>
    %42 = arith.truncf %41 : vector<8x16xf32> to vector<8x16xbf16>
    %cst_18 = arith.constant dense<0.000000e+00> : vector<8x8xf32>
    %43 = tpu.matmul %42, %34, %cst_18 {dimension_numbers = #tpu.dot_dimension_numbers<[1], [1], [0], [0], [0, 0, 1, 0], [], []>} : vector<8x16xbf16>, vector<8x16xbf16>, vector<8x8xf32> -> vector<8x8xf32>
    %cst_19 = arith.constant 2.500000e-01 : f32
    %44 = vector.broadcast %cst_19 : f32 to vector<8x8xf32>
    %45 = arith.mulf %43, %44 : vector<8x8xf32>
    %cst_20 = arith.constant 0xFF800000 : f32
    %46 = vector.broadcast %cst_20 : f32 to vector<8x8xf32>
    %47 = arith.select %4, %45, %46 : vector<8x8xi1>, vector<8x8xf32>
    %cst_21 = arith.constant dense<0xFF800000> : vector<8xf32>
    %48 = vector.multi_reduction <maximumf>, %47, %cst_21 [1] : vector<8x8xf32> to vector<8xf32>
    %49 = vector.shape_cast %48 : vector<8xf32> to vector<8x1xf32>
    %50 = vector.broadcast %49 : vector<8x1xf32> to vector<8x8xf32>
    %51 = arith.subf %47, %50 : vector<8x8xf32>
    %52 = math.exp %51 : vector<8x8xf32>
    %cst_22 = arith.constant dense<0.000000e+00> : vector<8xf32>
    %53 = vector.multi_reduction <add>, %52, %cst_22 [1] : vector<8x8xf32> to vector<8xf32>
    %54 = vector.shape_cast %53 : vector<8xf32> to vector<8x1xf32>
    %55 = tpu.reciprocal %54 {approx = true} : vector<8x1xf32> -> vector<8x1xf32>
    %56 = vector.broadcast %55 : vector<8x1xf32> to vector<8x8xf32>
    %57 = arith.mulf %52, %56 : vector<8x8xf32>
    %58 = arith.truncf %57 : vector<8x8xf32> to vector<8x8xbf16>
    %cst_23 = arith.constant dense<0.000000e+00> : vector<8x16xf32>
    %59 = tpu.matmul %58, %36, %cst_23 {dimension_numbers = #tpu.dot_dimension_numbers<[1], [0], [0], [1], [0, 0, 1, 1], [], []>} : vector<8x8xbf16>, vector<8x16xbf16>, vector<8x16xf32> -> vector<8x16xf32>
    %c0_24 = arith.constant 0 : index
    %c0_25 = arith.constant 0 : index
    %60 = vector.load %arg14[%c0_24, %c0_25] : memref<16x64xf32, #tpu.memory_space<vmem>>, vector<8x16xf32>
    tpu.vector_store %arg14[%c0_24, %c0_25], %59 {strides = array<i32>} : memref<16x64xf32, #tpu.memory_space<vmem>>, vector<8x16xf32>,
    %61 = vector.extract_strided_slice %28 {offsets = [0, 16], sizes = [8, 16], strides = [1, 1]} : vector<16x256xf32> to vector<8x16xf32>
    %62 = vector.extract_strided_slice %28 {offsets = [0, 80], sizes = [8, 16], strides = [1, 1]} : vector<16x256xf32> to vector<8x16xf32>
    %63 = arith.mulf %61, %0 : vector<8x16xf32>
    %64 = arith.mulf %62, %1 : vector<8x16xf32>
    %65 = arith.addf %63, %64 : vector<8x16xf32>
    %66 = arith.truncf %65 : vector<8x16xf32> to vector<8x16xbf16>
    %cst_26 = arith.constant dense<0.000000e+00> : vector<8x8xf32>
    %67 = tpu.matmul %66, %34, %cst_26 {dimension_numbers = #tpu.dot_dimension_numbers<[1], [1], [0], [0], [0, 0, 1, 0], [], []>} : vector<8x16xbf16>, vector<8x16xbf16>, vector<8x8xf32> -> vector<8x8xf32>
    %cst_27 = arith.constant 2.500000e-01 : f32
    %68 = vector.broadcast %cst_27 : f32 to vector<8x8xf32>
    %69 = arith.mulf %67, %68 : vector<8x8xf32>
    %cst_28 = arith.constant 0xFF800000 : f32
    %70 = vector.broadcast %cst_28 : f32 to vector<8x8xf32>
    %71 = arith.select %4, %69, %70 : vector<8x8xi1>, vector<8x8xf32>
    %cst_29 = arith.constant dense<0xFF800000> : vector<8xf32>
    %72 = vector.multi_reduction <maximumf>, %71, %cst_29 [1] : vector<8x8xf32> to vector<8xf32>
    %73 = vector.shape_cast %72 : vector<8xf32> to vector<8x1xf32>
    %74 = vector.broadcast %73 : vector<8x1xf32> to vector<8x8xf32>
    %75 = arith.subf %71, %74 : vector<8x8xf32>
    %76 = math.exp %75 : vector<8x8xf32>
    %cst_30 = arith.constant dense<0.000000e+00> : vector<8xf32>
    %77 = vector.multi_reduction <add>, %76, %cst_30 [1] : vector<8x8xf32> to vector<8xf32>
    %78 = vector.shape_cast %77 : vector<8xf32> to vector<8x1xf32>
    %79 = tpu.reciprocal %78 {approx = true} : vector<8x1xf32> -> vector<8x1xf32>
    %80 = vector.broadcast %79 : vector<8x1xf32> to vector<8x8xf32>
    %81 = arith.mulf %76, %80 : vector<8x8xf32>
    %82 = arith.truncf %81 : vector<8x8xf32> to vector<8x8xbf16>
    %cst_31 = arith.constant dense<0.000000e+00> : vector<8x16xf32>
    %83 = tpu.matmul %82, %36, %cst_31 {dimension_numbers = #tpu.dot_dimension_numbers<[1], [0], [0], [1], [0, 0, 1, 1], [], []>} : vector<8x8xbf16>, vector<8x16xbf16>, vector<8x16xf32> -> vector<8x16xf32>
    %c0_32 = arith.constant 0 : index
    %c16 = arith.constant 16 : index
    %84 = vector.load %arg14[%c0_32, %c16] : memref<16x64xf32, #tpu.memory_space<vmem>>, vector<8x16xf32>
    tpu.vector_store %arg14[%c0_32, %c16], %83 {strides = array<i32>} : memref<16x64xf32, #tpu.memory_space<vmem>>, vector<8x16xf32>,
    %85 = vector.extract_strided_slice %28 {offsets = [0, 144], sizes = [8, 16], strides = [1, 1]} : vector<16x256xf32> to vector<8x16xf32>
    %86 = vector.extract_strided_slice %28 {offsets = [0, 176], sizes = [8, 16], strides = [1, 1]} : vector<16x256xf32> to vector<8x16xf32>
    %87 = arith.mulf %85, %0 : vector<8x16xf32>
    %88 = arith.mulf %86, %1 : vector<8x16xf32>
    %89 = arith.addf %87, %88 : vector<8x16xf32>
    %90 = arith.truncf %89 : vector<8x16xf32> to vector<8x16xbf16>
    %91 = vector.extract_strided_slice %28 {offsets = [0, 208], sizes = [8, 16], strides = [1, 1]} : vector<16x256xf32> to vector<8x16xf32>
    %92 = arith.truncf %91 : vector<8x16xf32> to vector<8x16xbf16>
    %93 = vector.extract_strided_slice %28 {offsets = [0, 32], sizes = [8, 16], strides = [1, 1]} : vector<16x256xf32> to vector<8x16xf32>
    %94 = vector.extract_strided_slice %28 {offsets = [0, 96], sizes = [8, 16], strides = [1, 1]} : vector<16x256xf32> to vector<8x16xf32>
    %95 = arith.mulf %93, %0 : vector<8x16xf32>
    %96 = arith.mulf %94, %1 : vector<8x16xf32>
    %97 = arith.addf %95, %96 : vector<8x16xf32>
    %98 = arith.truncf %97 : vector<8x16xf32> to vector<8x16xbf16>
    %cst_33 = arith.constant dense<0.000000e+00> : vector<8x8xf32>
    %99 = tpu.matmul %98, %90, %cst_33 {dimension_numbers = #tpu.dot_dimension_numbers<[1], [1], [0], [0], [0, 0, 1, 0], [], []>} : vector<8x16xbf16>, vector<8x16xbf16>, vector<8x8xf32> -> vector<8x8xf32>
    %cst_34 = arith.constant 2.500000e-01 : f32
    %100 = vector.broadcast %cst_34 : f32 to vector<8x8xf32>
    %101 = arith.mulf %99, %100 : vector<8x8xf32>
    %cst_35 = arith.constant 0xFF800000 : f32
    %102 = vector.broadcast %cst_35 : f32 to vector<8x8xf32>
    %103 = arith.select %4, %101, %102 : vector<8x8xi1>, vector<8x8xf32>
    %cst_36 = arith.constant dense<0xFF800000> : vector<8xf32>
    %104 = vector.multi_reduction <maximumf>, %103, %cst_36 [1] : vector<8x8xf32> to vector<8xf32>
    %105 = vector.shape_cast %104 : vector<8xf32> to vector<8x1xf32>
    %106 = vector.broadcast %105 : vector<8x1xf32> to vector<8x8xf32>
    %107 = arith.subf %103, %106 : vector<8x8xf32>
    %108 = math.exp %107 : vector<8x8xf32>
    %cst_37 = arith.constant dense<0.000000e+00> : vector<8xf32>
    %109 = vector.multi_reduction <add>, %108, %cst_37 [1] : vector<8x8xf32> to vector<8xf32>
    %110 = vector.shape_cast %109 : vector<8xf32> to vector<8x1xf32>
    %111 = tpu.reciprocal %110 {approx = true} : vector<8x1xf32> -> vector<8x1xf32>
    %112 = vector.broadcast %111 : vector<8x1xf32> to vector<8x8xf32>
    %113 = arith.mulf %108, %112 : vector<8x8xf32>
    %114 = arith.truncf %113 : vector<8x8xf32> to vector<8x8xbf16>
    %cst_38 = arith.constant dense<0.000000e+00> : vector<8x16xf32>
    %115 = tpu.matmul %114, %92, %cst_38 {dimension_numbers = #tpu.dot_dimension_numbers<[1], [0], [0], [1], [0, 0, 1, 1], [], []>} : vector<8x8xbf16>, vector<8x16xbf16>, vector<8x16xf32> -> vector<8x16xf32>
    %c0_39 = arith.constant 0 : index
    %c32 = arith.constant 32 : index
    %116 = vector.load %arg14[%c0_39, %c32] : memref<16x64xf32, #tpu.memory_space<vmem>>, vector<8x16xf32>
    tpu.vector_store %arg14[%c0_39, %c32], %115 {strides = array<i32>} : memref<16x64xf32, #tpu.memory_space<vmem>>, vector<8x16xf32>,
    %117 = vector.extract_strided_slice %28 {offsets = [0, 48], sizes = [8, 16], strides = [1, 1]} : vector<16x256xf32> to vector<8x16xf32>
    %118 = vector.extract_strided_slice %28 {offsets = [0, 112], sizes = [8, 16], strides = [1, 1]} : vector<16x256xf32> to vector<8x16xf32>
    %119 = arith.mulf %117, %0 : vector<8x16xf32>
    %120 = arith.mulf %118, %1 : vector<8x16xf32>
    %121 = arith.addf %119, %120 : vector<8x16xf32>
    %122 = arith.truncf %121 : vector<8x16xf32> to vector<8x16xbf16>
    %cst_40 = arith.constant dense<0.000000e+00> : vector<8x8xf32>
    %123 = tpu.matmul %122, %90, %cst_40 {dimension_numbers = #tpu.dot_dimension_numbers<[1], [1], [0], [0], [0, 0, 1, 0], [], []>} : vector<8x16xbf16>, vector<8x16xbf16>, vector<8x8xf32> -> vector<8x8xf32>
    %cst_41 = arith.constant 2.500000e-01 : f32
    %124 = vector.broadcast %cst_41 : f32 to vector<8x8xf32>
    %125 = arith.mulf %123, %124 : vector<8x8xf32>
    %cst_42 = arith.constant 0xFF800000 : f32
    %126 = vector.broadcast %cst_42 : f32 to vector<8x8xf32>
    %127 = arith.select %4, %125, %126 : vector<8x8xi1>, vector<8x8xf32>
    %cst_43 = arith.constant dense<0xFF800000> : vector<8xf32>
    %128 = vector.multi_reduction <maximumf>, %127, %cst_43 [1] : vector<8x8xf32> to vector<8xf32>
    %129 = vector.shape_cast %128 : vector<8xf32> to vector<8x1xf32>
    %130 = vector.broadcast %129 : vector<8x1xf32> to vector<8x8xf32>
    %131 = arith.subf %127, %130 : vector<8x8xf32>
    %132 = math.exp %131 : vector<8x8xf32>
    %cst_44 = arith.constant dense<0.000000e+00> : vector<8xf32>
    %133 = vector.multi_reduction <add>, %132, %cst_44 [1] : vector<8x8xf32> to vector<8xf32>
    %134 = vector.shape_cast %133 : vector<8xf32> to vector<8x1xf32>
    %135 = tpu.reciprocal %134 {approx = true} : vector<8x1xf32> -> vector<8x1xf32>
    %136 = vector.broadcast %135 : vector<8x1xf32> to vector<8x8xf32>
    %137 = arith.mulf %132, %136 : vector<8x8xf32>
    %138 = arith.truncf %137 : vector<8x8xf32> to vector<8x8xbf16>
    %cst_45 = arith.constant dense<0.000000e+00> : vector<8x16xf32>
    %139 = tpu.matmul %138, %92, %cst_45 {dimension_numbers = #tpu.dot_dimension_numbers<[1], [0], [0], [1], [0, 0, 1, 1], [], []>} : vector<8x8xbf16>, vector<8x16xbf16>, vector<8x16xf32> -> vector<8x16xf32>
    %c0_46 = arith.constant 0 : index
    %c48 = arith.constant 48 : index
    %140 = vector.load %arg14[%c0_46, %c48] : memref<16x64xf32, #tpu.memory_space<vmem>>, vector<8x16xf32>
    tpu.vector_store %arg14[%c0_46, %c48], %139 {strides = array<i32>} : memref<16x64xf32, #tpu.memory_space<vmem>>, vector<8x16xf32>,
    %141 = vector.extract_strided_slice %28 {offsets = [8, 128], sizes = [8, 16], strides = [1, 1]} : vector<16x256xf32> to vector<8x16xf32>
    %142 = vector.extract_strided_slice %28 {offsets = [8, 160], sizes = [8, 16], strides = [1, 1]} : vector<16x256xf32> to vector<8x16xf32>
    %143 = arith.mulf %141, %0 : vector<8x16xf32>
    %144 = arith.mulf %142, %1 : vector<8x16xf32>
    %145 = arith.addf %143, %144 : vector<8x16xf32>
    %146 = arith.truncf %145 : vector<8x16xf32> to vector<8x16xbf16>
    %147 = vector.extract_strided_slice %28 {offsets = [8, 192], sizes = [8, 16], strides = [1, 1]} : vector<16x256xf32> to vector<8x16xf32>
    %148 = arith.truncf %147 : vector<8x16xf32> to vector<8x16xbf16>
    %149 = vector.extract_strided_slice %28 {offsets = [8, 0], sizes = [8, 16], strides = [1, 1]} : vector<16x256xf32> to vector<8x16xf32>
    %150 = vector.extract_strided_slice %28 {offsets = [8, 64], sizes = [8, 16], strides = [1, 1]} : vector<16x256xf32> to vector<8x16xf32>
    %151 = arith.mulf %149, %0 : vector<8x16xf32>
    %152 = arith.mulf %150, %1 : vector<8x16xf32>
    %153 = arith.addf %151, %152 : vector<8x16xf32>
    %154 = arith.truncf %153 : vector<8x16xf32> to vector<8x16xbf16>
    %cst_47 = arith.constant dense<0.000000e+00> : vector<8x8xf32>
    %155 = tpu.matmul %154, %146, %cst_47 {dimension_numbers = #tpu.dot_dimension_numbers<[1], [1], [0], [0], [0, 0, 1, 0], [], []>} : vector<8x16xbf16>, vector<8x16xbf16>, vector<8x8xf32> -> vector<8x8xf32>
    %cst_48 = arith.constant 2.500000e-01 : f32
    %156 = vector.broadcast %cst_48 : f32 to vector<8x8xf32>
    %157 = arith.mulf %155, %156 : vector<8x8xf32>
    %cst_49 = arith.constant 0xFF800000 : f32
    %158 = vector.broadcast %cst_49 : f32 to vector<8x8xf32>
    %159 = arith.select %4, %157, %158 : vector<8x8xi1>, vector<8x8xf32>
    %cst_50 = arith.constant dense<0xFF800000> : vector<8xf32>
    %160 = vector.multi_reduction <maximumf>, %159, %cst_50 [1] : vector<8x8xf32> to vector<8xf32>
    %161 = vector.shape_cast %160 : vector<8xf32> to vector<8x1xf32>
    %162 = vector.broadcast %161 : vector<8x1xf32> to vector<8x8xf32>
    %163 = arith.subf %159, %162 : vector<8x8xf32>
    %164 = math.exp %163 : vector<8x8xf32>
    %cst_51 = arith.constant dense<0.000000e+00> : vector<8xf32>
    %165 = vector.multi_reduction <add>, %164, %cst_51 [1] : vector<8x8xf32> to vector<8xf32>
    %166 = vector.shape_cast %165 : vector<8xf32> to vector<8x1xf32>
    %167 = tpu.reciprocal %166 {approx = true} : vector<8x1xf32> -> vector<8x1xf32>
    %168 = vector.broadcast %167 : vector<8x1xf32> to vector<8x8xf32>
    %169 = arith.mulf %164, %168 : vector<8x8xf32>
    %170 = arith.truncf %169 : vector<8x8xf32> to vector<8x8xbf16>
    %cst_52 = arith.constant dense<0.000000e+00> : vector<8x16xf32>
    %171 = tpu.matmul %170, %148, %cst_52 {dimension_numbers = #tpu.dot_dimension_numbers<[1], [0], [0], [1], [0, 0, 1, 1], [], []>} : vector<8x8xbf16>, vector<8x16xbf16>, vector<8x16xf32> -> vector<8x16xf32>
    %c8 = arith.constant 8 : index
    %c0_53 = arith.constant 0 : index
    %172 = vector.load %arg14[%c8, %c0_53] : memref<16x64xf32, #tpu.memory_space<vmem>>, vector<8x16xf32>
    tpu.vector_store %arg14[%c8, %c0_53], %171 {strides = array<i32>} : memref<16x64xf32, #tpu.memory_space<vmem>>, vector<8x16xf32>,
    %173 = vector.extract_strided_slice %28 {offsets = [8, 16], sizes = [8, 16], strides = [1, 1]} : vector<16x256xf32> to vector<8x16xf32>
    %174 = vector.extract_strided_slice %28 {offsets = [8, 80], sizes = [8, 16], strides = [1, 1]} : vector<16x256xf32> to vector<8x16xf32>
    %175 = arith.mulf %173, %0 : vector<8x16xf32>
    %176 = arith.mulf %174, %1 : vector<8x16xf32>
    %177 = arith.addf %175, %176 : vector<8x16xf32>
    %178 = arith.truncf %177 : vector<8x16xf32> to vector<8x16xbf16>
    %cst_54 = arith.constant dense<0.000000e+00> : vector<8x8xf32>
    %179 = tpu.matmul %178, %146, %cst_54 {dimension_numbers = #tpu.dot_dimension_numbers<[1], [1], [0], [0], [0, 0, 1, 0], [], []>} : vector<8x16xbf16>, vector<8x16xbf16>, vector<8x8xf32> -> vector<8x8xf32>
    %cst_55 = arith.constant 2.500000e-01 : f32
    %180 = vector.broadcast %cst_55 : f32 to vector<8x8xf32>
    %181 = arith.mulf %179, %180 : vector<8x8xf32>
    %cst_56 = arith.constant 0xFF800000 : f32
    %182 = vector.broadcast %cst_56 : f32 to vector<8x8xf32>
    %183 = arith.select %4, %181, %182 : vector<8x8xi1>, vector<8x8xf32>
    %cst_57 = arith.constant dense<0xFF800000> : vector<8xf32>
    %184 = vector.multi_reduction <maximumf>, %183, %cst_57 [1] : vector<8x8xf32> to vector<8xf32>
    %185 = vector.shape_cast %184 : vector<8xf32> to vector<8x1xf32>
    %186 = vector.broadcast %185 : vector<8x1xf32> to vector<8x8xf32>
    %187 = arith.subf %183, %186 : vector<8x8xf32>
    %188 = math.exp %187 : vector<8x8xf32>
    %cst_58 = arith.constant dense<0.000000e+00> : vector<8xf32>
    %189 = vector.multi_reduction <add>, %188, %cst_58 [1] : vector<8x8xf32> to vector<8xf32>
    %190 = vector.shape_cast %189 : vector<8xf32> to vector<8x1xf32>
    %191 = tpu.reciprocal %190 {approx = true} : vector<8x1xf32> -> vector<8x1xf32>
    %192 = vector.broadcast %191 : vector<8x1xf32> to vector<8x8xf32>
    %193 = arith.mulf %188, %192 : vector<8x8xf32>
    %194 = arith.truncf %193 : vector<8x8xf32> to vector<8x8xbf16>
    %cst_59 = arith.constant dense<0.000000e+00> : vector<8x16xf32>
    %195 = tpu.matmul %194, %148, %cst_59 {dimension_numbers = #tpu.dot_dimension_numbers<[1], [0], [0], [1], [0, 0, 1, 1], [], []>} : vector<8x8xbf16>, vector<8x16xbf16>, vector<8x16xf32> -> vector<8x16xf32>
    %c8_60 = arith.constant 8 : index
    %c16_61 = arith.constant 16 : index
    %196 = vector.load %arg14[%c8_60, %c16_61] : memref<16x64xf32, #tpu.memory_space<vmem>>, vector<8x16xf32>
    tpu.vector_store %arg14[%c8_60, %c16_61], %195 {strides = array<i32>} : memref<16x64xf32, #tpu.memory_space<vmem>>, vector<8x16xf32>,
    %197 = vector.extract_strided_slice %28 {offsets = [8, 144], sizes = [8, 16], strides = [1, 1]} : vector<16x256xf32> to vector<8x16xf32>
    %198 = vector.extract_strided_slice %28 {offsets = [8, 176], sizes = [8, 16], strides = [1, 1]} : vector<16x256xf32> to vector<8x16xf32>
    %199 = arith.mulf %197, %0 : vector<8x16xf32>
    %200 = arith.mulf %198, %1 : vector<8x16xf32>
    %201 = arith.addf %199, %200 : vector<8x16xf32>
    %202 = arith.truncf %201 : vector<8x16xf32> to vector<8x16xbf16>
    %203 = vector.extract_strided_slice %28 {offsets = [8, 208], sizes = [8, 16], strides = [1, 1]} : vector<16x256xf32> to vector<8x16xf32>
    %204 = arith.truncf %203 : vector<8x16xf32> to vector<8x16xbf16>
    %205 = vector.extract_strided_slice %28 {offsets = [8, 32], sizes = [8, 16], strides = [1, 1]} : vector<16x256xf32> to vector<8x16xf32>
    %206 = vector.extract_strided_slice %28 {offsets = [8, 96], sizes = [8, 16], strides = [1, 1]} : vector<16x256xf32> to vector<8x16xf32>
    %207 = arith.mulf %205, %0 : vector<8x16xf32>
    %208 = arith.mulf %206, %1 : vector<8x16xf32>
    %209 = arith.addf %207, %208 : vector<8x16xf32>
    %210 = arith.truncf %209 : vector<8x16xf32> to vector<8x16xbf16>
    %cst_62 = arith.constant dense<0.000000e+00> : vector<8x8xf32>
    %211 = tpu.matmul %210, %202, %cst_62 {dimension_numbers = #tpu.dot_dimension_numbers<[1], [1], [0], [0], [0, 0, 1, 0], [], []>} : vector<8x16xbf16>, vector<8x16xbf16>, vector<8x8xf32> -> vector<8x8xf32>
    %cst_63 = arith.constant 2.500000e-01 : f32
    %212 = vector.broadcast %cst_63 : f32 to vector<8x8xf32>
    %213 = arith.mulf %211, %212 : vector<8x8xf32>
    %cst_64 = arith.constant 0xFF800000 : f32
    %214 = vector.broadcast %cst_64 : f32 to vector<8x8xf32>
    %215 = arith.select %4, %213, %214 : vector<8x8xi1>, vector<8x8xf32>
    %cst_65 = arith.constant dense<0xFF800000> : vector<8xf32>
    %216 = vector.multi_reduction <maximumf>, %215, %cst_65 [1] : vector<8x8xf32> to vector<8xf32>
    %217 = vector.shape_cast %216 : vector<8xf32> to vector<8x1xf32>
    %218 = vector.broadcast %217 : vector<8x1xf32> to vector<8x8xf32>
    %219 = arith.subf %215, %218 : vector<8x8xf32>
    %220 = math.exp %219 : vector<8x8xf32>
    %cst_66 = arith.constant dense<0.000000e+00> : vector<8xf32>
    %221 = vector.multi_reduction <add>, %220, %cst_66 [1] : vector<8x8xf32> to vector<8xf32>
    %222 = vector.shape_cast %221 : vector<8xf32> to vector<8x1xf32>
    %223 = tpu.reciprocal %222 {approx = true} : vector<8x1xf32> -> vector<8x1xf32>
    %224 = vector.broadcast %223 : vector<8x1xf32> to vector<8x8xf32>
    %225 = arith.mulf %220, %224 : vector<8x8xf32>
    %226 = arith.truncf %225 : vector<8x8xf32> to vector<8x8xbf16>
    %cst_67 = arith.constant dense<0.000000e+00> : vector<8x16xf32>
    %227 = tpu.matmul %226, %204, %cst_67 {dimension_numbers = #tpu.dot_dimension_numbers<[1], [0], [0], [1], [0, 0, 1, 1], [], []>} : vector<8x8xbf16>, vector<8x16xbf16>, vector<8x16xf32> -> vector<8x16xf32>
    %c8_68 = arith.constant 8 : index
    %c32_69 = arith.constant 32 : index
    %228 = vector.load %arg14[%c8_68, %c32_69] : memref<16x64xf32, #tpu.memory_space<vmem>>, vector<8x16xf32>
    tpu.vector_store %arg14[%c8_68, %c32_69], %227 {strides = array<i32>} : memref<16x64xf32, #tpu.memory_space<vmem>>, vector<8x16xf32>,
    %229 = vector.extract_strided_slice %28 {offsets = [8, 48], sizes = [8, 16], strides = [1, 1]} : vector<16x256xf32> to vector<8x16xf32>
    %230 = vector.extract_strided_slice %28 {offsets = [8, 112], sizes = [8, 16], strides = [1, 1]} : vector<16x256xf32> to vector<8x16xf32>
    %231 = arith.mulf %229, %0 : vector<8x16xf32>
    %232 = arith.mulf %230, %1 : vector<8x16xf32>
    %233 = arith.addf %231, %232 : vector<8x16xf32>
    %234 = arith.truncf %233 : vector<8x16xf32> to vector<8x16xbf16>
    %cst_70 = arith.constant dense<0.000000e+00> : vector<8x8xf32>
    %235 = tpu.matmul %234, %202, %cst_70 {dimension_numbers = #tpu.dot_dimension_numbers<[1], [1], [0], [0], [0, 0, 1, 0], [], []>} : vector<8x16xbf16>, vector<8x16xbf16>, vector<8x8xf32> -> vector<8x8xf32>
    %cst_71 = arith.constant 2.500000e-01 : f32
    %236 = vector.broadcast %cst_71 : f32 to vector<8x8xf32>
    %237 = arith.mulf %235, %236 : vector<8x8xf32>
    %cst_72 = arith.constant 0xFF800000 : f32
    %238 = vector.broadcast %cst_72 : f32 to vector<8x8xf32>
    %239 = arith.select %4, %237, %238 : vector<8x8xi1>, vector<8x8xf32>
    %cst_73 = arith.constant dense<0xFF800000> : vector<8xf32>
    %240 = vector.multi_reduction <maximumf>, %239, %cst_73 [1] : vector<8x8xf32> to vector<8xf32>
    %241 = vector.shape_cast %240 : vector<8xf32> to vector<8x1xf32>
    %242 = vector.broadcast %241 : vector<8x1xf32> to vector<8x8xf32>
    %243 = arith.subf %239, %242 : vector<8x8xf32>
    %244 = math.exp %243 : vector<8x8xf32>
    %cst_74 = arith.constant dense<0.000000e+00> : vector<8xf32>
    %245 = vector.multi_reduction <add>, %244, %cst_74 [1] : vector<8x8xf32> to vector<8xf32>
    %246 = vector.shape_cast %245 : vector<8xf32> to vector<8x1xf32>
    %247 = tpu.reciprocal %246 {approx = true} : vector<8x1xf32> -> vector<8x1xf32>
    %248 = vector.broadcast %247 : vector<8x1xf32> to vector<8x8xf32>
    %249 = arith.mulf %244, %248 : vector<8x8xf32>
    %250 = arith.truncf %249 : vector<8x8xf32> to vector<8x8xbf16>
    %cst_75 = arith.constant dense<0.000000e+00> : vector<8x16xf32>
    %251 = tpu.matmul %250, %204, %cst_75 {dimension_numbers = #tpu.dot_dimension_numbers<[1], [0], [0], [1], [0, 0, 1, 1], [], []>} : vector<8x8xbf16>, vector<8x16xbf16>, vector<8x16xf32> -> vector<8x16xf32>
    %c8_76 = arith.constant 8 : index
    %c48_77 = arith.constant 48 : index
    %252 = vector.load %arg14[%c8_76, %c48_77] : memref<16x64xf32, #tpu.memory_space<vmem>>, vector<8x16xf32>
    tpu.vector_store %arg14[%c8_76, %c48_77], %251 {strides = array<i32>} : memref<16x64xf32, #tpu.memory_space<vmem>>, vector<8x16xf32>,
    %c0_78 = arith.constant 0 : index
    %c0_79 = arith.constant 0 : index
    %253 = vector.load %arg14[%c0_78, %c0_79] : memref<16x64xf32, #tpu.memory_space<vmem>>, vector<16x64xf32>
    %254 = arith.truncf %253 : vector<16x64xf32> to vector<16x64xbf16>
    %c0_80 = arith.constant 0 : index
    %c0_81 = arith.constant 0 : index
    %c0_82 = arith.constant 0 : index
    %255 = vector.load %arg6[%c0_80, %c0_81, %c0_82] : memref<2x64x64xbf16, #tpu.memory_space<vmem>>, vector<1x64x64xbf16>
    %256 = vector.shape_cast %255 : vector<1x64x64xbf16> to vector<64x64xbf16>
    %cst_83 = arith.constant dense<0.000000e+00> : vector<16x64xf32>
    %257 = tpu.matmul %254, %256, %cst_83 {dimension_numbers = #tpu.dot_dimension_numbers<[1], [0], [0], [1], [0, 0, 1, 1], [], []>} : vector<16x64xbf16>, vector<64x64xbf16>, vector<16x64xf32> -> vector<16x64xf32>
    %258 = arith.addf %6, %257 : vector<16x64xf32>
    %259 = arith.mulf %258, %258 : vector<16x64xf32>
    %cst_84 = arith.constant dense<0.000000e+00> : vector<16xf32>
    %260 = vector.multi_reduction <add>, %259, %cst_84 [1] : vector<16x64xf32> to vector<16xf32>
    %261 = vector.shape_cast %260 : vector<16xf32> to vector<16x1xf32>
    %cst_85 = arith.constant 6.400000e+01 : f32
    %262 = vector.broadcast %cst_85 : f32 to vector<16x1xf32>
    %263 = arith.divf %261, %262 : vector<16x1xf32>
    %cst_86 = arith.constant 9.99999974E-6 : f32
    %264 = vector.broadcast %cst_86 : f32 to vector<16x1xf32>
    %265 = arith.addf %263, %264 : vector<16x1xf32>
    %266 = math.rsqrt %265 : vector<16x1xf32>
    %267 = vector.broadcast %266 : vector<16x1xf32> to vector<16x64xf32>
    %268 = arith.mulf %258, %267 : vector<16x64xf32>
    %c0_87 = arith.constant 0 : index
    %c0_88 = arith.constant 0 : index
    %c0_89 = arith.constant 0 : index
    %269 = vector.load %arg7[%c0_87, %c0_88, %c0_89] : memref<2x1x64xf32, #tpu.memory_space<vmem>>, vector<1x1x64xf32>
    %270 = vector.shape_cast %269 : vector<1x1x64xf32> to vector<1x64xf32>
    %271 = vector.broadcast %270 : vector<1x64xf32> to vector<16x64xf32>
    %272 = arith.mulf %268, %271 : vector<16x64xf32>
    %273 = arith.truncf %272 : vector<16x64xf32> to vector<16x64xbf16>
    %c0_90 = arith.constant 0 : index
    %c0_91 = arith.constant 0 : index
    %c0_92 = arith.constant 0 : index
    %274 = vector.load %arg8[%c0_90, %c0_91, %c0_92] : memref<2x64x3xbf16, #tpu.memory_space<vmem>>, vector<1x64x3xbf16>
    %275 = vector.shape_cast %274 : vector<1x64x3xbf16> to vector<64x3xbf16>
    %cst_93 = arith.constant dense<0.000000e+00> : vector<16x3xf32>
    %276 = tpu.matmul %273, %275, %cst_93 {dimension_numbers = #tpu.dot_dimension_numbers<[1], [0], [0], [1], [0, 0, 1, 1], [], []>} : vector<16x64xbf16>, vector<64x3xbf16>, vector<16x3xf32> -> vector<16x3xf32>
    %c0_94 = arith.constant 0 : index
    %c0_95 = arith.constant 0 : index
    %c0_96 = arith.constant 0 : index
    %277 = vector.load %arg9[%c0_94, %c0_95, %c0_96] : memref<2x1x3xf32, #tpu.memory_space<vmem>>, vector<1x1x3xf32>
    %278 = vector.shape_cast %277 : vector<1x1x3xf32> to vector<1x3xf32>
    %279 = vector.broadcast %278 : vector<1x3xf32> to vector<16x3xf32>
    %280 = arith.addf %276, %279 : vector<16x3xf32>
    %281 = arith.negf %280 : vector<16x3xf32>
    %282 = math.exp %281 : vector<16x3xf32>
    %cst_97 = arith.constant 1.000000e+00 : f32
    %283 = vector.broadcast %cst_97 : f32 to vector<16x3xf32>
    %284 = arith.addf %283, %282 : vector<16x3xf32>
    %285 = arith.divf %283, %284 : vector<16x3xf32>
    %cst_98 = arith.constant 0.000000e+00 : f32
    %286 = vector.broadcast %cst_98 : f32 to vector<16x3xf32>
    %287 = vector.extract_strided_slice %285 {offsets = [0, 0], sizes = [16, 1], strides = [1, 1]} : vector<16x3xf32> to vector<16x1xf32>
    %288 = vector.broadcast %287 : vector<16x1xf32> to vector<16x3xf32>
    %289 = arith.cmpf ogt, %288, %285 : vector<16x3xf32>
    %290 = arith.extui %289 : vector<16x3xi1> to vector<16x3xi32>
    %291 = arith.sitofp %290 : vector<16x3xi32> to vector<16x3xf32>
    %292 = vector.broadcast %287 : vector<16x1xf32> to vector<16x3xf32>
    %293 = arith.cmpf oge, %292, %285 : vector<16x3xf32>
    %294 = arith.extui %293 : vector<16x3xi1> to vector<16x3xi32>
    %295 = arith.sitofp %294 : vector<16x3xi32> to vector<16x3xf32>
    %c0_i32 = arith.constant 0 : i32
    %296 = vector.broadcast %c0_i32 : i32 to vector<16x3xi32>
    %297 = arith.cmpi sgt, %5, %296 : vector<16x3xi32>
    %298 = arith.select %297, %295, %291 : vector<16x3xi1>, vector<16x3xf32>
    %299 = arith.addf %286, %298 : vector<16x3xf32>
    %300 = vector.extract_strided_slice %285 {offsets = [0, 1], sizes = [16, 1], strides = [1, 1]} : vector<16x3xf32> to vector<16x1xf32>
    %301 = vector.broadcast %300 : vector<16x1xf32> to vector<16x3xf32>
    %302 = arith.cmpf ogt, %301, %285 : vector<16x3xf32>
    %303 = arith.extui %302 : vector<16x3xi1> to vector<16x3xi32>
    %304 = arith.sitofp %303 : vector<16x3xi32> to vector<16x3xf32>
    %305 = vector.broadcast %300 : vector<16x1xf32> to vector<16x3xf32>
    %306 = arith.cmpf oge, %305, %285 : vector<16x3xf32>
    %307 = arith.extui %306 : vector<16x3xi1> to vector<16x3xi32>
    %308 = arith.sitofp %307 : vector<16x3xi32> to vector<16x3xf32>
    %c1_i32 = arith.constant 1 : i32
    %309 = vector.broadcast %c1_i32 : i32 to vector<16x3xi32>
    %310 = arith.cmpi sgt, %5, %309 : vector<16x3xi32>
    %311 = arith.select %310, %308, %304 : vector<16x3xi1>, vector<16x3xf32>
    %312 = arith.addf %299, %311 : vector<16x3xf32>
    %313 = vector.extract_strided_slice %285 {offsets = [0, 2], sizes = [16, 1], strides = [1, 1]} : vector<16x3xf32> to vector<16x1xf32>
    %314 = vector.broadcast %313 : vector<16x1xf32> to vector<16x3xf32>
    %315 = arith.cmpf ogt, %314, %285 : vector<16x3xf32>
    %316 = arith.extui %315 : vector<16x3xi1> to vector<16x3xi32>
    %317 = arith.sitofp %316 : vector<16x3xi32> to vector<16x3xf32>
    %318 = vector.broadcast %313 : vector<16x1xf32> to vector<16x3xf32>
    %319 = arith.cmpf oge, %318, %285 : vector<16x3xf32>
    %320 = arith.extui %319 : vector<16x3xi1> to vector<16x3xi32>
    %321 = arith.sitofp %320 : vector<16x3xi32> to vector<16x3xf32>
    %c2_i32 = arith.constant 2 : i32
    %322 = vector.broadcast %c2_i32 : i32 to vector<16x3xi32>
    %323 = arith.cmpi sgt, %5, %322 : vector<16x3xi32>
    %324 = arith.select %323, %321, %317 : vector<16x3xi1>, vector<16x3xf32>
    %325 = arith.addf %312, %324 : vector<16x3xf32>
    %cst_99 = arith.constant 2.000000e+00 : f32
    %326 = vector.broadcast %cst_99 : f32 to vector<16x3xf32>
    %327 = arith.cmpf olt, %325, %326 : vector<16x3xf32>
    %cst_100 = arith.constant 0.000000e+00 : f32
    %328 = vector.broadcast %cst_100 : f32 to vector<16x3xf32>
    %329 = arith.select %327, %285, %328 : vector<16x3xi1>, vector<16x3xf32>
    %cst_101 = arith.constant dense<0.000000e+00> : vector<16xf32>
    %330 = vector.multi_reduction <add>, %329, %cst_101 [1] : vector<16x3xf32> to vector<16xf32>
    %331 = vector.shape_cast %330 : vector<16xf32> to vector<16x1xf32>
    %332 = vector.broadcast %331 : vector<16x1xf32> to vector<16x3xf32>
    %333 = arith.divf %329, %332 : vector<16x3xf32>
    %c0_102 = arith.constant 0 : index
    %c0_103 = arith.constant 0 : index
    %c0_104 = arith.constant 0 : index
    %334 = vector.load %arg10[%c0_102, %c0_103, %c0_104] : memref<8x64x256xbf16, #tpu.memory_space<vmem>>, vector<1x64x256xbf16>
    %335 = vector.shape_cast %334 : vector<1x64x256xbf16> to vector<64x256xbf16>
    %cst_105 = arith.constant dense<0.000000e+00> : vector<16x256xf32>
    %336 = tpu.matmul %273, %335, %cst_105 {dimension_numbers = #tpu.dot_dimension_numbers<[1], [0], [0], [1], [0, 0, 1, 1], [], []>} : vector<16x64xbf16>, vector<64x256xbf16>, vector<16x256xf32> -> vector<16x256xf32>
    %337 = vector.extract_strided_slice %336 {offsets = [0, 0], sizes = [16, 128], strides = [1, 1]} : vector<16x256xf32> to vector<16x128xf32>
    %338 = vector.extract_strided_slice %336 {offsets = [0, 128], sizes = [16, 128], strides = [1, 1]} : vector<16x256xf32> to vector<16x128xf32>
    %339 = arith.negf %337 : vector<16x128xf32>
    %340 = math.exp %339 : vector<16x128xf32>
    %cst_106 = arith.constant 1.000000e+00 : f32
    %341 = vector.broadcast %cst_106 : f32 to vector<16x128xf32>
    %342 = arith.addf %341, %340 : vector<16x128xf32>
    %343 = arith.divf %341, %342 : vector<16x128xf32>
    %344 = arith.mulf %337, %343 : vector<16x128xf32>
    %345 = arith.mulf %344, %338 : vector<16x128xf32>
    %346 = arith.truncf %345 : vector<16x128xf32> to vector<16x128xbf16>
    %c0_107 = arith.constant 0 : index
    %c0_108 = arith.constant 0 : index
    %c0_109 = arith.constant 0 : index
    %347 = vector.load %arg11[%c0_107, %c0_108, %c0_109] : memref<8x128x64xbf16, #tpu.memory_space<vmem>>, vector<1x128x64xbf16>
    %348 = vector.shape_cast %347 : vector<1x128x64xbf16> to vector<128x64xbf16>
    %cst_110 = arith.constant dense<0.000000e+00> : vector<16x64xf32>
    %349 = tpu.matmul %346, %348, %cst_110 {dimension_numbers = #tpu.dot_dimension_numbers<[1], [0], [0], [1], [0, 0, 1, 1], [], []>} : vector<16x128xbf16>, vector<128x64xbf16>, vector<16x64xf32> -> vector<16x64xf32>
    %350 = arith.addf %258, %349 : vector<16x64xf32>
    %c1 = arith.constant 1 : index
    %c0_111 = arith.constant 0 : index
    %c0_112 = arith.constant 0 : index
    %351 = vector.load %arg10[%c1, %c0_111, %c0_112] : memref<8x64x256xbf16, #tpu.memory_space<vmem>>, vector<1x64x256xbf16>
    %352 = vector.shape_cast %351 : vector<1x64x256xbf16> to vector<64x256xbf16>
    %cst_113 = arith.constant dense<0.000000e+00> : vector<16x256xf32>
    %353 = tpu.matmul %273, %352, %cst_113 {dimension_numbers = #tpu.dot_dimension_numbers<[1], [0], [0], [1], [0, 0, 1, 1], [], []>} : vector<16x64xbf16>, vector<64x256xbf16>, vector<16x256xf32> -> vector<16x256xf32>
    %354 = vector.extract_strided_slice %353 {offsets = [0, 0], sizes = [16, 128], strides = [1, 1]} : vector<16x256xf32> to vector<16x128xf32>
    %355 = vector.extract_strided_slice %353 {offsets = [0, 128], sizes = [16, 128], strides = [1, 1]} : vector<16x256xf32> to vector<16x128xf32>
    %356 = arith.negf %354 : vector<16x128xf32>
    %357 = math.exp %356 : vector<16x128xf32>
    %cst_114 = arith.constant 1.000000e+00 : f32
    %358 = vector.broadcast %cst_114 : f32 to vector<16x128xf32>
    %359 = arith.addf %358, %357 : vector<16x128xf32>
    %360 = arith.divf %358, %359 : vector<16x128xf32>
    %361 = arith.mulf %354, %360 : vector<16x128xf32>
    %362 = arith.mulf %361, %355 : vector<16x128xf32>
    %363 = arith.truncf %362 : vector<16x128xf32> to vector<16x128xbf16>
    %c1_115 = arith.constant 1 : index
    %c0_116 = arith.constant 0 : index
    %c0_117 = arith.constant 0 : index
    %364 = vector.load %arg11[%c1_115, %c0_116, %c0_117] : memref<8x128x64xbf16, #tpu.memory_space<vmem>>, vector<1x128x64xbf16>
    %365 = vector.shape_cast %364 : vector<1x128x64xbf16> to vector<128x64xbf16>
    %cst_118 = arith.constant dense<0.000000e+00> : vector<16x64xf32>
    %366 = tpu.matmul %363, %365, %cst_118 {dimension_numbers = #tpu.dot_dimension_numbers<[1], [0], [0], [1], [0, 0, 1, 1], [], []>} : vector<16x128xbf16>, vector<128x64xbf16>, vector<16x64xf32> -> vector<16x64xf32>
    %367 = vector.extract_strided_slice %333 {offsets = [0, 0], sizes = [16, 1], strides = [1, 1]} : vector<16x3xf32> to vector<16x1xf32>
    %368 = vector.broadcast %367 : vector<16x1xf32> to vector<16x64xf32>
    %369 = arith.mulf %366, %368 : vector<16x64xf32>
    %370 = arith.addf %350, %369 : vector<16x64xf32>
    %c2 = arith.constant 2 : index
    %c0_119 = arith.constant 0 : index
    %c0_120 = arith.constant 0 : index
    %371 = vector.load %arg10[%c2, %c0_119, %c0_120] : memref<8x64x256xbf16, #tpu.memory_space<vmem>>, vector<1x64x256xbf16>
    %372 = vector.shape_cast %371 : vector<1x64x256xbf16> to vector<64x256xbf16>
    %cst_121 = arith.constant dense<0.000000e+00> : vector<16x256xf32>
    %373 = tpu.matmul %273, %372, %cst_121 {dimension_numbers = #tpu.dot_dimension_numbers<[1], [0], [0], [1], [0, 0, 1, 1], [], []>} : vector<16x64xbf16>, vector<64x256xbf16>, vector<16x256xf32> -> vector<16x256xf32>
    %374 = vector.extract_strided_slice %373 {offsets = [0, 0], sizes = [16, 128], strides = [1, 1]} : vector<16x256xf32> to vector<16x128xf32>
    %375 = vector.extract_strided_slice %373 {offsets = [0, 128], sizes = [16, 128], strides = [1, 1]} : vector<16x256xf32> to vector<16x128xf32>
    %376 = arith.negf %374 : vector<16x128xf32>
    %377 = math.exp %376 : vector<16x128xf32>
    %cst_122 = arith.constant 1.000000e+00 : f32
    %378 = vector.broadcast %cst_122 : f32 to vector<16x128xf32>
    %379 = arith.addf %378, %377 : vector<16x128xf32>
    %380 = arith.divf %378, %379 : vector<16x128xf32>
    %381 = arith.mulf %374, %380 : vector<16x128xf32>
    %382 = arith.mulf %381, %375 : vector<16x128xf32>
    %383 = arith.truncf %382 : vector<16x128xf32> to vector<16x128xbf16>
    %c2_123 = arith.constant 2 : index
    %c0_124 = arith.constant 0 : index
    %c0_125 = arith.constant 0 : index
    %384 = vector.load %arg11[%c2_123, %c0_124, %c0_125] : memref<8x128x64xbf16, #tpu.memory_space<vmem>>, vector<1x128x64xbf16>
    %385 = vector.shape_cast %384 : vector<1x128x64xbf16> to vector<128x64xbf16>
    %cst_126 = arith.constant dense<0.000000e+00> : vector<16x64xf32>
    %386 = tpu.matmul %383, %385, %cst_126 {dimension_numbers = #tpu.dot_dimension_numbers<[1], [0], [0], [1], [0, 0, 1, 1], [], []>} : vector<16x128xbf16>, vector<128x64xbf16>, vector<16x64xf32> -> vector<16x64xf32>
    %387 = vector.extract_strided_slice %333 {offsets = [0, 1], sizes = [16, 1], strides = [1, 1]} : vector<16x3xf32> to vector<16x1xf32>
    %388 = vector.broadcast %387 : vector<16x1xf32> to vector<16x64xf32>
    %389 = arith.mulf %386, %388 : vector<16x64xf32>
    %390 = arith.addf %370, %389 : vector<16x64xf32>
    %c3 = arith.constant 3 : index
    %c0_127 = arith.constant 0 : index
    %c0_128 = arith.constant 0 : index
    %391 = vector.load %arg10[%c3, %c0_127, %c0_128] : memref<8x64x256xbf16, #tpu.memory_space<vmem>>, vector<1x64x256xbf16>
    %392 = vector.shape_cast %391 : vector<1x64x256xbf16> to vector<64x256xbf16>
    %cst_129 = arith.constant dense<0.000000e+00> : vector<16x256xf32>
    %393 = tpu.matmul %273, %392, %cst_129 {dimension_numbers = #tpu.dot_dimension_numbers<[1], [0], [0], [1], [0, 0, 1, 1], [], []>} : vector<16x64xbf16>, vector<64x256xbf16>, vector<16x256xf32> -> vector<16x256xf32>
    %394 = vector.extract_strided_slice %393 {offsets = [0, 0], sizes = [16, 128], strides = [1, 1]} : vector<16x256xf32> to vector<16x128xf32>
    %395 = vector.extract_strided_slice %393 {offsets = [0, 128], sizes = [16, 128], strides = [1, 1]} : vector<16x256xf32> to vector<16x128xf32>
    %396 = arith.negf %394 : vector<16x128xf32>
    %397 = math.exp %396 : vector<16x128xf32>
    %cst_130 = arith.constant 1.000000e+00 : f32
    %398 = vector.broadcast %cst_130 : f32 to vector<16x128xf32>
    %399 = arith.addf %398, %397 : vector<16x128xf32>
    %400 = arith.divf %398, %399 : vector<16x128xf32>
    %401 = arith.mulf %394, %400 : vector<16x128xf32>
    %402 = arith.mulf %401, %395 : vector<16x128xf32>
    %403 = arith.truncf %402 : vector<16x128xf32> to vector<16x128xbf16>
    %c3_131 = arith.constant 3 : index
    %c0_132 = arith.constant 0 : index
    %c0_133 = arith.constant 0 : index
    %404 = vector.load %arg11[%c3_131, %c0_132, %c0_133] : memref<8x128x64xbf16, #tpu.memory_space<vmem>>, vector<1x128x64xbf16>
    %405 = vector.shape_cast %404 : vector<1x128x64xbf16> to vector<128x64xbf16>
    %cst_134 = arith.constant dense<0.000000e+00> : vector<16x64xf32>
    %406 = tpu.matmul %403, %405, %cst_134 {dimension_numbers = #tpu.dot_dimension_numbers<[1], [0], [0], [1], [0, 0, 1, 1], [], []>} : vector<16x128xbf16>, vector<128x64xbf16>, vector<16x64xf32> -> vector<16x64xf32>
    %407 = vector.extract_strided_slice %333 {offsets = [0, 2], sizes = [16, 1], strides = [1, 1]} : vector<16x3xf32> to vector<16x1xf32>
    %408 = vector.broadcast %407 : vector<16x1xf32> to vector<16x64xf32>
    %409 = arith.mulf %406, %408 : vector<16x64xf32>
    %410 = arith.addf %390, %409 : vector<16x64xf32>
    %411 = arith.mulf %410, %410 : vector<16x64xf32>
    %cst_135 = arith.constant dense<0.000000e+00> : vector<16xf32>
    %412 = vector.multi_reduction <add>, %411, %cst_135 [1] : vector<16x64xf32> to vector<16xf32>
    %413 = vector.shape_cast %412 : vector<16xf32> to vector<16x1xf32>
    %cst_136 = arith.constant 6.400000e+01 : f32
    %414 = vector.broadcast %cst_136 : f32 to vector<16x1xf32>
    %415 = arith.divf %413, %414 : vector<16x1xf32>
    %cst_137 = arith.constant 9.99999974E-6 : f32
    %416 = vector.broadcast %cst_137 : f32 to vector<16x1xf32>
    %417 = arith.addf %415, %416 : vector<16x1xf32>
    %418 = math.rsqrt %417 : vector<16x1xf32>
    %419 = vector.broadcast %418 : vector<16x1xf32> to vector<16x64xf32>
    %420 = arith.mulf %410, %419 : vector<16x64xf32>
    %c1_138 = arith.constant 1 : index
    %c0_139 = arith.constant 0 : index
    %c0_140 = arith.constant 0 : index
    %421 = vector.load %arg3[%c1_138, %c0_139, %c0_140] : memref<2x1x64xf32, #tpu.memory_space<vmem>>, vector<1x1x64xf32>
    %422 = vector.shape_cast %421 : vector<1x1x64xf32> to vector<1x64xf32>
    %423 = vector.broadcast %422 : vector<1x64xf32> to vector<16x64xf32>
    %424 = arith.mulf %420, %423 : vector<16x64xf32>
    %425 = arith.truncf %424 : vector<16x64xf32> to vector<16x64xbf16>
    %c1_141 = arith.constant 1 : index
    %c0_142 = arith.constant 0 : index
    %c0_143 = arith.constant 0 : index
    %426 = vector.load %arg4[%c1_141, %c0_142, %c0_143] : memref<2x64x16xbf16, #tpu.memory_space<vmem>>, vector<1x64x16xbf16>
    %427 = vector.shape_cast %426 : vector<1x64x16xbf16> to vector<64x16xbf16>
    %cst_144 = arith.constant dense<0.000000e+00> : vector<16x16xf32>
    %428 = tpu.matmul %425, %427, %cst_144 {dimension_numbers = #tpu.dot_dimension_numbers<[1], [0], [0], [1], [0, 0, 1, 1], [], []>} : vector<16x64xbf16>, vector<64x16xbf16>, vector<16x16xf32> -> vector<16x16xf32>
    %429 = arith.truncf %428 : vector<16x16xf32> to vector<16x16xbf16>
    %c1_145 = arith.constant 1 : index
    %c0_146 = arith.constant 0 : index
    %c0_147 = arith.constant 0 : index
    %430 = vector.load %arg5[%c1_145, %c0_146, %c0_147] : memref<2x16x256xbf16, #tpu.memory_space<vmem>>, vector<1x16x256xbf16>
    %431 = vector.shape_cast %430 : vector<1x16x256xbf16> to vector<16x256xbf16>
    %cst_148 = arith.constant dense<0.000000e+00> : vector<16x256xf32>
    %432 = tpu.matmul %429, %431, %cst_148 {dimension_numbers = #tpu.dot_dimension_numbers<[1], [0], [0], [1], [0, 0, 1, 1], [], []>} : vector<16x16xbf16>, vector<16x256xbf16>, vector<16x256xf32> -> vector<16x256xf32>
    %433 = vector.extract_strided_slice %432 {offsets = [0, 128], sizes = [8, 16], strides = [1, 1]} : vector<16x256xf32> to vector<8x16xf32>
    %434 = vector.extract_strided_slice %432 {offsets = [0, 160], sizes = [8, 16], strides = [1, 1]} : vector<16x256xf32> to vector<8x16xf32>
    %435 = arith.mulf %433, %0 : vector<8x16xf32>
    %436 = arith.mulf %434, %1 : vector<8x16xf32>
    %437 = arith.addf %435, %436 : vector<8x16xf32>
    %438 = arith.truncf %437 : vector<8x16xf32> to vector<8x16xbf16>
    %439 = vector.extract_strided_slice %432 {offsets = [0, 192], sizes = [8, 16], strides = [1, 1]} : vector<16x256xf32> to vector<8x16xf32>
    %440 = arith.truncf %439 : vector<8x16xf32> to vector<8x16xbf16>
    %441 = vector.extract_strided_slice %432 {offsets = [0, 0], sizes = [8, 16], strides = [1, 1]} : vector<16x256xf32> to vector<8x16xf32>
    %442 = vector.extract_strided_slice %432 {offsets = [0, 64], sizes = [8, 16], strides = [1, 1]} : vector<16x256xf32> to vector<8x16xf32>
    %443 = arith.mulf %441, %0 : vector<8x16xf32>
    %444 = arith.mulf %442, %1 : vector<8x16xf32>
    %445 = arith.addf %443, %444 : vector<8x16xf32>
    %446 = arith.truncf %445 : vector<8x16xf32> to vector<8x16xbf16>
    %cst_149 = arith.constant dense<0.000000e+00> : vector<8x8xf32>
    %447 = tpu.matmul %446, %438, %cst_149 {dimension_numbers = #tpu.dot_dimension_numbers<[1], [1], [0], [0], [0, 0, 1, 0], [], []>} : vector<8x16xbf16>, vector<8x16xbf16>, vector<8x8xf32> -> vector<8x8xf32>
    %cst_150 = arith.constant 2.500000e-01 : f32
    %448 = vector.broadcast %cst_150 : f32 to vector<8x8xf32>
    %449 = arith.mulf %447, %448 : vector<8x8xf32>
    %cst_151 = arith.constant 0xFF800000 : f32
    %450 = vector.broadcast %cst_151 : f32 to vector<8x8xf32>
    %451 = arith.select %4, %449, %450 : vector<8x8xi1>, vector<8x8xf32>
    %cst_152 = arith.constant dense<0xFF800000> : vector<8xf32>
    %452 = vector.multi_reduction <maximumf>, %451, %cst_152 [1] : vector<8x8xf32> to vector<8xf32>
    %453 = vector.shape_cast %452 : vector<8xf32> to vector<8x1xf32>
    %454 = vector.broadcast %453 : vector<8x1xf32> to vector<8x8xf32>
    %455 = arith.subf %451, %454 : vector<8x8xf32>
    %456 = math.exp %455 : vector<8x8xf32>
    %cst_153 = arith.constant dense<0.000000e+00> : vector<8xf32>
    %457 = vector.multi_reduction <add>, %456, %cst_153 [1] : vector<8x8xf32> to vector<8xf32>
    %458 = vector.shape_cast %457 : vector<8xf32> to vector<8x1xf32>
    %459 = tpu.reciprocal %458 {approx = true} : vector<8x1xf32> -> vector<8x1xf32>
    %460 = vector.broadcast %459 : vector<8x1xf32> to vector<8x8xf32>
    %461 = arith.mulf %456, %460 : vector<8x8xf32>
    %462 = arith.truncf %461 : vector<8x8xf32> to vector<8x8xbf16>
    %cst_154 = arith.constant dense<0.000000e+00> : vector<8x16xf32>
    %463 = tpu.matmul %462, %440, %cst_154 {dimension_numbers = #tpu.dot_dimension_numbers<[1], [0], [0], [1], [0, 0, 1, 1], [], []>} : vector<8x8xbf16>, vector<8x16xbf16>, vector<8x16xf32> -> vector<8x16xf32>
    %c0_155 = arith.constant 0 : index
    %c0_156 = arith.constant 0 : index
    %464 = vector.load %arg14[%c0_155, %c0_156] : memref<16x64xf32, #tpu.memory_space<vmem>>, vector<8x16xf32>
    tpu.vector_store %arg14[%c0_155, %c0_156], %463 {strides = array<i32>} : memref<16x64xf32, #tpu.memory_space<vmem>>, vector<8x16xf32>,
    %465 = vector.extract_strided_slice %432 {offsets = [0, 16], sizes = [8, 16], strides = [1, 1]} : vector<16x256xf32> to vector<8x16xf32>
    %466 = vector.extract_strided_slice %432 {offsets = [0, 80], sizes = [8, 16], strides = [1, 1]} : vector<16x256xf32> to vector<8x16xf32>
    %467 = arith.mulf %465, %0 : vector<8x16xf32>
    %468 = arith.mulf %466, %1 : vector<8x16xf32>
    %469 = arith.addf %467, %468 : vector<8x16xf32>
    %470 = arith.truncf %469 : vector<8x16xf32> to vector<8x16xbf16>
    %cst_157 = arith.constant dense<0.000000e+00> : vector<8x8xf32>
    %471 = tpu.matmul %470, %438, %cst_157 {dimension_numbers = #tpu.dot_dimension_numbers<[1], [1], [0], [0], [0, 0, 1, 0], [], []>} : vector<8x16xbf16>, vector<8x16xbf16>, vector<8x8xf32> -> vector<8x8xf32>
    %cst_158 = arith.constant 2.500000e-01 : f32
    %472 = vector.broadcast %cst_158 : f32 to vector<8x8xf32>
    %473 = arith.mulf %471, %472 : vector<8x8xf32>
    %cst_159 = arith.constant 0xFF800000 : f32
    %474 = vector.broadcast %cst_159 : f32 to vector<8x8xf32>
    %475 = arith.select %4, %473, %474 : vector<8x8xi1>, vector<8x8xf32>
    %cst_160 = arith.constant dense<0xFF800000> : vector<8xf32>
    %476 = vector.multi_reduction <maximumf>, %475, %cst_160 [1] : vector<8x8xf32> to vector<8xf32>
    %477 = vector.shape_cast %476 : vector<8xf32> to vector<8x1xf32>
    %478 = vector.broadcast %477 : vector<8x1xf32> to vector<8x8xf32>
    %479 = arith.subf %475, %478 : vector<8x8xf32>
    %480 = math.exp %479 : vector<8x8xf32>
    %cst_161 = arith.constant dense<0.000000e+00> : vector<8xf32>
    %481 = vector.multi_reduction <add>, %480, %cst_161 [1] : vector<8x8xf32> to vector<8xf32>
    %482 = vector.shape_cast %481 : vector<8xf32> to vector<8x1xf32>
    %483 = tpu.reciprocal %482 {approx = true} : vector<8x1xf32> -> vector<8x1xf32>
    %484 = vector.broadcast %483 : vector<8x1xf32> to vector<8x8xf32>
    %485 = arith.mulf %480, %484 : vector<8x8xf32>
    %486 = arith.truncf %485 : vector<8x8xf32> to vector<8x8xbf16>
    %cst_162 = arith.constant dense<0.000000e+00> : vector<8x16xf32>
    %487 = tpu.matmul %486, %440, %cst_162 {dimension_numbers = #tpu.dot_dimension_numbers<[1], [0], [0], [1], [0, 0, 1, 1], [], []>} : vector<8x8xbf16>, vector<8x16xbf16>, vector<8x16xf32> -> vector<8x16xf32>
    %c0_163 = arith.constant 0 : index
    %c16_164 = arith.constant 16 : index
    %488 = vector.load %arg14[%c0_163, %c16_164] : memref<16x64xf32, #tpu.memory_space<vmem>>, vector<8x16xf32>
    tpu.vector_store %arg14[%c0_163, %c16_164], %487 {strides = array<i32>} : memref<16x64xf32, #tpu.memory_space<vmem>>, vector<8x16xf32>,
    %489 = vector.extract_strided_slice %432 {offsets = [0, 144], sizes = [8, 16], strides = [1, 1]} : vector<16x256xf32> to vector<8x16xf32>
    %490 = vector.extract_strided_slice %432 {offsets = [0, 176], sizes = [8, 16], strides = [1, 1]} : vector<16x256xf32> to vector<8x16xf32>
    %491 = arith.mulf %489, %0 : vector<8x16xf32>
    %492 = arith.mulf %490, %1 : vector<8x16xf32>
    %493 = arith.addf %491, %492 : vector<8x16xf32>
    %494 = arith.truncf %493 : vector<8x16xf32> to vector<8x16xbf16>
    %495 = vector.extract_strided_slice %432 {offsets = [0, 208], sizes = [8, 16], strides = [1, 1]} : vector<16x256xf32> to vector<8x16xf32>
    %496 = arith.truncf %495 : vector<8x16xf32> to vector<8x16xbf16>
    %497 = vector.extract_strided_slice %432 {offsets = [0, 32], sizes = [8, 16], strides = [1, 1]} : vector<16x256xf32> to vector<8x16xf32>
    %498 = vector.extract_strided_slice %432 {offsets = [0, 96], sizes = [8, 16], strides = [1, 1]} : vector<16x256xf32> to vector<8x16xf32>
    %499 = arith.mulf %497, %0 : vector<8x16xf32>
    %500 = arith.mulf %498, %1 : vector<8x16xf32>
    %501 = arith.addf %499, %500 : vector<8x16xf32>
    %502 = arith.truncf %501 : vector<8x16xf32> to vector<8x16xbf16>
    %cst_165 = arith.constant dense<0.000000e+00> : vector<8x8xf32>
    %503 = tpu.matmul %502, %494, %cst_165 {dimension_numbers = #tpu.dot_dimension_numbers<[1], [1], [0], [0], [0, 0, 1, 0], [], []>} : vector<8x16xbf16>, vector<8x16xbf16>, vector<8x8xf32> -> vector<8x8xf32>
    %cst_166 = arith.constant 2.500000e-01 : f32
    %504 = vector.broadcast %cst_166 : f32 to vector<8x8xf32>
    %505 = arith.mulf %503, %504 : vector<8x8xf32>
    %cst_167 = arith.constant 0xFF800000 : f32
    %506 = vector.broadcast %cst_167 : f32 to vector<8x8xf32>
    %507 = arith.select %4, %505, %506 : vector<8x8xi1>, vector<8x8xf32>
    %cst_168 = arith.constant dense<0xFF800000> : vector<8xf32>
    %508 = vector.multi_reduction <maximumf>, %507, %cst_168 [1] : vector<8x8xf32> to vector<8xf32>
    %509 = vector.shape_cast %508 : vector<8xf32> to vector<8x1xf32>
    %510 = vector.broadcast %509 : vector<8x1xf32> to vector<8x8xf32>
    %511 = arith.subf %507, %510 : vector<8x8xf32>
    %512 = math.exp %511 : vector<8x8xf32>
    %cst_169 = arith.constant dense<0.000000e+00> : vector<8xf32>
    %513 = vector.multi_reduction <add>, %512, %cst_169 [1] : vector<8x8xf32> to vector<8xf32>
    %514 = vector.shape_cast %513 : vector<8xf32> to vector<8x1xf32>
    %515 = tpu.reciprocal %514 {approx = true} : vector<8x1xf32> -> vector<8x1xf32>
    %516 = vector.broadcast %515 : vector<8x1xf32> to vector<8x8xf32>
    %517 = arith.mulf %512, %516 : vector<8x8xf32>
    %518 = arith.truncf %517 : vector<8x8xf32> to vector<8x8xbf16>
    %cst_170 = arith.constant dense<0.000000e+00> : vector<8x16xf32>
    %519 = tpu.matmul %518, %496, %cst_170 {dimension_numbers = #tpu.dot_dimension_numbers<[1], [0], [0], [1], [0, 0, 1, 1], [], []>} : vector<8x8xbf16>, vector<8x16xbf16>, vector<8x16xf32> -> vector<8x16xf32>
    %c0_171 = arith.constant 0 : index
    %c32_172 = arith.constant 32 : index
    %520 = vector.load %arg14[%c0_171, %c32_172] : memref<16x64xf32, #tpu.memory_space<vmem>>, vector<8x16xf32>
    tpu.vector_store %arg14[%c0_171, %c32_172], %519 {strides = array<i32>} : memref<16x64xf32, #tpu.memory_space<vmem>>, vector<8x16xf32>,
    %521 = vector.extract_strided_slice %432 {offsets = [0, 48], sizes = [8, 16], strides = [1, 1]} : vector<16x256xf32> to vector<8x16xf32>
    %522 = vector.extract_strided_slice %432 {offsets = [0, 112], sizes = [8, 16], strides = [1, 1]} : vector<16x256xf32> to vector<8x16xf32>
    %523 = arith.mulf %521, %0 : vector<8x16xf32>
    %524 = arith.mulf %522, %1 : vector<8x16xf32>
    %525 = arith.addf %523, %524 : vector<8x16xf32>
    %526 = arith.truncf %525 : vector<8x16xf32> to vector<8x16xbf16>
    %cst_173 = arith.constant dense<0.000000e+00> : vector<8x8xf32>
    %527 = tpu.matmul %526, %494, %cst_173 {dimension_numbers = #tpu.dot_dimension_numbers<[1], [1], [0], [0], [0, 0, 1, 0], [], []>} : vector<8x16xbf16>, vector<8x16xbf16>, vector<8x8xf32> -> vector<8x8xf32>
    %cst_174 = arith.constant 2.500000e-01 : f32
    %528 = vector.broadcast %cst_174 : f32 to vector<8x8xf32>
    %529 = arith.mulf %527, %528 : vector<8x8xf32>
    %cst_175 = arith.constant 0xFF800000 : f32
    %530 = vector.broadcast %cst_175 : f32 to vector<8x8xf32>
    %531 = arith.select %4, %529, %530 : vector<8x8xi1>, vector<8x8xf32>
    %cst_176 = arith.constant dense<0xFF800000> : vector<8xf32>
    %532 = vector.multi_reduction <maximumf>, %531, %cst_176 [1] : vector<8x8xf32> to vector<8xf32>
    %533 = vector.shape_cast %532 : vector<8xf32> to vector<8x1xf32>
    %534 = vector.broadcast %533 : vector<8x1xf32> to vector<8x8xf32>
    %535 = arith.subf %531, %534 : vector<8x8xf32>
    %536 = math.exp %535 : vector<8x8xf32>
    %cst_177 = arith.constant dense<0.000000e+00> : vector<8xf32>
    %537 = vector.multi_reduction <add>, %536, %cst_177 [1] : vector<8x8xf32> to vector<8xf32>
    %538 = vector.shape_cast %537 : vector<8xf32> to vector<8x1xf32>
    %539 = tpu.reciprocal %538 {approx = true} : vector<8x1xf32> -> vector<8x1xf32>
    %540 = vector.broadcast %539 : vector<8x1xf32> to vector<8x8xf32>
    %541 = arith.mulf %536, %540 : vector<8x8xf32>
    %542 = arith.truncf %541 : vector<8x8xf32> to vector<8x8xbf16>
    %cst_178 = arith.constant dense<0.000000e+00> : vector<8x16xf32>
    %543 = tpu.matmul %542, %496, %cst_178 {dimension_numbers = #tpu.dot_dimension_numbers<[1], [0], [0], [1], [0, 0, 1, 1], [], []>} : vector<8x8xbf16>, vector<8x16xbf16>, vector<8x16xf32> -> vector<8x16xf32>
    %c0_179 = arith.constant 0 : index
    %c48_180 = arith.constant 48 : index
    %544 = vector.load %arg14[%c0_179, %c48_180] : memref<16x64xf32, #tpu.memory_space<vmem>>, vector<8x16xf32>
    tpu.vector_store %arg14[%c0_179, %c48_180], %543 {strides = array<i32>} : memref<16x64xf32, #tpu.memory_space<vmem>>, vector<8x16xf32>,
    %545 = vector.extract_strided_slice %432 {offsets = [8, 128], sizes = [8, 16], strides = [1, 1]} : vector<16x256xf32> to vector<8x16xf32>
    %546 = vector.extract_strided_slice %432 {offsets = [8, 160], sizes = [8, 16], strides = [1, 1]} : vector<16x256xf32> to vector<8x16xf32>
    %547 = arith.mulf %545, %0 : vector<8x16xf32>
    %548 = arith.mulf %546, %1 : vector<8x16xf32>
    %549 = arith.addf %547, %548 : vector<8x16xf32>
    %550 = arith.truncf %549 : vector<8x16xf32> to vector<8x16xbf16>
    %551 = vector.extract_strided_slice %432 {offsets = [8, 192], sizes = [8, 16], strides = [1, 1]} : vector<16x256xf32> to vector<8x16xf32>
    %552 = arith.truncf %551 : vector<8x16xf32> to vector<8x16xbf16>
    %553 = vector.extract_strided_slice %432 {offsets = [8, 0], sizes = [8, 16], strides = [1, 1]} : vector<16x256xf32> to vector<8x16xf32>
    %554 = vector.extract_strided_slice %432 {offsets = [8, 64], sizes = [8, 16], strides = [1, 1]} : vector<16x256xf32> to vector<8x16xf32>
    %555 = arith.mulf %553, %0 : vector<8x16xf32>
    %556 = arith.mulf %554, %1 : vector<8x16xf32>
    %557 = arith.addf %555, %556 : vector<8x16xf32>
    %558 = arith.truncf %557 : vector<8x16xf32> to vector<8x16xbf16>
    %cst_181 = arith.constant dense<0.000000e+00> : vector<8x8xf32>
    %559 = tpu.matmul %558, %550, %cst_181 {dimension_numbers = #tpu.dot_dimension_numbers<[1], [1], [0], [0], [0, 0, 1, 0], [], []>} : vector<8x16xbf16>, vector<8x16xbf16>, vector<8x8xf32> -> vector<8x8xf32>
    %cst_182 = arith.constant 2.500000e-01 : f32
    %560 = vector.broadcast %cst_182 : f32 to vector<8x8xf32>
    %561 = arith.mulf %559, %560 : vector<8x8xf32>
    %cst_183 = arith.constant 0xFF800000 : f32
    %562 = vector.broadcast %cst_183 : f32 to vector<8x8xf32>
    %563 = arith.select %4, %561, %562 : vector<8x8xi1>, vector<8x8xf32>
    %cst_184 = arith.constant dense<0xFF800000> : vector<8xf32>
    %564 = vector.multi_reduction <maximumf>, %563, %cst_184 [1] : vector<8x8xf32> to vector<8xf32>
    %565 = vector.shape_cast %564 : vector<8xf32> to vector<8x1xf32>
    %566 = vector.broadcast %565 : vector<8x1xf32> to vector<8x8xf32>
    %567 = arith.subf %563, %566 : vector<8x8xf32>
    %568 = math.exp %567 : vector<8x8xf32>
    %cst_185 = arith.constant dense<0.000000e+00> : vector<8xf32>
    %569 = vector.multi_reduction <add>, %568, %cst_185 [1] : vector<8x8xf32> to vector<8xf32>
    %570 = vector.shape_cast %569 : vector<8xf32> to vector<8x1xf32>
    %571 = tpu.reciprocal %570 {approx = true} : vector<8x1xf32> -> vector<8x1xf32>
    %572 = vector.broadcast %571 : vector<8x1xf32> to vector<8x8xf32>
    %573 = arith.mulf %568, %572 : vector<8x8xf32>
    %574 = arith.truncf %573 : vector<8x8xf32> to vector<8x8xbf16>
    %cst_186 = arith.constant dense<0.000000e+00> : vector<8x16xf32>
    %575 = tpu.matmul %574, %552, %cst_186 {dimension_numbers = #tpu.dot_dimension_numbers<[1], [0], [0], [1], [0, 0, 1, 1], [], []>} : vector<8x8xbf16>, vector<8x16xbf16>, vector<8x16xf32> -> vector<8x16xf32>
    %c8_187 = arith.constant 8 : index
    %c0_188 = arith.constant 0 : index
    %576 = vector.load %arg14[%c8_187, %c0_188] : memref<16x64xf32, #tpu.memory_space<vmem>>, vector<8x16xf32>
    tpu.vector_store %arg14[%c8_187, %c0_188], %575 {strides = array<i32>} : memref<16x64xf32, #tpu.memory_space<vmem>>, vector<8x16xf32>,
    %577 = vector.extract_strided_slice %432 {offsets = [8, 16], sizes = [8, 16], strides = [1, 1]} : vector<16x256xf32> to vector<8x16xf32>
    %578 = vector.extract_strided_slice %432 {offsets = [8, 80], sizes = [8, 16], strides = [1, 1]} : vector<16x256xf32> to vector<8x16xf32>
    %579 = arith.mulf %577, %0 : vector<8x16xf32>
    %580 = arith.mulf %578, %1 : vector<8x16xf32>
    %581 = arith.addf %579, %580 : vector<8x16xf32>
    %582 = arith.truncf %581 : vector<8x16xf32> to vector<8x16xbf16>
    %cst_189 = arith.constant dense<0.000000e+00> : vector<8x8xf32>
    %583 = tpu.matmul %582, %550, %cst_189 {dimension_numbers = #tpu.dot_dimension_numbers<[1], [1], [0], [0], [0, 0, 1, 0], [], []>} : vector<8x16xbf16>, vector<8x16xbf16>, vector<8x8xf32> -> vector<8x8xf32>
    %cst_190 = arith.constant 2.500000e-01 : f32
    %584 = vector.broadcast %cst_190 : f32 to vector<8x8xf32>
    %585 = arith.mulf %583, %584 : vector<8x8xf32>
    %cst_191 = arith.constant 0xFF800000 : f32
    %586 = vector.broadcast %cst_191 : f32 to vector<8x8xf32>
    %587 = arith.select %4, %585, %586 : vector<8x8xi1>, vector<8x8xf32>
    %cst_192 = arith.constant dense<0xFF800000> : vector<8xf32>
    %588 = vector.multi_reduction <maximumf>, %587, %cst_192 [1] : vector<8x8xf32> to vector<8xf32>
    %589 = vector.shape_cast %588 : vector<8xf32> to vector<8x1xf32>
    %590 = vector.broadcast %589 : vector<8x1xf32> to vector<8x8xf32>
    %591 = arith.subf %587, %590 : vector<8x8xf32>
    %592 = math.exp %591 : vector<8x8xf32>
    %cst_193 = arith.constant dense<0.000000e+00> : vector<8xf32>
    %593 = vector.multi_reduction <add>, %592, %cst_193 [1] : vector<8x8xf32> to vector<8xf32>
    %594 = vector.shape_cast %593 : vector<8xf32> to vector<8x1xf32>
    %595 = tpu.reciprocal %594 {approx = true} : vector<8x1xf32> -> vector<8x1xf32>
    %596 = vector.broadcast %595 : vector<8x1xf32> to vector<8x8xf32>
    %597 = arith.mulf %592, %596 : vector<8x8xf32>
    %598 = arith.truncf %597 : vector<8x8xf32> to vector<8x8xbf16>
    %cst_194 = arith.constant dense<0.000000e+00> : vector<8x16xf32>
    %599 = tpu.matmul %598, %552, %cst_194 {dimension_numbers = #tpu.dot_dimension_numbers<[1], [0], [0], [1], [0, 0, 1, 1], [], []>} : vector<8x8xbf16>, vector<8x16xbf16>, vector<8x16xf32> -> vector<8x16xf32>
    %c8_195 = arith.constant 8 : index
    %c16_196 = arith.constant 16 : index
    %600 = vector.load %arg14[%c8_195, %c16_196] : memref<16x64xf32, #tpu.memory_space<vmem>>, vector<8x16xf32>
    tpu.vector_store %arg14[%c8_195, %c16_196], %599 {strides = array<i32>} : memref<16x64xf32, #tpu.memory_space<vmem>>, vector<8x16xf32>,
    %601 = vector.extract_strided_slice %432 {offsets = [8, 144], sizes = [8, 16], strides = [1, 1]} : vector<16x256xf32> to vector<8x16xf32>
    %602 = vector.extract_strided_slice %432 {offsets = [8, 176], sizes = [8, 16], strides = [1, 1]} : vector<16x256xf32> to vector<8x16xf32>
    %603 = arith.mulf %601, %0 : vector<8x16xf32>
    %604 = arith.mulf %602, %1 : vector<8x16xf32>
    %605 = arith.addf %603, %604 : vector<8x16xf32>
    %606 = arith.truncf %605 : vector<8x16xf32> to vector<8x16xbf16>
    %607 = vector.extract_strided_slice %432 {offsets = [8, 208], sizes = [8, 16], strides = [1, 1]} : vector<16x256xf32> to vector<8x16xf32>
    %608 = arith.truncf %607 : vector<8x16xf32> to vector<8x16xbf16>
    %609 = vector.extract_strided_slice %432 {offsets = [8, 32], sizes = [8, 16], strides = [1, 1]} : vector<16x256xf32> to vector<8x16xf32>
    %610 = vector.extract_strided_slice %432 {offsets = [8, 96], sizes = [8, 16], strides = [1, 1]} : vector<16x256xf32> to vector<8x16xf32>
    %611 = arith.mulf %609, %0 : vector<8x16xf32>
    %612 = arith.mulf %610, %1 : vector<8x16xf32>
    %613 = arith.addf %611, %612 : vector<8x16xf32>
    %614 = arith.truncf %613 : vector<8x16xf32> to vector<8x16xbf16>
    %cst_197 = arith.constant dense<0.000000e+00> : vector<8x8xf32>
    %615 = tpu.matmul %614, %606, %cst_197 {dimension_numbers = #tpu.dot_dimension_numbers<[1], [1], [0], [0], [0, 0, 1, 0], [], []>} : vector<8x16xbf16>, vector<8x16xbf16>, vector<8x8xf32> -> vector<8x8xf32>
    %cst_198 = arith.constant 2.500000e-01 : f32
    %616 = vector.broadcast %cst_198 : f32 to vector<8x8xf32>
    %617 = arith.mulf %615, %616 : vector<8x8xf32>
    %cst_199 = arith.constant 0xFF800000 : f32
    %618 = vector.broadcast %cst_199 : f32 to vector<8x8xf32>
    %619 = arith.select %4, %617, %618 : vector<8x8xi1>, vector<8x8xf32>
    %cst_200 = arith.constant dense<0xFF800000> : vector<8xf32>
    %620 = vector.multi_reduction <maximumf>, %619, %cst_200 [1] : vector<8x8xf32> to vector<8xf32>
    %621 = vector.shape_cast %620 : vector<8xf32> to vector<8x1xf32>
    %622 = vector.broadcast %621 : vector<8x1xf32> to vector<8x8xf32>
    %623 = arith.subf %619, %622 : vector<8x8xf32>
    %624 = math.exp %623 : vector<8x8xf32>
    %cst_201 = arith.constant dense<0.000000e+00> : vector<8xf32>
    %625 = vector.multi_reduction <add>, %624, %cst_201 [1] : vector<8x8xf32> to vector<8xf32>
    %626 = vector.shape_cast %625 : vector<8xf32> to vector<8x1xf32>
    %627 = tpu.reciprocal %626 {approx = true} : vector<8x1xf32> -> vector<8x1xf32>
    %628 = vector.broadcast %627 : vector<8x1xf32> to vector<8x8xf32>
    %629 = arith.mulf %624, %628 : vector<8x8xf32>
    %630 = arith.truncf %629 : vector<8x8xf32> to vector<8x8xbf16>
    %cst_202 = arith.constant dense<0.000000e+00> : vector<8x16xf32>
    %631 = tpu.matmul %630, %608, %cst_202 {dimension_numbers = #tpu.dot_dimension_numbers<[1], [0], [0], [1], [0, 0, 1, 1], [], []>} : vector<8x8xbf16>, vector<8x16xbf16>, vector<8x16xf32> -> vector<8x16xf32>
    %c8_203 = arith.constant 8 : index
    %c32_204 = arith.constant 32 : index
    %632 = vector.load %arg14[%c8_203, %c32_204] : memref<16x64xf32, #tpu.memory_space<vmem>>, vector<8x16xf32>
    tpu.vector_store %arg14[%c8_203, %c32_204], %631 {strides = array<i32>} : memref<16x64xf32, #tpu.memory_space<vmem>>, vector<8x16xf32>,
    %633 = vector.extract_strided_slice %432 {offsets = [8, 48], sizes = [8, 16], strides = [1, 1]} : vector<16x256xf32> to vector<8x16xf32>
    %634 = vector.extract_strided_slice %432 {offsets = [8, 112], sizes = [8, 16], strides = [1, 1]} : vector<16x256xf32> to vector<8x16xf32>
    %635 = arith.mulf %633, %0 : vector<8x16xf32>
    %636 = arith.mulf %634, %1 : vector<8x16xf32>
    %637 = arith.addf %635, %636 : vector<8x16xf32>
    %638 = arith.truncf %637 : vector<8x16xf32> to vector<8x16xbf16>
    %cst_205 = arith.constant dense<0.000000e+00> : vector<8x8xf32>
    %639 = tpu.matmul %638, %606, %cst_205 {dimension_numbers = #tpu.dot_dimension_numbers<[1], [1], [0], [0], [0, 0, 1, 0], [], []>} : vector<8x16xbf16>, vector<8x16xbf16>, vector<8x8xf32> -> vector<8x8xf32>
    %cst_206 = arith.constant 2.500000e-01 : f32
    %640 = vector.broadcast %cst_206 : f32 to vector<8x8xf32>
    %641 = arith.mulf %639, %640 : vector<8x8xf32>
    %cst_207 = arith.constant 0xFF800000 : f32
    %642 = vector.broadcast %cst_207 : f32 to vector<8x8xf32>
    %643 = arith.select %4, %641, %642 : vector<8x8xi1>, vector<8x8xf32>
    %cst_208 = arith.constant dense<0xFF800000> : vector<8xf32>
    %644 = vector.multi_reduction <maximumf>, %643, %cst_208 [1] : vector<8x8xf32> to vector<8xf32>
    %645 = vector.shape_cast %644 : vector<8xf32> to vector<8x1xf32>
    %646 = vector.broadcast %645 : vector<8x1xf32> to vector<8x8xf32>
    %647 = arith.subf %643, %646 : vector<8x8xf32>
    %648 = math.exp %647 : vector<8x8xf32>
    %cst_209 = arith.constant dense<0.000000e+00> : vector<8xf32>
    %649 = vector.multi_reduction <add>, %648, %cst_209 [1] : vector<8x8xf32> to vector<8xf32>
    %650 = vector.shape_cast %649 : vector<8xf32> to vector<8x1xf32>
    %651 = tpu.reciprocal %650 {approx = true} : vector<8x1xf32> -> vector<8x1xf32>
    %652 = vector.broadcast %651 : vector<8x1xf32> to vector<8x8xf32>
    %653 = arith.mulf %648, %652 : vector<8x8xf32>
    %654 = arith.truncf %653 : vector<8x8xf32> to vector<8x8xbf16>
    %cst_210 = arith.constant dense<0.000000e+00> : vector<8x16xf32>
    %655 = tpu.matmul %654, %608, %cst_210 {dimension_numbers = #tpu.dot_dimension_numbers<[1], [0], [0], [1], [0, 0, 1, 1], [], []>} : vector<8x8xbf16>, vector<8x16xbf16>, vector<8x16xf32> -> vector<8x16xf32>
    %c8_211 = arith.constant 8 : index
    %c48_212 = arith.constant 48 : index
    %656 = vector.load %arg14[%c8_211, %c48_212] : memref<16x64xf32, #tpu.memory_space<vmem>>, vector<8x16xf32>
    tpu.vector_store %arg14[%c8_211, %c48_212], %655 {strides = array<i32>} : memref<16x64xf32, #tpu.memory_space<vmem>>, vector<8x16xf32>,
    %c0_213 = arith.constant 0 : index
    %c0_214 = arith.constant 0 : index
    %657 = vector.load %arg14[%c0_213, %c0_214] : memref<16x64xf32, #tpu.memory_space<vmem>>, vector<16x64xf32>
    %658 = arith.truncf %657 : vector<16x64xf32> to vector<16x64xbf16>
    %c1_215 = arith.constant 1 : index
    %c0_216 = arith.constant 0 : index
    %c0_217 = arith.constant 0 : index
    %659 = vector.load %arg6[%c1_215, %c0_216, %c0_217] : memref<2x64x64xbf16, #tpu.memory_space<vmem>>, vector<1x64x64xbf16>
    %660 = vector.shape_cast %659 : vector<1x64x64xbf16> to vector<64x64xbf16>
    %cst_218 = arith.constant dense<0.000000e+00> : vector<16x64xf32>
    %661 = tpu.matmul %658, %660, %cst_218 {dimension_numbers = #tpu.dot_dimension_numbers<[1], [0], [0], [1], [0, 0, 1, 1], [], []>} : vector<16x64xbf16>, vector<64x64xbf16>, vector<16x64xf32> -> vector<16x64xf32>
    %662 = arith.addf %410, %661 : vector<16x64xf32>
    %663 = arith.mulf %662, %662 : vector<16x64xf32>
    %cst_219 = arith.constant dense<0.000000e+00> : vector<16xf32>
    %664 = vector.multi_reduction <add>, %663, %cst_219 [1] : vector<16x64xf32> to vector<16xf32>
    %665 = vector.shape_cast %664 : vector<16xf32> to vector<16x1xf32>
    %cst_220 = arith.constant 6.400000e+01 : f32
    %666 = vector.broadcast %cst_220 : f32 to vector<16x1xf32>
    %667 = arith.divf %665, %666 : vector<16x1xf32>
    %cst_221 = arith.constant 9.99999974E-6 : f32
    %668 = vector.broadcast %cst_221 : f32 to vector<16x1xf32>
    %669 = arith.addf %667, %668 : vector<16x1xf32>
    %670 = math.rsqrt %669 : vector<16x1xf32>
    %671 = vector.broadcast %670 : vector<16x1xf32> to vector<16x64xf32>
    %672 = arith.mulf %662, %671 : vector<16x64xf32>
    %c1_222 = arith.constant 1 : index
    %c0_223 = arith.constant 0 : index
    %c0_224 = arith.constant 0 : index
    %673 = vector.load %arg7[%c1_222, %c0_223, %c0_224] : memref<2x1x64xf32, #tpu.memory_space<vmem>>, vector<1x1x64xf32>
    %674 = vector.shape_cast %673 : vector<1x1x64xf32> to vector<1x64xf32>
    %675 = vector.broadcast %674 : vector<1x64xf32> to vector<16x64xf32>
    %676 = arith.mulf %672, %675 : vector<16x64xf32>
    %677 = arith.truncf %676 : vector<16x64xf32> to vector<16x64xbf16>
    %c1_225 = arith.constant 1 : index
    %c0_226 = arith.constant 0 : index
    %c0_227 = arith.constant 0 : index
    %678 = vector.load %arg8[%c1_225, %c0_226, %c0_227] : memref<2x64x3xbf16, #tpu.memory_space<vmem>>, vector<1x64x3xbf16>
    %679 = vector.shape_cast %678 : vector<1x64x3xbf16> to vector<64x3xbf16>
    %cst_228 = arith.constant dense<0.000000e+00> : vector<16x3xf32>
    %680 = tpu.matmul %677, %679, %cst_228 {dimension_numbers = #tpu.dot_dimension_numbers<[1], [0], [0], [1], [0, 0, 1, 1], [], []>} : vector<16x64xbf16>, vector<64x3xbf16>, vector<16x3xf32> -> vector<16x3xf32>
    %c1_229 = arith.constant 1 : index
    %c0_230 = arith.constant 0 : index
    %c0_231 = arith.constant 0 : index
    %681 = vector.load %arg9[%c1_229, %c0_230, %c0_231] : memref<2x1x3xf32, #tpu.memory_space<vmem>>, vector<1x1x3xf32>
    %682 = vector.shape_cast %681 : vector<1x1x3xf32> to vector<1x3xf32>
    %683 = vector.broadcast %682 : vector<1x3xf32> to vector<16x3xf32>
    %684 = arith.addf %680, %683 : vector<16x3xf32>
    %685 = arith.negf %684 : vector<16x3xf32>
    %686 = math.exp %685 : vector<16x3xf32>
    %cst_232 = arith.constant 1.000000e+00 : f32
    %687 = vector.broadcast %cst_232 : f32 to vector<16x3xf32>
    %688 = arith.addf %687, %686 : vector<16x3xf32>
    %689 = arith.divf %687, %688 : vector<16x3xf32>
    %cst_233 = arith.constant 0.000000e+00 : f32
    %690 = vector.broadcast %cst_233 : f32 to vector<16x3xf32>
    %691 = vector.extract_strided_slice %689 {offsets = [0, 0], sizes = [16, 1], strides = [1, 1]} : vector<16x3xf32> to vector<16x1xf32>
    %692 = vector.broadcast %691 : vector<16x1xf32> to vector<16x3xf32>
    %693 = arith.cmpf ogt, %692, %689 : vector<16x3xf32>
    %694 = arith.extui %693 : vector<16x3xi1> to vector<16x3xi32>
    %695 = arith.sitofp %694 : vector<16x3xi32> to vector<16x3xf32>
    %696 = vector.broadcast %691 : vector<16x1xf32> to vector<16x3xf32>
    %697 = arith.cmpf oge, %696, %689 : vector<16x3xf32>
    %698 = arith.extui %697 : vector<16x3xi1> to vector<16x3xi32>
    %699 = arith.sitofp %698 : vector<16x3xi32> to vector<16x3xf32>
    %c0_i32_234 = arith.constant 0 : i32
    %700 = vector.broadcast %c0_i32_234 : i32 to vector<16x3xi32>
    %701 = arith.cmpi sgt, %5, %700 : vector<16x3xi32>
    %702 = arith.select %701, %699, %695 : vector<16x3xi1>, vector<16x3xf32>
    %703 = arith.addf %690, %702 : vector<16x3xf32>
    %704 = vector.extract_strided_slice %689 {offsets = [0, 1], sizes = [16, 1], strides = [1, 1]} : vector<16x3xf32> to vector<16x1xf32>
    %705 = vector.broadcast %704 : vector<16x1xf32> to vector<16x3xf32>
    %706 = arith.cmpf ogt, %705, %689 : vector<16x3xf32>
    %707 = arith.extui %706 : vector<16x3xi1> to vector<16x3xi32>
    %708 = arith.sitofp %707 : vector<16x3xi32> to vector<16x3xf32>
    %709 = vector.broadcast %704 : vector<16x1xf32> to vector<16x3xf32>
    %710 = arith.cmpf oge, %709, %689 : vector<16x3xf32>
    %711 = arith.extui %710 : vector<16x3xi1> to vector<16x3xi32>
    %712 = arith.sitofp %711 : vector<16x3xi32> to vector<16x3xf32>
    %c1_i32_235 = arith.constant 1 : i32
    %713 = vector.broadcast %c1_i32_235 : i32 to vector<16x3xi32>
    %714 = arith.cmpi sgt, %5, %713 : vector<16x3xi32>
    %715 = arith.select %714, %712, %708 : vector<16x3xi1>, vector<16x3xf32>
    %716 = arith.addf %703, %715 : vector<16x3xf32>
    %717 = vector.extract_strided_slice %689 {offsets = [0, 2], sizes = [16, 1], strides = [1, 1]} : vector<16x3xf32> to vector<16x1xf32>
    %718 = vector.broadcast %717 : vector<16x1xf32> to vector<16x3xf32>
    %719 = arith.cmpf ogt, %718, %689 : vector<16x3xf32>
    %720 = arith.extui %719 : vector<16x3xi1> to vector<16x3xi32>
    %721 = arith.sitofp %720 : vector<16x3xi32> to vector<16x3xf32>
    %722 = vector.broadcast %717 : vector<16x1xf32> to vector<16x3xf32>
    %723 = arith.cmpf oge, %722, %689 : vector<16x3xf32>
    %724 = arith.extui %723 : vector<16x3xi1> to vector<16x3xi32>
    %725 = arith.sitofp %724 : vector<16x3xi32> to vector<16x3xf32>
    %c2_i32_236 = arith.constant 2 : i32
    %726 = vector.broadcast %c2_i32_236 : i32 to vector<16x3xi32>
    %727 = arith.cmpi sgt, %5, %726 : vector<16x3xi32>
    %728 = arith.select %727, %725, %721 : vector<16x3xi1>, vector<16x3xf32>
    %729 = arith.addf %716, %728 : vector<16x3xf32>
    %cst_237 = arith.constant 2.000000e+00 : f32
    %730 = vector.broadcast %cst_237 : f32 to vector<16x3xf32>
    %731 = arith.cmpf olt, %729, %730 : vector<16x3xf32>
    %cst_238 = arith.constant 0.000000e+00 : f32
    %732 = vector.broadcast %cst_238 : f32 to vector<16x3xf32>
    %733 = arith.select %731, %689, %732 : vector<16x3xi1>, vector<16x3xf32>
    %cst_239 = arith.constant dense<0.000000e+00> : vector<16xf32>
    %734 = vector.multi_reduction <add>, %733, %cst_239 [1] : vector<16x3xf32> to vector<16xf32>
    %735 = vector.shape_cast %734 : vector<16xf32> to vector<16x1xf32>
    %736 = vector.broadcast %735 : vector<16x1xf32> to vector<16x3xf32>
    %737 = arith.divf %733, %736 : vector<16x3xf32>
    %c4 = arith.constant 4 : index
    %c0_240 = arith.constant 0 : index
    %c0_241 = arith.constant 0 : index
    %738 = vector.load %arg10[%c4, %c0_240, %c0_241] : memref<8x64x256xbf16, #tpu.memory_space<vmem>>, vector<1x64x256xbf16>
    %739 = vector.shape_cast %738 : vector<1x64x256xbf16> to vector<64x256xbf16>
    %cst_242 = arith.constant dense<0.000000e+00> : vector<16x256xf32>
    %740 = tpu.matmul %677, %739, %cst_242 {dimension_numbers = #tpu.dot_dimension_numbers<[1], [0], [0], [1], [0, 0, 1, 1], [], []>} : vector<16x64xbf16>, vector<64x256xbf16>, vector<16x256xf32> -> vector<16x256xf32>
    %741 = vector.extract_strided_slice %740 {offsets = [0, 0], sizes = [16, 128], strides = [1, 1]} : vector<16x256xf32> to vector<16x128xf32>
    %742 = vector.extract_strided_slice %740 {offsets = [0, 128], sizes = [16, 128], strides = [1, 1]} : vector<16x256xf32> to vector<16x128xf32>
    %743 = arith.negf %741 : vector<16x128xf32>
    %744 = math.exp %743 : vector<16x128xf32>
    %cst_243 = arith.constant 1.000000e+00 : f32
    %745 = vector.broadcast %cst_243 : f32 to vector<16x128xf32>
    %746 = arith.addf %745, %744 : vector<16x128xf32>
    %747 = arith.divf %745, %746 : vector<16x128xf32>
    %748 = arith.mulf %741, %747 : vector<16x128xf32>
    %749 = arith.mulf %748, %742 : vector<16x128xf32>
    %750 = arith.truncf %749 : vector<16x128xf32> to vector<16x128xbf16>
    %c4_244 = arith.constant 4 : index
    %c0_245 = arith.constant 0 : index
    %c0_246 = arith.constant 0 : index
    %751 = vector.load %arg11[%c4_244, %c0_245, %c0_246] : memref<8x128x64xbf16, #tpu.memory_space<vmem>>, vector<1x128x64xbf16>
    %752 = vector.shape_cast %751 : vector<1x128x64xbf16> to vector<128x64xbf16>
    %cst_247 = arith.constant dense<0.000000e+00> : vector<16x64xf32>
    %753 = tpu.matmul %750, %752, %cst_247 {dimension_numbers = #tpu.dot_dimension_numbers<[1], [0], [0], [1], [0, 0, 1, 1], [], []>} : vector<16x128xbf16>, vector<128x64xbf16>, vector<16x64xf32> -> vector<16x64xf32>
    %754 = arith.addf %662, %753 : vector<16x64xf32>
    %c5 = arith.constant 5 : index
    %c0_248 = arith.constant 0 : index
    %c0_249 = arith.constant 0 : index
    %755 = vector.load %arg10[%c5, %c0_248, %c0_249] : memref<8x64x256xbf16, #tpu.memory_space<vmem>>, vector<1x64x256xbf16>
    %756 = vector.shape_cast %755 : vector<1x64x256xbf16> to vector<64x256xbf16>
    %cst_250 = arith.constant dense<0.000000e+00> : vector<16x256xf32>
    %757 = tpu.matmul %677, %756, %cst_250 {dimension_numbers = #tpu.dot_dimension_numbers<[1], [0], [0], [1], [0, 0, 1, 1], [], []>} : vector<16x64xbf16>, vector<64x256xbf16>, vector<16x256xf32> -> vector<16x256xf32>
    %758 = vector.extract_strided_slice %757 {offsets = [0, 0], sizes = [16, 128], strides = [1, 1]} : vector<16x256xf32> to vector<16x128xf32>
    %759 = vector.extract_strided_slice %757 {offsets = [0, 128], sizes = [16, 128], strides = [1, 1]} : vector<16x256xf32> to vector<16x128xf32>
    %760 = arith.negf %758 : vector<16x128xf32>
    %761 = math.exp %760 : vector<16x128xf32>
    %cst_251 = arith.constant 1.000000e+00 : f32
    %762 = vector.broadcast %cst_251 : f32 to vector<16x128xf32>
    %763 = arith.addf %762, %761 : vector<16x128xf32>
    %764 = arith.divf %762, %763 : vector<16x128xf32>
    %765 = arith.mulf %758, %764 : vector<16x128xf32>
    %766 = arith.mulf %765, %759 : vector<16x128xf32>
    %767 = arith.truncf %766 : vector<16x128xf32> to vector<16x128xbf16>
    %c5_252 = arith.constant 5 : index
    %c0_253 = arith.constant 0 : index
    %c0_254 = arith.constant 0 : index
    %768 = vector.load %arg11[%c5_252, %c0_253, %c0_254] : memref<8x128x64xbf16, #tpu.memory_space<vmem>>, vector<1x128x64xbf16>
    %769 = vector.shape_cast %768 : vector<1x128x64xbf16> to vector<128x64xbf16>
    %cst_255 = arith.constant dense<0.000000e+00> : vector<16x64xf32>
    %770 = tpu.matmul %767, %769, %cst_255 {dimension_numbers = #tpu.dot_dimension_numbers<[1], [0], [0], [1], [0, 0, 1, 1], [], []>} : vector<16x128xbf16>, vector<128x64xbf16>, vector<16x64xf32> -> vector<16x64xf32>
    %771 = vector.extract_strided_slice %737 {offsets = [0, 0], sizes = [16, 1], strides = [1, 1]} : vector<16x3xf32> to vector<16x1xf32>
    %772 = vector.broadcast %771 : vector<16x1xf32> to vector<16x64xf32>
    %773 = arith.mulf %770, %772 : vector<16x64xf32>
    %774 = arith.addf %754, %773 : vector<16x64xf32>
    %c6 = arith.constant 6 : index
    %c0_256 = arith.constant 0 : index
    %c0_257 = arith.constant 0 : index
    %775 = vector.load %arg10[%c6, %c0_256, %c0_257] : memref<8x64x256xbf16, #tpu.memory_space<vmem>>, vector<1x64x256xbf16>
    %776 = vector.shape_cast %775 : vector<1x64x256xbf16> to vector<64x256xbf16>
    %cst_258 = arith.constant dense<0.000000e+00> : vector<16x256xf32>
    %777 = tpu.matmul %677, %776, %cst_258 {dimension_numbers = #tpu.dot_dimension_numbers<[1], [0], [0], [1], [0, 0, 1, 1], [], []>} : vector<16x64xbf16>, vector<64x256xbf16>, vector<16x256xf32> -> vector<16x256xf32>
    %778 = vector.extract_strided_slice %777 {offsets = [0, 0], sizes = [16, 128], strides = [1, 1]} : vector<16x256xf32> to vector<16x128xf32>
    %779 = vector.extract_strided_slice %777 {offsets = [0, 128], sizes = [16, 128], strides = [1, 1]} : vector<16x256xf32> to vector<16x128xf32>
    %780 = arith.negf %778 : vector<16x128xf32>
    %781 = math.exp %780 : vector<16x128xf32>
    %cst_259 = arith.constant 1.000000e+00 : f32
    %782 = vector.broadcast %cst_259 : f32 to vector<16x128xf32>
    %783 = arith.addf %782, %781 : vector<16x128xf32>
    %784 = arith.divf %782, %783 : vector<16x128xf32>
    %785 = arith.mulf %778, %784 : vector<16x128xf32>
    %786 = arith.mulf %785, %779 : vector<16x128xf32>
    %787 = arith.truncf %786 : vector<16x128xf32> to vector<16x128xbf16>
    %c6_260 = arith.constant 6 : index
    %c0_261 = arith.constant 0 : index
    %c0_262 = arith.constant 0 : index
    %788 = vector.load %arg11[%c6_260, %c0_261, %c0_262] : memref<8x128x64xbf16, #tpu.memory_space<vmem>>, vector<1x128x64xbf16>
    %789 = vector.shape_cast %788 : vector<1x128x64xbf16> to vector<128x64xbf16>
    %cst_263 = arith.constant dense<0.000000e+00> : vector<16x64xf32>
    %790 = tpu.matmul %787, %789, %cst_263 {dimension_numbers = #tpu.dot_dimension_numbers<[1], [0], [0], [1], [0, 0, 1, 1], [], []>} : vector<16x128xbf16>, vector<128x64xbf16>, vector<16x64xf32> -> vector<16x64xf32>
    %791 = vector.extract_strided_slice %737 {offsets = [0, 1], sizes = [16, 1], strides = [1, 1]} : vector<16x3xf32> to vector<16x1xf32>
    %792 = vector.broadcast %791 : vector<16x1xf32> to vector<16x64xf32>
    %793 = arith.mulf %790, %792 : vector<16x64xf32>
    %794 = arith.addf %774, %793 : vector<16x64xf32>
    %c7 = arith.constant 7 : index
    %c0_264 = arith.constant 0 : index
    %c0_265 = arith.constant 0 : index
    %795 = vector.load %arg10[%c7, %c0_264, %c0_265] : memref<8x64x256xbf16, #tpu.memory_space<vmem>>, vector<1x64x256xbf16>
    %796 = vector.shape_cast %795 : vector<1x64x256xbf16> to vector<64x256xbf16>
    %cst_266 = arith.constant dense<0.000000e+00> : vector<16x256xf32>
    %797 = tpu.matmul %677, %796, %cst_266 {dimension_numbers = #tpu.dot_dimension_numbers<[1], [0], [0], [1], [0, 0, 1, 1], [], []>} : vector<16x64xbf16>, vector<64x256xbf16>, vector<16x256xf32> -> vector<16x256xf32>
    %798 = vector.extract_strided_slice %797 {offsets = [0, 0], sizes = [16, 128], strides = [1, 1]} : vector<16x256xf32> to vector<16x128xf32>
    %799 = vector.extract_strided_slice %797 {offsets = [0, 128], sizes = [16, 128], strides = [1, 1]} : vector<16x256xf32> to vector<16x128xf32>
    %800 = arith.negf %798 : vector<16x128xf32>
    %801 = math.exp %800 : vector<16x128xf32>
    %cst_267 = arith.constant 1.000000e+00 : f32
    %802 = vector.broadcast %cst_267 : f32 to vector<16x128xf32>
    %803 = arith.addf %802, %801 : vector<16x128xf32>
    %804 = arith.divf %802, %803 : vector<16x128xf32>
    %805 = arith.mulf %798, %804 : vector<16x128xf32>
    %806 = arith.mulf %805, %799 : vector<16x128xf32>
    %807 = arith.truncf %806 : vector<16x128xf32> to vector<16x128xbf16>
    %c7_268 = arith.constant 7 : index
    %c0_269 = arith.constant 0 : index
    %c0_270 = arith.constant 0 : index
    %808 = vector.load %arg11[%c7_268, %c0_269, %c0_270] : memref<8x128x64xbf16, #tpu.memory_space<vmem>>, vector<1x128x64xbf16>
    %809 = vector.shape_cast %808 : vector<1x128x64xbf16> to vector<128x64xbf16>
    %cst_271 = arith.constant dense<0.000000e+00> : vector<16x64xf32>
    %810 = tpu.matmul %807, %809, %cst_271 {dimension_numbers = #tpu.dot_dimension_numbers<[1], [0], [0], [1], [0, 0, 1, 1], [], []>} : vector<16x128xbf16>, vector<128x64xbf16>, vector<16x64xf32> -> vector<16x64xf32>
    %811 = vector.extract_strided_slice %737 {offsets = [0, 2], sizes = [16, 1], strides = [1, 1]} : vector<16x3xf32> to vector<16x1xf32>
    %812 = vector.broadcast %811 : vector<16x1xf32> to vector<16x64xf32>
    %813 = arith.mulf %810, %812 : vector<16x64xf32>
    %814 = arith.addf %794, %813 : vector<16x64xf32>
    %815 = arith.mulf %814, %814 : vector<16x64xf32>
    %cst_272 = arith.constant dense<0.000000e+00> : vector<16xf32>
    %816 = vector.multi_reduction <add>, %815, %cst_272 [1] : vector<16x64xf32> to vector<16xf32>
    %817 = vector.shape_cast %816 : vector<16xf32> to vector<16x1xf32>
    %cst_273 = arith.constant 6.400000e+01 : f32
    %818 = vector.broadcast %cst_273 : f32 to vector<16x1xf32>
    %819 = arith.divf %817, %818 : vector<16x1xf32>
    %cst_274 = arith.constant 9.99999974E-6 : f32
    %820 = vector.broadcast %cst_274 : f32 to vector<16x1xf32>
    %821 = arith.addf %819, %820 : vector<16x1xf32>
    %822 = math.rsqrt %821 : vector<16x1xf32>
    %823 = vector.broadcast %822 : vector<16x1xf32> to vector<16x64xf32>
    %824 = arith.mulf %814, %823 : vector<16x64xf32>
    %c0_275 = arith.constant 0 : index
    %c0_276 = arith.constant 0 : index
    %825 = vector.load %arg12[%c0_275, %c0_276] : memref<1x64xf32, #tpu.memory_space<vmem>>, vector<1x64xf32>
    %826 = vector.broadcast %825 : vector<1x64xf32> to vector<16x64xf32>
    %827 = arith.mulf %824, %826 : vector<16x64xf32>
    %c0_277 = arith.constant 0 : index
    %c0_278 = arith.constant 0 : index
    %828 = vector.load %arg13[%c0_277, %c0_278] : memref<16x64xf32, #tpu.memory_space<vmem>>, vector<16x64xf32>
    tpu.vector_store %arg13[%c0_277, %c0_278], %827 {strides = array<i32>} : memref<16x64xf32, #tpu.memory_space<vmem>>, vector<16x64xf32>,
    return
  }
}

</mosaic_0001>

<bundles_post_ra>
// kernel: model_forward.1
= control target key start
LH: loop header
LB: loop body
LE: loop exit
PB: predicated region body
PF: predicated region fallthrough
CT: control target
= control target key end

     0   :  { %vm57_vm0 = vcmask 523264   ;;  %v6288_v7 = vmov 0.0   ;;  %vm6289_vm1 = vmmov 0   ;;  %s7773_s0 = inlined_call_operand.vmem [shape: f32[16,64], index: 0, kind: input, shape index: {}]   ;;  %s7774_s1 = inlined_call_operand.vmem [shape: f32[8,16], index: 1, kind: input, shape index: {}]   ;;  %s7775_s2 = inlined_call_operand.vmem [shape: f32[8,16], index: 2, kind: input, shape index: {}]   ;;  %s7776_s3 = inlined_call_operand.vmem [shape: f32[2,1,64], index: 3, kind: input, shape index: {}]   ;;  %s7777_s4 = inlined_call_operand.vmem [shape: bf16[2,64,16], index: 4, kind: input, shape index: {}]   ;;  %s7778_s5 = inlined_call_operand.vmem [shape: bf16[2,16,256], index: 5, kind: input, shape index: {}]   ;;  %s7779_s6 = inlined_call_operand.vmem [shape: bf16[2,64,64], index: 6, kind: input, shape index: {}]   ;;  %s7780_s7 = inlined_call_operand.vmem [shape: f32[2,1,64], index: 7, kind: input, shape index: {}]   ;;  %s7781_s8 = inlined_call_operand.vmem [shape: bf16[2,64,3], index: 8, kind: input, shape index: {}]   ;;  %s7782_s9 = inlined_call_operand.vmem [shape: f32[2,1,3], index: 9, kind: input, shape index: {}]   ;;  %s7783_s10 = inlined_call_operand.vmem [shape: bf16[8,64,256], index: 10, kind: input, shape index: {}]   ;;  %s7784_s11 = inlined_call_operand.vmem [shape: bf16[8,128,64], index: 11, kind: input, shape index: {}]   ;;  %s7785_s12 = inlined_call_operand.vmem [shape: f32[1,64], index: 12, kind: input, shape index: {}]   ;;  %s7786_s13 = inlined_call_operand.hbm [shape: f32[16,64], index: 13, kind: output, shape index: {}]  }
   0x1   :  { %v53_v0 = vld [vmem:[%s7773_s0] sm:$0xff]  ;;  %v54_v1 = vld [vmem:[%s7773_s0 + $0x8] sm:$0xff]  ;;  %5440 = vmatprep.subr.bf16.mxu0 %v6288_v7  ;;  %5448 = vmatprep.mubr.msk.bf16.mxu0 %vm6289_vm1, %v6288_v7  ;;  %v5901_v9 = vld [vmem:[%s7777_s4 + $0x10] sm:$0xff]  }
   0x2   :  { %v55_v2 = vmul.f32 %v53_v0, %v53_v0  ;;  %v56_v3 = vmul.f32 %v54_v1, %v54_v1  ;;  %v5899_v6 = vld [vmem:[%s7777_s4] sm:$0xff]   ;;  %v5900_v8 = vld [vmem:[%s7777_s4 + $0x8] sm:$0xff]   ;;  %v5902_v10 = vld [vmem:[%s7777_s4 + $0x18] sm:$0xff]  }
   0x3   :  { %5441 = vmatpush3.bf16.msra.mxu0 %v5899_v6 }
   0x4   :  { %v58_v4 = vsel %vm57_vm0, %v55_v2, 0.0  ;;  %v61_v5 = vsel %vm57_vm0, %v56_v3, 0.0  ;;  %5442 = vmatprep.subr.bf16.mxu0 %v6288_v7 }
   0x5   :  { %59 = vadd.xlane.f32.xlu0 %v58_v4 }
   0x7   :  { %5443 = vmatpush3.bf16.msra.mxu0 %v5900_v8 }
   0x8   :  { %5444 = vmatprep.subr.bf16.mxu0 %v6288_v7 }
   0x9   :  { %62 = vadd.xlane.f32.xlu0 %v61_v5 }
   0xb   :  { %5445 = vmatpush3.bf16.msra.mxu0 %v5901_v9 }
   0xc   :  { %5446 = vmatprep.subr.bf16.mxu0 %v6288_v7 }
   0xf   :  { %5447 = vmatpush3.bf16.msra.mxu0 %v5902_v10 }
  0x10   :  { %5464 = vmatprep.subr.bf16.mxu0 %v6288_v7 }
  0x11   :  { %18 = vsyncpa [#allocation4], 0  ;;  %v4822_v20 = vld [vmem:[%s7776_s3] ss:$0 sm:$0xff]  ;;  %v5903_v25 = vld [vmem:[%s7778_s5 + $0x4] ss:$8 sps:$4 sm:$0xff]  }
  0x12   :  { %v5905_v26 = vld [vmem:[%s7778_s5] ss:$8 sps:$4 sm:$0xff]   ;;  %176 = vmatprep.subr.bf16.mxu1 %v5903_v25  ;;  %v6290_v27 = vmov 0   ;;  %s6291_s28 = smov 80   ;;  %s6292_s29 = smov 96   ;;  %vm172_vm2 = vcmask 130048  }
  0x13   :  { %177 = vmatpush1.bf16.msra.mxu1 %v5905_v26  ;;  %208 = vmatprep.mubr.bf16.mxu1 %v6290_v27  ;;  %v47_v28 = vld [vmem:[%s7775_s2] sm:$0xff]  ;;  %s6293_s15 = smov 48   ;;  %s6294_s16 = smov 32   ;;  %vm291_vm4 = vcmask 64512   ;;  %vm310_vm5 = vcmask 1043456   ;;  %vm477_vm6 = vcmask 261248  }
  0x14   :  { %5452 = vmatprep.subr.bf16.mxu1 %v6288_v7  ;;  %5879 = vset.pattern.permute.xlu0 %v6290_v27  ;;  %v6423_v29 = vld [vmem:[%s7774_s1] sm:$0xff]  ;;  %s6295_s17 = smov 112   ;;  %s6296_s2 = smov 64   ;;  %vm622_vm7 = vcmask 392448   ;;  %vm7787_vm8 = vcmask 523648  }
  0x15   :  { %360 = vrot.lane.b32.xlu1 %v47_v28, %s6291_s28  ;;  %s6297_s18 = smov 16  }
  0x19   :  { %480 = vrot.lane.b32.xlu1 %v47_v28, %s6293_s15 }
  0x1d   :  { %628 = vrot.lane.b32.xlu1 %v47_v28, %s6295_s17 }
  0x1f   :  { %494 = vrot.lane.b32.xlu0 %v47_v28, %s6292_s29 }
  0x21   :  { %221 = vrot.lane.b32.xlu1 %v47_v28, %s6294_s16 }
  0x23   :  { %490 = vrot.lane.b32.xlu0 %v6423_v29, %s6294_s16 }
  0x25   :  { %233 = vrot.lane.b32.xlu1 %v47_v28, %s6296_s2 }
  0x27   :  { %624 = vrot.lane.b32.xlu0 %v6423_v29, %s6293_s15 }
  0x29   :  { %356 = vrot.lane.b32.xlu1 %v6423_v29, %s6297_s18 }
  0x87   :  { %v6438_v35 = vpop.permute.xlu1 %360 }
  0x8b   :  { %v6453_v42 = vpop.permute.xlu1 %480 }
  0x8f   :  { %v6466_v47 = vpop.permute.xlu1 %628 }
  0x92   :  { %v60_v11 = vpop.xlane.xlu0 %59 }
  0x93   :  { %v65_v12 = vmul.f32 0.015625, %v60_v11  ;;  %v6477_v51 = vpop.permute.xlu1 %221 }
  0x95   :  { %v67_v13 = vadd.f32 1e-05, %v65_v12 }
  0x96   :  { %v63_v14 = vpop.xlane.xlu0 %62 }
  0x97   :  { %6089 = vrsqrt.f32 %v67_v13  ;;  %v66_v15 = vmul.f32 0.015625, %v63_v14  ;;  %v6483_v53 = vpop.permute.xlu1 %233 }
  0x99   :  { %v68_v16 = vadd.f32 1e-05, %v66_v15 }
  0x9a   :  { %v6458_v44 = vpop.permute.xlu0 %494 }
  0x9b   :  { %6091 = vrsqrt.f32 %v68_v16  ;;  %v6490_v56 = vpop.permute.xlu1 %356 }
  0x9e   :  { %v6488_v55 = vpop.permute.xlu0 %490 }
  0xa1   :  { %v6090_v17 = vpop.eup %6089 }
  0xa2   :  { %v71_v18 = vmul.f32 %v6090_v17, %v53_v0  ;;  %v6494_v58 = vpop.permute.xlu0 %624 }
  0xa4   :  { %v80_v22 = vmul.f32 %v4822_v20, %v71_v18 }
  0xa5   :  { %v6092_v19 = vpop.eup %6091 }
  0xa6   :  { %v72_v21 = vmul.f32 %v6092_v19, %v54_v1 }
  0xa8   :  { %v81_v23 = vmul.f32 %v4822_v20, %v72_v21 }
  0xaa   :  { %v82_v24 = vpack.c.bf16 %v81_v23, %v80_v22 }
  0xac   :  { %5449 = vmatmul.mubr.msk.bf16.vlgmr.msra.gmra.mrb[0].mxu0 %vm57_vm0, %v82_v24 }
  0xad   :  { %5466 = vmatprep.mubr.msk.bf16.mxu0 %vm6289_vm1, %v6288_v7 }
 0x17f   :  { %v152_v30 = vpop.f32.mrb[0].mxu0 }
 0x180   :  { %v5450_v31 = vpop.f32.mrb[1].mxu0 }
 0x181   :  { %v155_v32 = vpop.f32.mrb[2].mxu0 }
 0x182   :  { %v159_v33 = vpack.c.bf16 %v155_v32, %v152_v30  ;;  %v5451_v34 = vpop.f32.mrb[3].mxu0 }
 0x184   :  { %4830 = vmatmul.mubr.msk.bf16.vlgmr.msra.gmra.mrb[0].mxu1 %vm172_vm2, %v159_v33 }
 0x185   :  { %5454 = vmatprep.mubr.msk.bf16.mxu1 %vm6289_vm1, %v6288_v7 }
 0x257   :  { %v6440_v36 = vpop.f32.mrb[0].mxu1 }
 0x258   :  { %v6442_v37 = vpop.f32.mrb[1].mxu1  ;;  %v363_v38 = vmul.f32 %v6438_v35, %v6440_v36  ;;  %v497_v46 = vmul.f32 %v6458_v44, %v6440_v36  ;;  %v631_v49 = vmul.f32 %v6466_v47, %v6440_v36  ;;  %v236_v54 = vmul.f32 %v6483_v53, %v6440_v36 }
 0x259   :  { %v6446_v39 = vpop.f32.mrb[2].mxu1  ;;  %v483_v43 = vmul.f32 %v6453_v42, %v6442_v37  ;;  %v224_v52 = vmul.f32 %v6477_v51, %v6442_v37  ;;  %v359_v57 = vmul.f32 %v6490_v56, %v6440_v36  ;;  %v479_v62 = vmul.f32 %v6490_v56, %v6442_v37 }
 0x25a   :  { %v6448_v40 = vpop.f32.mrb[3].mxu1  ;;  %365 = vrot.lane.b32.xlu1 %v363_v38, %s6296_s2  ;;  %v875_v41 = vmul.f32 %v6438_v35, %v6446_v39  ;;  %v999_v45 = vmul.f32 %v6458_v44, %v6446_v39  ;;  %v1126_v48 = vmul.f32 %v6466_v47, %v6446_v39  ;;  %v493_v3 = vmul.f32 %v6488_v55, %v6440_v36 }
 0x25b   :  { %v991_v50 = vmul.f32 %v6453_v42, %v6448_v40  ;;  %v627_v9 = vmul.f32 %v6494_v58, %v6440_v36  ;;  %v748_v10 = vmul.f32 %v6477_v51, %v6448_v40  ;;  %v874_v12 = vmul.f32 %v6490_v56, %v6446_v39 }
 0x25c   :  { %877 = vrot.lane.b32.xlu0 %v875_v41, %s6296_s2  ;;  %v990_v16 = vmul.f32 %v6490_v56, %v6448_v40  ;;  %v757_v17 = vmul.f32 %v6483_v53, %v6446_v39  ;;  %v998_v20 = vmul.f32 %v6488_v55, %v6446_v39  ;;  %v1125_v21 = vmul.f32 %v6494_v58, %v6446_v39 }
 0x25d   :  { %v219_v23 = vmul.f32 %v6442_v37, %v6423_v29  ;;  %v232_v41 = vmul.f32 %v6440_v36, %v6423_v29 }
 0x25e   :  { %485 = vrot.lane.b32.xlu1 %v483_v43, %s6292_s29 }
 0x260   :  { %1001 = vrot.lane.b32.xlu0 %v999_v45, %s6296_s2 }
 0x262   :  { %499 = vrot.lane.b32.xlu1 %v497_v46, %s6296_s2 }
 0x264   :  { %1128 = vrot.lane.b32.xlu0 %v1126_v48, %s6296_s2 }
 0x266   :  { %633 = vrot.lane.b32.xlu1 %v631_v49, %s6296_s2 }
 0x26a   :  { %993 = vrot.lane.b32.xlu1 %v991_v50, %s6292_s29 }
 0x26e   :  { %226 = vrot.lane.b32.xlu1 %v224_v52, %s6292_s29  ;;  %v747_v52 = vmul.f32 %v6448_v40, %v6423_v29 }
 0x272   :  { %238 = vrot.lane.b32.xlu1 %v236_v54, %s6296_s2 }
 0x2cc   :  { %v366_v59 = vpop.permute.xlu1 %365 }
 0x2cd   :  { %v368_v60 = vadd.f32 %v366_v59, %v359_v57 }
 0x2ce   :  { %v878_v63 = vpop.permute.xlu0 %877 }
 0x2cf   :  { %v369_v61 = vpack.c.bf16 %v368_v60, %v368_v60  ;;  %v880_v14 = vadd.f32 %v878_v63, %v874_v12 }
 0x2d0   :  { %v486_v0 = vpop.permute.xlu1 %485 }
 0x2d1   :  { %v488_v1 = vadd.f32 %v486_v0, %v479_v62  ;;  %371 = vrot.lane.b32.xlu0 %v369_v61, %s6295_s17  ;;  %v881_v24 = vpack.c.bf16 %v880_v14, %v880_v14  ;;  %v756_v62 = vmul.f32 %v6446_v39, %v6423_v29 }
 0x2d2   :  { %v1002_v6 = vpop.permute.xlu0 %1001 }
 0x2d3   :  { %v489_v2 = vpack.c.bf16 %v488_v1, %v488_v1  ;;  %v1004_v25 = vadd.f32 %v1002_v6, %v998_v20 }
 0x2d4   :  { %v500_v4 = vpop.permute.xlu1 %499 }
 0x2d5   :  { %v502_v5 = vadd.f32 %v500_v4, %v493_v3  ;;  %508 = vrot.lane.b32.xlu1 %v489_v2, %s6295_s17  ;;  %v1005_v32 = vpack.c.bf16 %v1004_v25, %v1004_v25 }
 0x2d6   :  { %v1129_v18 = vpop.permute.xlu0 %1128 }
 0x2d7   :  { %v503_v8 = vpack.c.bf16 %v502_v5, %v502_v5  ;;  %v1131_v26 = vadd.f32 %v1129_v18, %v1125_v21  ;;  %v48_v5 = vlaneseq }
 0x2d8   :  { %v634_v11 = vpop.permute.xlu1 %633 }
 0x2d9   :  { %v636_v13 = vadd.f32 %v634_v11, %v627_v9  ;;  %750 = vrot.lane.b32.xlu1 %v748_v10, %s6292_s29  ;;  %505 = vrot.lane.b32.xlu0 %v503_v8, %s6292_s29  ;;  %v1132_v33 = vpack.c.bf16 %v1131_v26, %v1131_v26  ;;  %v49_v6 = vshrl.u32 %v48_v5, 7  ;;  %v6568_v8 = vand.u32 127, %v48_v5 }
 0x2db   :  { %v637_v15 = vpack.c.bf16 %v636_v13, %v636_v13  ;;  %vm6571_vm3 = vcmp.le.s32.totalorder %v6568_v8, %v49_v6  ;;  %vm1490_vm9 = vcmp.gt.s32.totalorder %v6568_v8, 1  ;;  %vm1465_vm10 = vcmp.gt.s32.totalorder %v6568_v8, 0 }
 0x2dc   :  { %v994_v19 = vpop.permute.xlu1 %993  ;;  %vm1515_vm15 = vcmp.gt.s32.totalorder %v6568_v8, 2 }
 0x2dd   :  { %v996_v22 = vadd.f32 %v994_v19, %v990_v16  ;;  %759 = vrot.lane.b32.xlu1 %v757_v17, %s6296_s2  ;;  %639 = vrot.lane.b32.xlu0 %v637_v15, %s6291_s28 }
 0x2df   :  { %v997_v28 = vpack.c.bf16 %v996_v22, %v996_v22 }
 0x2e0   :  { %v227_v30 = vpop.permute.xlu1 %226 }
 0x2e1   :  { %v229_v31 = vadd.f32 %v227_v30, %v219_v23  ;;  %883 = vrot.lane.b32.xlu0 %v881_v24, %s6295_s17  ;;  %1010 = vrot.lane.b32.xlu1 %v997_v28, %s6295_s17 }
 0x2e3   :  { %v230_v34 = vpack.c.bf16 %v229_v31, %v229_v31 }
 0x2e4   :  { %v239_v38 = vpop.permute.xlu1 %238 }
 0x2e5   :  { %1007 = vrot.lane.b32.xlu0 %v1005_v32, %s6292_s29  ;;  %1134 = vrot.lane.b32.xlu1 %v1132_v33, %s6291_s28  ;;  %v247_v43 = vsel %vm172_vm2, %v230_v34, 0  ;;  %v241_v45 = vadd.f32 %v239_v38, %v232_v41 }
 0x2e6   :  { %5453 = vmatpush3.bf16.xpose.msra.mxu1 %v247_v43  ;;  %5465 = vmatpush3.bf16.xpose.msra.mxu0 %v247_v43 }
 0x2e7   :  { %5476 = vmatprep.subr.bf16.mxu0 %v6288_v7  ;;  %5458 = vmatprep.subr.bf16.mxu1 %v6288_v7  ;;  %v242_v46 = vpack.c.bf16 %v241_v45, %v241_v45 }
 0x2ed   :  { %5455 = vmatmul.mubr.msk.bf16.vlgmr.msra.gmra.mrb[4].mxu1 %vm172_vm2, %v242_v46 }
 0x2ee   :  { %5460 = vmatprep.mubr.msk.bf16.mxu1 %vm6289_vm1, %v6288_v7 }
 0x343   :  { %v372_v36 = vpop.permute.xlu0 %371 }
 0x344   :  { %5467 = vmatmul.mubr.msk.bf16.vlgmr.msra.gmra.mrb[4].mxu0 %vm172_vm2, %v372_v36 }
 0x345   :  { %5478 = vmatprep.mubr.msk.bf16.mxu0 %vm6289_vm1, %v6288_v7 }
 0x347   :  { %v509_v48 = vpop.permute.xlu1 %508 }
 0x348   :  { %v514_v49 = vsel %vm172_vm2, %v509_v48, 0 }
 0x349   :  { %5477 = vmatpush3.bf16.xpose.msra.mxu0 %v514_v49 }
 0x34a   :  { %5488 = vmatprep.subr.bf16.mxu0 %v6288_v7 }
 0x34b   :  { %v751_v50 = vpop.permute.xlu1 %750  ;;  %v506_v54 = vpop.permute.xlu0 %505 }
 0x34c   :  { %v753_v57 = vadd.f32 %v751_v50, %v747_v52 }
 0x34e   :  { %v754_v59 = vpack.c.bf16 %v753_v57, %v753_v57 }
 0x34f   :  { %v640_v60 = vpop.permute.xlu0 %639  ;;  %v760_v61 = vpop.permute.xlu1 %759 }
 0x350   :  { %5479 = vmatmul.mubr.msk.bf16.vlgmr.msra.gmra.mrb[8].mxu0 %vm172_vm2, %v506_v54  ;;  %v768_v63 = vsel %vm172_vm2, %v754_v59, 0  ;;  %v762_v0 = vadd.f32 %v760_v61, %v756_v62 }
 0x351   :  { %5489 = vmatpush3.bf16.xpose.msra.mxu0 %v514_v49  ;;  %5490 = vmatprep.mubr.msk.bf16.mxu0 %vm6289_vm1, %v6288_v7 }
 0x352   :  { %5500 = vmatprep.subr.bf16.mxu0 %v6288_v7  ;;  %v763_v1 = vpack.c.bf16 %v762_v0, %v762_v0 }
 0x353   :  { %v1011_v29 = vpop.permute.xlu1 %1010  ;;  %v884_v39 = vpop.permute.xlu0 %883 }
 0x354   :  { %v1016_v2 = vsel %vm172_vm2, %v1011_v29, 0 }
 0x357   :  { %v1008_v3 = vpop.permute.xlu0 %1007  ;;  %v1135_v4 = vpop.permute.xlu1 %1134 }
 0x358   :  { %5491 = vmatmul.mubr.msk.bf16.vlgmr.msra.gmra.mrb[12].mxu0 %vm172_vm2, %v640_v60 }
 0x359   :  { %5501 = vmatpush3.bf16.xpose.msra.mxu0 %v768_v63  ;;  %5502 = vmatprep.mubr.msk.bf16.mxu0 %vm6289_vm1, %v6288_v7 }
 0x35a   :  { %5512 = vmatprep.subr.bf16.mxu0 %v6288_v7 }
 0x360   :  { %5503 = vmatmul.mubr.msk.bf16.vlgmr.msra.gmra.mrb[16].mxu0 %vm172_vm2, %v763_v1 }
 0x361   :  { %5513 = vmatpush3.bf16.xpose.msra.mxu0 %v768_v63  ;;  %5514 = vmatprep.mubr.msk.bf16.mxu0 %vm6289_vm1, %v6288_v7 }
 0x362   :  { %5524 = vmatprep.subr.bf16.mxu0 %v6288_v7 }
 0x368   :  { %5515 = vmatmul.mubr.msk.bf16.vlgmr.msra.gmra.mrb[20].mxu0 %vm172_vm2, %v884_v39 }
 0x369   :  { %5525 = vmatpush3.bf16.xpose.msra.mxu0 %v1016_v2  ;;  %5526 = vmatprep.mubr.msk.bf16.mxu0 %vm6289_vm1, %v6288_v7 }
 0x36a   :  { %5536 = vmatprep.subr.bf16.mxu0 %v6288_v7 }
 0x370   :  { %5527 = vmatmul.mubr.msk.bf16.vlgmr.msra.gmra.mrb[24].mxu0 %vm172_vm2, %v1008_v3 }
 0x371   :  { %5537 = vmatpush3.bf16.xpose.msra.mxu0 %v1016_v2  ;;  %5538 = vmatprep.mubr.msk.bf16.mxu0 %vm6289_vm1, %v6288_v7 }
 0x372   :  { %5548 = vmatprep.subr.bf16.mxu0 %v6288_v7 }
 0x378   :  { %5539 = vmatmul.mubr.msk.bf16.vlgmr.msra.gmra.mrb[28].mxu0 %vm172_vm2, %v1135_v4 }
 0x379   :  { %5556 = vmatprep.mubr.msk.bf16.mxu0 %vm6289_vm1, %v6288_v7 }
 0x3c0   :  { %v283_v9 = vpop.f32.mrb[4].mxu1 }
 0x3c1   :  { %v289_v11 = vmul.f32 0.25, %v283_v9  ;;  %v5456_v12 = vpop.f32.mrb[5].mxu1 }
 0x3c2   :  { %v286_v13 = vpop.f32.mrb[6].mxu1 }
 0x3c3   :  { %v5457_v14 = vpop.f32.mrb[7].mxu1  ;;  %v290_v15 = vsel %vm6571_vm3, %v289_v11, -inf }
 0x3c4   :  { %v292_v16 = vsel %vm291_vm4, %v290_v15, -inf }
 0x3c5   :  { %293 = vmax.xlane.f32.xlu0 %v292_v16 }
 0x417   :  { %v410_v17 = vpop.f32.mrb[4].mxu0 }
 0x418   :  { %v416_v18 = vmul.f32 0.25, %v410_v17  ;;  %v5468_v19 = vpop.f32.mrb[5].mxu0 }
 0x419   :  { %v413_v20 = vpop.f32.mrb[6].mxu0 }
 0x41a   :  { %v5469_v21 = vpop.f32.mrb[7].mxu0  ;;  %v417_v22 = vsel %vm6571_vm3, %v416_v18, -inf }
 0x41b   :  { %v418_v23 = vsel %vm291_vm4, %v417_v22, -inf }
 0x41c   :  { %419 = vmax.xlane.f32.xlu1 %v418_v23 }
 0x423   :  { %v550_v24 = vpop.f32.mrb[8].mxu0 }
 0x424   :  { %v556_v25 = vmul.f32 0.25, %v550_v24  ;;  %v5480_v26 = vpop.f32.mrb[9].mxu0 }
 0x425   :  { %v553_v28 = vpop.f32.mrb[10].mxu0 }
 0x426   :  { %v5481_v30 = vpop.f32.mrb[11].mxu0  ;;  %v557_v31 = vsel %vm6571_vm3, %v556_v25, -inf }
 0x427   :  { %v558_v32 = vsel %vm291_vm4, %v557_v31, -inf }
 0x428   :  { %559 = vmax.xlane.f32.xlu0 %v558_v32 }
 0x42b   :  { %v678_v33 = vpop.f32.mrb[12].mxu0 }
 0x42c   :  { %v684_v34 = vmul.f32 0.25, %v678_v33  ;;  %v5492_v38 = vpop.f32.mrb[13].mxu0 }
 0x42d   :  { %v681_v41 = vpop.f32.mrb[14].mxu0 }
 0x42e   :  { %v5493_v43 = vpop.f32.mrb[15].mxu0  ;;  %v685_v45 = vsel %vm6571_vm3, %v684_v34, -inf }
 0x42f   :  { %v686_v46 = vsel %vm291_vm4, %v685_v45, -inf }
 0x430   :  { %687 = vmax.xlane.f32.xlu0 %v686_v46 }
 0x433   :  { %v804_v36 = vpop.f32.mrb[16].mxu0 }
 0x434   :  { %v810_v48 = vmul.f32 0.25, %v804_v36  ;;  %v5504_v49 = vpop.f32.mrb[17].mxu0 }
 0x435   :  { %v807_v50 = vpop.f32.mrb[18].mxu0 }
 0x436   :  { %v5505_v52 = vpop.f32.mrb[19].mxu0  ;;  %v811_v54 = vsel %vm6571_vm3, %v810_v48, -inf }
 0x437   :  { %v812_v57 = vsel %vm291_vm4, %v811_v54, -inf  ;;  %v231_v52 = vpack.c.bf16 %v6442_v37, %v6442_v37 }
 0x438   :  { %813 = vmax.xlane.f32.xlu1 %v812_v57 }
 0x43b   :  { %v922_v59 = vpop.f32.mrb[20].mxu0 }
 0x43c   :  { %v928_v60 = vmul.f32 0.25, %v922_v59  ;;  %v5516_v61 = vpop.f32.mrb[21].mxu0 }
 0x43d   :  { %v925_v62 = vpop.f32.mrb[22].mxu0 }
 0x43e   :  { %v5517_v63 = vpop.f32.mrb[23].mxu0  ;;  %v6592_v0 = vsel %vm6571_vm3, %v928_v60, -inf }
 0x43f   :  { %v930_v1 = vsel %vm291_vm4, %v6592_v0, -inf }
 0x440   :  { %931 = vmax.xlane.f32.xlu0 %v930_v1 }
 0x443   :  { %v1052_v29 = vpop.f32.mrb[24].mxu0 }
 0x444   :  { %v1058_v39 = vmul.f32 0.25, %v1052_v29  ;;  %v5528_v2 = vpop.f32.mrb[25].mxu0 }
 0x445   :  { %v1055_v3 = vpop.f32.mrb[26].mxu0 }
 0x446   :  { %v5529_v4 = vpop.f32.mrb[27].mxu0  ;;  %v1059_v5 = vsel %vm6571_vm3, %v1058_v39, -inf }
 0x447   :  { %v1060_v6 = vsel %vm291_vm4, %v1059_v5, -inf }
 0x448   :  { %1061 = vmax.xlane.f32.xlu1 %v1060_v6 }
 0x44b   :  { %v1173_v9 = vpop.f32.mrb[28].mxu0 }
 0x44c   :  { %v1179_v11 = vmul.f32 0.25, %v1173_v9  ;;  %v5540_v12 = vpop.f32.mrb[29].mxu0 }
 0x44d   :  { %v1176_v13 = vpop.f32.mrb[30].mxu0 }
 0x44e   :  { %v5541_v14 = vpop.f32.mrb[31].mxu0  ;;  %v1180_v16 = vsel %vm6571_vm3, %v1179_v11, -inf }
 0x44f   :  { %v1181_v17 = vsel %vm291_vm4, %v1180_v16, -inf }
 0x450   :  { %1182 = vmax.xlane.f32.xlu0 %v1181_v17 }
 0x452   :  { %v294_v18 = vpop.xlane.xlu0 %293 }
 0x453   :  { %v295_v19 = vsub.f32 %v290_v15, %v294_v18 }
 0x455   :  { %v296_v20 = vmul.f32 1.442695, %v295_v19 }
 0x457   :  { %6093 = vpow2.f32 %v296_v20 }
 0x461   :  { %v6602_v21 = vpop.eup %6093 }
 0x462   :  { %v298_v23 = vsel %vm291_vm4, %v6602_v21, 0.0 }
 0x463   :  { %299 = vadd.xlane.f32.xlu1 %v298_v23 }
 0x4a9   :  { %v420_v24 = vpop.xlane.xlu1 %419 }
 0x4aa   :  { %v421_v25 = vsub.f32 %v417_v22, %v420_v24 }
 0x4ac   :  { %v422_v26 = vmul.f32 1.442695, %v421_v25 }
 0x4ae   :  { %6095 = vpow2.f32 %v422_v26 }
 0x4b5   :  { %v560_v28 = vpop.xlane.xlu0 %559 }
 0x4b6   :  { %v561_v30 = vsub.f32 %v557_v31, %v560_v28 }
 0x4b8   :  { %v6606_v32 = vpop.eup %6095  ;;  %v562_v33 = vmul.f32 1.442695, %v561_v30 }
 0x4b9   :  { %v424_v15 = vsel %vm291_vm4, %v6606_v32, 0.0 }
 0x4ba   :  { %6097 = vpow2.f32 %v562_v33  ;;  %425 = vadd.xlane.f32.xlu0 %v424_v15 }
 0x4bd   :  { %v688_v34 = vpop.xlane.xlu0 %687 }
 0x4be   :  { %v689_v38 = vsub.f32 %v685_v45, %v688_v34 }
 0x4c0   :  { %v690_v41 = vmul.f32 1.442695, %v689_v38 }
 0x4c2   :  { %6099 = vpow2.f32 %v690_v41 }
 0x4c4   :  { %v6610_v43 = vpop.eup %6097 }
 0x4c5   :  { %v814_v46 = vpop.xlane.xlu1 %813  ;;  %v564_v22 = vsel %vm291_vm4, %v6610_v43, 0.0 }
 0x4c6   :  { %v815_v36 = vsub.f32 %v811_v54, %v814_v46  ;;  %565 = vadd.xlane.f32.xlu1 %v564_v22 }
 0x4c8   :  { %v816_v31 = vmul.f32 1.442695, %v815_v36 }
 0x4ca   :  { %6101 = vpow2.f32 %v816_v31 }
 0x4cc   :  { %v6614_v48 = vpop.eup %6099 }
 0x4cd   :  { %v692_v49 = vsel %vm291_vm4, %v6614_v48, 0.0  ;;  %v932_v60 = vpop.xlane.xlu0 %931 }
 0x4ce   :  { %693 = vadd.xlane.f32.xlu0 %v692_v49  ;;  %v933_v61 = vsub.f32 %v6592_v0, %v932_v60  ;;  %v755_v0 = vpack.c.bf16 %v6448_v40, %v6448_v40 }
 0x4d0   :  { %v934_v1 = vmul.f32 1.442695, %v933_v61 }
 0x4d4   :  { %v6618_v50 = vpop.eup %6101 }
 0x4d5   :  { %v818_v45 = vsel %vm291_vm4, %v6618_v50, 0.0  ;;  %v1062_v54 = vpop.xlane.xlu1 %1061 }
 0x4d6   :  { %819 = vadd.xlane.f32.xlu0 %v818_v45  ;;  %v1063_v57 = vsub.f32 %v1059_v5, %v1062_v54 }
 0x4d7   :  { %305 = vrot.lane.b32.xlu1 %v231_v52, %s6296_s2 }
 0x4d8   :  { %v1064_v59 = vmul.f32 1.442695, %v1063_v57 }
 0x4da   :  { %6103 = vpow2.f32 %v1064_v59 }
 0x4db   :  { %6105 = vpow2.f32 %v934_v1 }
 0x4dd   :  { %v1183_v62 = vpop.xlane.xlu0 %1182 }
 0x4de   :  { %v1184_v29 = vsub.f32 %v1180_v16, %v1183_v62 }
 0x4e0   :  { %v1185_v39 = vmul.f32 1.442695, %v1184_v29 }
 0x4e2   :  { %6107 = vpow2.f32 %v1185_v39 }
 0x4e4   :  { %v6627_v63 = vpop.eup %6103 }
 0x4e5   :  { %v1066_v37 = vsel %vm291_vm4, %v6627_v63, 0.0  ;;  %v6631_v2 = vpop.eup %6105 }
 0x4e6   :  { %v936_v3 = vsel %vm291_vm4, %v6631_v2, 0.0 }
 0x4ec   :  { %570 = vrot.lane.b32.xlu0 %v231_v52, %s6293_s15  ;;  %v6637_v4 = vpop.eup %6107 }
 0x4ed   :  { %v1187_v5 = vsel %vm291_vm4, %v6637_v4, 0.0 }
 0x4f0   :  { %v300_v6 = vpop.xlane.xlu1 %299 }
 0x4f1   :  { %6109 = vrcp.f32 %v300_v6 }
 0x4fb   :  { %1067 = vadd.xlane.f32.xlu1 %v1066_v37  ;;  %v6110_v11 = vpop.eup %6109 }
 0x4fc   :  { %v302_v40 = vmul.f32 %v6110_v11, %v6602_v21 }
 0x4fe   :  { %v303_v16 = vpack.c.bf16 %v302_v40, %v302_v40 }
 0x50b   :  { %937 = vadd.xlane.f32.xlu0 %v936_v3 }
 0x50c   :  { %825 = vrot.lane.b32.xlu1 %v755_v0, %s6296_s2 }
 0x50f   :  { %1188 = vadd.xlane.f32.xlu0 %v1187_v5 }
 0x525   :  { %1072 = vrot.lane.b32.xlu0 %v755_v0, %s6293_s15 }
 0x547   :  { %v426_v9 = vpop.xlane.xlu0 %425 }
 0x548   :  { %6111 = vrcp.f32 %v426_v9 }
 0x552   :  { %v6112_v17 = vpop.eup %6111 }
 0x553   :  { %v566_v12 = vpop.xlane.xlu1 %565  ;;  %v428_v18 = vmul.f32 %v6112_v17, %v6606_v32 }
 0x554   :  { %6113 = vrcp.f32 %v566_v12 }
 0x555   :  { %v429_v20 = vpack.c.bf16 %v428_v18, %v428_v18  ;;  %v5906_v18 = vld [vmem:[%s7779_s6] sm:$0xff]  }
 0x556   :  { %5549 = vmatpush3.bf16.msra.mxu0 %v5906_v18  ;;  %v4852_v18 = vld [vmem:[%s7780_s7] ss:$0 sm:$0xff] }
 0x557   :  { %v306_v13 = vpop.permute.xlu1 %305  ;;  %5550 = vmatprep.subr.bf16.mxu0 %v6288_v7 }
 0x558   :  { %v312_v14 = vsel %vm310_vm5, %v306_v13, 0 }
 0x559   :  { %5459 = vmatpush3.bf16.msra.mxu1 %v312_v14 }
 0x55a   :  { %5470 = vmatprep.subr.bf16.mxu1 %v6288_v7 }
 0x55b   :  { %v694_v19 = vpop.xlane.xlu0 %693 }
 0x55c   :  { %5461 = vmatmul.mubr.msk.bf16.vlgmr.msra.gmra.mrb[8].mxu1 %vm291_vm4, %v303_v16  ;;  %6115 = vrcp.f32 %v694_v19  ;;  %v5907_v19 = vld [vmem:[%s7779_s6 + $0x8] sm:$0xff]  }
 0x55d   :  { %5471 = vmatpush3.bf16.msra.mxu1 %v312_v14  ;;  %5472 = vmatprep.mubr.msk.bf16.mxu1 %vm6289_vm1, %v6288_v7 }
 0x55e   :  { %5482 = vmatprep.subr.bf16.mxu1 %v6288_v7  ;;  %v6114_v21 = vpop.eup %6113  ;;  %5551 = vmatpush3.bf16.msra.mxu0 %v5907_v19 }
 0x55f   :  { %v568_v24 = vmul.f32 %v6114_v21, %v6610_v43  ;;  %5552 = vmatprep.subr.bf16.mxu0 %v6288_v7 }
 0x561   :  { %v569_v28 = vpack.c.bf16 %v568_v24, %v568_v24 }
 0x563   :  { %v820_v23 = vpop.xlane.xlu0 %819 }
 0x564   :  { %5473 = vmatmul.mubr.msk.bf16.vlgmr.msra.gmra.mrb[12].mxu1 %vm291_vm4, %v429_v20  ;;  %6117 = vrcp.f32 %v820_v23 }
 0x565   :  { %5484 = vmatprep.mubr.msk.bf16.mxu1 %vm6289_vm1, %v6288_v7 }
 0x566   :  { %v6116_v30 = vpop.eup %6115 }
 0x567   :  { %v571_v25 = vpop.permute.xlu0 %570  ;;  %v696_v32 = vmul.f32 %v6116_v30, %v6614_v48 }
 0x568   :  { %v576_v26 = vsel %vm310_vm5, %v571_v25, 0  ;;  %v5908_v25 = vld [vmem:[%s7779_s6 + $0x10] sm:$0xff]  }
 0x569   :  { %5483 = vmatpush3.bf16.msra.mxu1 %v576_v26  ;;  %v697_v33 = vpack.c.bf16 %v696_v32, %v696_v32  ;;  %5553 = vmatpush3.bf16.msra.mxu0 %v5908_v25  ;;  %v5919_v25 = vld [vmem:[%s7783_s10 + $0x14] ss:$8 sps:$4 sm:$0xff]  }
 0x56a   :  { %5494 = vmatprep.subr.bf16.mxu1 %v6288_v7  ;;  %5554 = vmatprep.subr.bf16.mxu0 %v6288_v7 }
 0x56c   :  { %5485 = vmatmul.mubr.msk.bf16.vlgmr.msra.gmra.mrb[16].mxu1 %vm291_vm4, %v569_v28 }
 0x56d   :  { %5495 = vmatpush3.bf16.msra.mxu1 %v576_v26  ;;  %5496 = vmatprep.mubr.msk.bf16.mxu1 %vm6289_vm1, %v6288_v7  ;;  %v5909_v26 = vld [vmem:[%s7779_s6 + $0x18] sm:$0xff]  }
 0x56e   :  { %5506 = vmatprep.subr.bf16.mxu1 %v6288_v7  ;;  %v6118_v15 = vpop.eup %6117  ;;  %5555 = vmatpush3.bf16.msra.mxu0 %v5909_v26  ;;  %v5917_v26 = vld [vmem:[%s7783_s10 + $0x10] ss:$8 sps:$4 sm:$0xff]  }
 0x56f   :  { %v822_v38 = vmul.f32 %v6118_v15, %v6618_v50  ;;  %5560 = vmatprep.subr.bf16.mxu0 %v6288_v7 }
 0x571   :  { %v823_v46 = vpack.c.bf16 %v822_v38, %v822_v38 }
 0x574   :  { %5497 = vmatmul.mubr.msk.bf16.vlgmr.msra.gmra.mrb[20].mxu1 %vm291_vm4, %v697_v33 }
 0x575   :  { %5508 = vmatprep.mubr.msk.bf16.mxu1 %vm6289_vm1, %v6288_v7 }
 0x588   :  { %v1068_v34 = vpop.xlane.xlu1 %1067 }
 0x58c   :  { %v826_v41 = vpop.permute.xlu1 %825 }
 0x58d   :  { %v831_v43 = vsel %vm310_vm5, %v826_v41, 0 }
 0x58e   :  { %5507 = vmatpush3.bf16.msra.mxu1 %v831_v43 }
 0x58f   :  { %5518 = vmatprep.subr.bf16.mxu1 %v6288_v7 }
 0x591   :  { %5509 = vmatmul.mubr.msk.bf16.vlgmr.msra.gmra.mrb[24].mxu1 %vm291_vm4, %v823_v46 }
 0x592   :  { %5519 = vmatpush3.bf16.msra.mxu1 %v831_v43  ;;  %5520 = vmatprep.mubr.msk.bf16.mxu1 %vm6289_vm1, %v6288_v7 }
 0x593   :  { %5530 = vmatprep.subr.bf16.mxu1 %v6288_v7 }
 0x598   :  { %v938_v22 = vpop.xlane.xlu0 %937 }
 0x599   :  { %6119 = vrcp.f32 %v938_v22 }
 0x59a   :  { %6121 = vrcp.f32 %v1068_v34 }
 0x59c   :  { %v1189_v36 = vpop.xlane.xlu0 %1188 }
 0x59d   :  { %6123 = vrcp.f32 %v1189_v36 }
 0x5a0   :  { %v1073_v49 = vpop.permute.xlu0 %1072 }
 0x5a1   :  { %v1078_v52 = vsel %vm310_vm5, %v1073_v49, 0 }
 0x5a3   :  { %v6120_v31 = vpop.eup %6119 }
 0x5a4   :  { %v940_v48 = vmul.f32 %v6120_v31, %v6631_v2  ;;  %v6122_v45 = vpop.eup %6121 }
 0x5a5   :  { %v1070_v54 = vmul.f32 %v6122_v45, %v6627_v63 }
 0x5a6   :  { %v941_v50 = vpack.c.bf16 %v940_v48, %v940_v48 }
 0x5a7   :  { %v1071_v57 = vpack.c.bf16 %v1070_v54, %v1070_v54  ;;  %v6124_v59 = vpop.eup %6123  ;;  %v6261_v54 = vld [vmem:[%s7773_s0] sm:$0xff] }
 0x5a8   :  { %5521 = vmatmul.mubr.msk.bf16.vlgmr.msra.gmra.mrb[28].mxu1 %vm291_vm4, %v941_v50  ;;  %v1191_v60 = vmul.f32 %v6124_v59, %v6637_v4 }
 0x5a9   :  { %5531 = vmatpush3.bf16.msra.mxu1 %v1078_v52  ;;  %5532 = vmatprep.mubr.msk.bf16.mxu1 %vm6289_vm1, %v6288_v7 }
 0x5aa   :  { %5542 = vmatprep.subr.bf16.mxu1 %v6288_v7  ;;  %v1192_v61 = vpack.c.bf16 %v1191_v60, %v1191_v60 }
 0x5b0   :  { %5533 = vmatmul.mubr.msk.bf16.vlgmr.msra.gmra.mrb[32].mxu1 %vm291_vm4, %v1071_v57 }
 0x5b1   :  { %5543 = vmatpush3.bf16.msra.mxu1 %v1078_v52  ;;  %5544 = vmatprep.mubr.msk.bf16.mxu1 %vm6289_vm1, %v6288_v7 }
 0x5b2   :  { %5572 = vmatprep.subr.bf16.mxu1 %v6288_v7 }
 0x5b8   :  { %5545 = vmatmul.mubr.msk.bf16.vlgmr.msra.gmra.mrb[36].mxu1 %vm291_vm4, %v1192_v61  ;;  %v6262_v61 = vld [vmem:[%s7773_s0 + $0x8] sm:$0xff] }
 0x5b9   :  { %5588 = vmatprep.mubr.msk.bf16.mxu1 %vm6289_vm1, %v6288_v7 }
 0x62f   :  { %v348_v62 = vpop.f32.mrb[8].mxu1 }
 0x630   :  { %354 = vst.msk [vmem:[#allocation2] sm:$0xff] %vm172_vm2, %v348_v62  ;;  %v5462_v63 = vpop.f32.mrb[9].mxu1 }
 0x631   :  { %v351_v1 = vpop.f32.mrb[10].mxu1 }
 0x632   :  { %v5463_v29 = vpop.f32.mrb[11].mxu1 }
 0x637   :  { %v467_v37 = vpop.f32.mrb[12].mxu1 }
 0x638   :  { %474 = vrot.lane.b32.xlu1 %v467_v37, %s6297_s18  ;;  %v5474_v39 = vpop.f32.mrb[13].mxu1 }
 0x639   :  { %v470_v2 = vpop.f32.mrb[14].mxu1 }
 0x63a   :  { %v5475_v3 = vpop.f32.mrb[15].mxu1  ;;  %v5910_v2 = vld [vmem:[%s7781_s8] sm:$0xff]  }
 0x63b   :  { %v5911_v3 = vld [vmem:[%s7781_s8 + $0x8] sm:$0xff]  }
 0x63f   :  { %v612_v0 = vpop.f32.mrb[16].mxu1 }
 0x640   :  { %619 = vrot.lane.b32.xlu1 %v612_v0, %s6294_s16  ;;  %v5486_v4 = vpop.f32.mrb[17].mxu1  ;;  %v5912_v0 = vld [vmem:[%s7781_s8 + $0x10] sm:$0xff]  }
 0x641   :  { %v615_v5 = vpop.f32.mrb[18].mxu1  ;;  %v5913_v4 = vld [vmem:[%s7781_s8 + $0x18] sm:$0xff]  }
 0x642   :  { %v5487_v6 = vpop.f32.mrb[19].mxu1  ;;  %v5916_v5 = vld [vmem:[%s7783_s10 + $0x4] ss:$8 sps:$4 sm:$0xff]  }
 0x647   :  { %v735_v9 = vpop.f32.mrb[20].mxu1 }
 0x648   :  { %742 = vrot.lane.b32.xlu0 %v735_v9, %s6293_s15  ;;  %v5498_v11 = vpop.f32.mrb[21].mxu1 }
 0x649   :  { %v738_v12 = vpop.f32.mrb[22].mxu1 }
 0x64a   :  { %v5499_v40 = vpop.f32.mrb[23].mxu1 }
 0x664   :  { %v867_v13 = vpop.f32.mrb[24].mxu1 }
 0x665   :  { %873 = vst.msk [vmem:[#allocation2 + $0x8] sm:$0xff] %vm172_vm2, %v867_v13  ;;  %v5510_v14 = vpop.f32.mrb[25].mxu1 }
 0x666   :  { %v870_v16 = vpop.f32.mrb[26].mxu1 }
 0x667   :  { %v5511_v17 = vpop.f32.mrb[27].mxu1 }
 0x67b   :  { %v979_v20 = vpop.f32.mrb[28].mxu1 }
 0x67c   :  { %986 = vrot.lane.b32.xlu1 %v979_v20, %s6297_s18  ;;  %v5522_v21 = vpop.f32.mrb[29].mxu1 }
 0x67d   :  { %v982_v23 = vpop.f32.mrb[30].mxu1 }
 0x67e   :  { %v5523_v24 = vpop.f32.mrb[31].mxu1  ;;  %v5914_v23 = vld [vmem:[%s7783_s10] ss:$8 sps:$4 sm:$0xff]  }
 0x683   :  { %v1114_v28 = vpop.f32.mrb[32].mxu1 }
 0x684   :  { %1121 = vrot.lane.b32.xlu1 %v1114_v28, %s6294_s16  ;;  %v5534_v30 = vpop.f32.mrb[33].mxu1  ;;  %v5922_v28 = vld [vmem:[%s7783_s10 + $0x24] ss:$8 sps:$4 sm:$0xff]  }
 0x685   :  { %v1117_v32 = vpop.f32.mrb[34].mxu1  ;;  %v5920_v30 = vld [vmem:[%s7783_s10 + $0x20] ss:$8 sps:$4 sm:$0xff]  }
 0x686   :  { %v5535_v33 = vpop.f32.mrb[35].mxu1  ;;  %v5925_v32 = vld [vmem:[%s7783_s10 + $0x34] ss:$8 sps:$4 sm:$0xff]  }
 0x687   :  { %v5923_v33 = vld [vmem:[%s7783_s10 + $0x30] ss:$8 sps:$4 sm:$0xff]  }
 0x68b   :  { %v1230_v15 = vpop.f32.mrb[36].mxu1 }
 0x68c   :  { %1237 = vrot.lane.b32.xlu1 %v1230_v15, %s6293_s15  ;;  %v5546_v34 = vpop.f32.mrb[37].mxu1  ;;  %v5928_v15 = vld [vmem:[%s7783_s10 + $0x44] ss:$8 sps:$4 sm:$0xff]  }
 0x68d   :  { %v1233_v38 = vpop.f32.mrb[38].mxu1  ;;  %v5926_v34 = vld [vmem:[%s7783_s10 + $0x40] ss:$8 sps:$4 sm:$0xff]  }
 0x68e   :  { %v5547_v41 = vpop.f32.mrb[39].mxu1  ;;  %v5931_v38 = vld [vmem:[%s7783_s10 + $0x54] ss:$8 sps:$4 sm:$0xff]  }
 0x68f   :  { %v5929_v41 = vld [vmem:[%s7783_s10 + $0x50] ss:$8 sps:$4 sm:$0xff]  }
 0x6aa   :  { %v475_v43 = vpop.permute.xlu1 %474 }
 0x6ab   :  { %478 = vst.msk [vmem:[#allocation2] sm:$0xff] %vm477_vm6, %v475_v43  ;;  %v5934_v43 = vld [vmem:[%s7783_s10 + $0x64] ss:$8 sps:$4 sm:$0xff]  }
 0x6b2   :  { %v620_v46 = vpop.permute.xlu1 %619 }
 0x6b3   :  { %623 = vst.msk [vmem:[#allocation2] sm:$0xff] %vm622_vm7, %v620_v46  ;;  %v5932_v46 = vld [vmem:[%s7783_s10 + $0x60] ss:$8 sps:$4 sm:$0xff]  }
 0x6ba   :  { %v743_v22 = vpop.permute.xlu0 %742 }
 0x6bb   :  { %746 = vst.msk [vmem:[#allocation2] sm:$0xff] %vm7787_vm8, %v743_v22  ;;  %v5937_v22 = vld [vmem:[%s7783_s10 + $0x74] ss:$8 sps:$4 sm:$0xff]  }
 0x6c2   :  { %v1241_v49 = vld [vmem:[#allocation2] sm:$0xff] }
 0x6ee   :  { %v987_v36 = vpop.permute.xlu1 %986 }
 0x6ef   :  { %989 = vst.msk [vmem:[#allocation2 + $0x8] sm:$0xff] %vm477_vm6, %v987_v36  ;;  %v5935_v36 = vld [vmem:[%s7783_s10 + $0x70] ss:$8 sps:$4 sm:$0xff]  }
 0x6f6   :  { %v1122_v31 = vpop.permute.xlu1 %1121 }
 0x6f7   :  { %1124 = vst.msk [vmem:[#allocation2 + $0x8] sm:$0xff] %vm622_vm7, %v1122_v31  ;;  %v5938_v31 = vld [vmem:[%s7784_s11] sm:$0xff]  }
 0x6f8   :  { %5573 = vmatpush3.bf16.msra.mxu1 %v5938_v31 }
 0x6f9   :  { %5574 = vmatprep.subr.bf16.mxu1 %v6288_v7 }
 0x6fe   :  { %v1238_v48 = vpop.permute.xlu1 %1237 }
 0x6ff   :  { %1240 = vst.msk [vmem:[#allocation2 + $0x8] sm:$0xff] %vm7787_vm8, %v1238_v48  ;;  %v5939_v48 = vld [vmem:[%s7784_s11 + $0x8] sm:$0xff]  }
 0x700   :  { %5575 = vmatpush3.bf16.msra.mxu1 %v5939_v48 }
 0x701   :  { %5576 = vmatprep.subr.bf16.mxu1 %v6288_v7 }
 0x706   :  { %v1242_v50 = vld [vmem:[#allocation2 + $0x8] sm:$0xff] }
 0x707   :  { %v1243_v45 = vpack.c.bf16 %v1242_v50, %v1241_v49  ;;  %v5940_v49 = vld [vmem:[%s7784_s11 + $0x10] sm:$0xff]   ;;  %v6298_v50 = vmov 1  }
 0x708   :  { %5577 = vmatpush3.bf16.msra.mxu1 %v5940_v49  ;;  %5880 = vset.pattern.permute.xlu1 %v6298_v50 }
 0x709   :  { %5557 = vmatmul.mubr.msk.bf16.vlgmr.msra.gmra.mrb[32].mxu0 %vm57_vm0, %v1243_v45  ;;  %5578 = vmatprep.subr.bf16.mxu1 %v6288_v7  ;;  %v5941_v45 = vld [vmem:[%s7784_s11 + $0x18] sm:$0xff]  }
 0x70a   :  { %5568 = vmatprep.mubr.msk.bf16.mxu0 %vm6289_vm1, %v6288_v7  ;;  %5561 = vmatpush3.bf16.msra.mxu0 %v5910_v2  ;;  %v5957_v2 = vld [vmem:[%s7784_s11 + $0x68] sm:$0xff]  }
 0x70b   :  { %5562 = vmatprep.subr.bf16.mxu0 %v6288_v7 }
 0x70c   :  { %5579 = vmatpush3.bf16.msra.mxu1 %v5941_v45 }
 0x70d   :  { %5580 = vmatprep.subr.bf16.mxu1 %v6288_v7 }
 0x70e   :  { %5563 = vmatpush3.bf16.msra.mxu0 %v5911_v3  ;;  %v5961_v3 = vld [vmem:[%s7784_s11 + $0x70] sm:$0xff]  }
 0x70f   :  { %5564 = vmatprep.subr.bf16.mxu0 %v6288_v7 }
 0x712   :  { %5565 = vmatpush3.bf16.msra.mxu0 %v5912_v0  ;;  %v5965_v0 = vld [vmem:[%s7784_s11 + $0x78] sm:$0xff]  }
 0x713   :  { %5566 = vmatprep.subr.bf16.mxu0 %v6288_v7 }
 0x716   :  { %5567 = vmatpush3.bf16.msra.mxu0 %v5913_v4  ;;  %v5968_v4 = vld [vmem:[%s7783_s10 + $0xc4] ss:$8 sps:$4 sm:$0xff]  }
 0x717   :  { %1583 = vmatprep.subr.bf16.mxu0 %v5916_v5  ;;  %v4853_v5 = vld [vmem:[%s7782_s9] ss:$0 sm:$0xff] }
 0x7dc   :  { %v1313_v52 = vpop.f32.mrb[32].mxu0 }
 0x7dd   :  { %v6723_v57 = vadd.f32 %v6261_v54, %v1313_v52  ;;  %v5558_v59 = vpop.f32.mrb[33].mxu0  ;;  %v5942_v52 = vld [vmem:[%s7784_s11 + $0x20] sm:$0xff]  }
 0x7de   :  { %v1316_v60 = vpop.f32.mrb[34].mxu0  ;;  %v5943_v54 = vld [vmem:[%s7784_s11 + $0x40] sm:$0xff]   ;;  %5581 = vmatpush3.bf16.msra.mxu1 %v5942_v52  ;;  %v5944_v59 = vld [vmem:[%s7784_s11 + $0x28] sm:$0xff]  }
 0x7df   :  { %v6728_v62 = vadd.f32 %v6262_v61, %v1316_v60  ;;  %v5559_v63 = vpop.f32.mrb[35].mxu0  ;;  %v1322_v1 = vmul.f32 %v6723_v57, %v6723_v57  ;;  %5582 = vmatprep.subr.bf16.mxu1 %v6288_v7  ;;  %v5945_v60 = vld [vmem:[%s7784_s11 + $0x48] sm:$0xff]   ;;  %v5946_v61 = vld [vmem:[%s7784_s11 + $0x30] sm:$0xff]  }
 0x7e0   :  { %v5947_v63 = vld [vmem:[%s7784_s11 + $0x50] sm:$0xff]  }
 0x7e1   :  { %v1324_v29 = vsel %vm57_vm0, %v1322_v1, 0.0  ;;  %v1323_v37 = vmul.f32 %v6728_v62, %v6728_v62  ;;  %v5948_v1 = vld [vmem:[%s7784_s11 + $0x38] sm:$0xff]  }
 0x7e2   :  { %1325 = vadd.xlane.f32.xlu0 %v1324_v29  ;;  %5583 = vmatpush3.bf16.msra.mxu1 %v5944_v59  ;;  %v5949_v29 = vld [vmem:[%s7784_s11 + $0x58] sm:$0xff]  }
 0x7e3   :  { %v1327_v39 = vsel %vm57_vm0, %v1323_v37, 0.0  ;;  %5584 = vmatprep.subr.bf16.mxu1 %v6288_v7  ;;  %v5952_v37 = vld [vmem:[%s7783_s10 + $0x84] ss:$8 sps:$4 sm:$0xff]  }
 0x7e4   :  { %1328 = vadd.xlane.f32.xlu1 %v1327_v39  ;;  %v5953_v39 = vld [vmem:[%s7784_s11 + $0x60] sm:$0xff]  }
 0x7e6   :  { %5585 = vmatpush3.bf16.msra.mxu1 %v5946_v61 }
 0x7e7   :  { %5586 = vmatprep.subr.bf16.mxu1 %v6288_v7 }
 0x7ea   :  { %5587 = vmatpush3.bf16.msra.mxu1 %v5948_v1 }
 0x7eb   :  { %2028 = vmatprep.subr.bf16.mxu1 %v5952_v37 }
 0x86f   :  { %v1326_v6 = vpop.xlane.xlu0 %1325 }
 0x870   :  { %v1330_v9 = vmul.f32 0.015625, %v1326_v6 }
 0x871   :  { %v1329_v11 = vpop.xlane.xlu1 %1328 }
 0x872   :  { %v1332_v12 = vadd.f32 1e-05, %v1330_v9  ;;  %v1331_v40 = vmul.f32 0.015625, %v1329_v11 }
 0x874   :  { %6125 = vrsqrt.f32 %v1332_v12  ;;  %v1333_v13 = vadd.f32 1e-05, %v1331_v40 }
 0x876   :  { %6127 = vrsqrt.f32 %v1333_v13 }
 0x87e   :  { %v6126_v14 = vpop.eup %6125 }
 0x87f   :  { %v1336_v16 = vmul.f32 %v6126_v14, %v6723_v57 }
 0x880   :  { %v6128_v17 = vpop.eup %6127 }
 0x881   :  { %v1337_v19 = vmul.f32 %v6128_v17, %v6728_v62  ;;  %v1345_v20 = vmul.f32 %v4852_v18, %v1336_v16 }
 0x883   :  { %v1346_v21 = vmul.f32 %v4852_v18, %v1337_v19 }
 0x885   :  { %v6762_v24 = vpack.c.bf16 %v1346_v21, %v1345_v20 }
 0x887   :  { %5569 = vmatmul.mubr.msk.bf16.vlgmr.msra.gmra.mrb[36].mxu0 %vm57_vm0, %v6762_v24 }
 0x888   :  { %1584 = vmatpush1.bf16.msra.mxu0 %v5914_v23  ;;  %1615 = vmatprep.mubr.bf16.mxu0 %v6290_v27 }
 0x889   :  { %1585 = vmatprep.subr.bf16.mxu0 %v5919_v25 }
 0x88c   :  { %1586 = vmatpush1.bf16.msra.mxu0 %v5917_v26 }
 0x88d   :  { %1587 = vmatprep.subr.bf16.mxu0 %v5922_v28 }
 0x890   :  { %1588 = vmatpush1.bf16.msra.mxu0 %v5920_v30 }
 0x891   :  { %1589 = vmatprep.subr.bf16.mxu0 %v5925_v32 }
 0x894   :  { %1590 = vmatpush1.bf16.msra.mxu0 %v5923_v33 }
 0x895   :  { %1799 = vmatprep.subr.bf16.mxu0 %v5928_v15 }
 0x897   :  { %4881 = vmatmul.mubr.msk.bf16.vlgmr.msra.gmra.mrb[40].mxu0 %vm57_vm0, %v6762_v24 }
 0x898   :  { %1800 = vmatpush1.bf16.msra.mxu0 %v5926_v34  ;;  %1831 = vmatprep.mubr.bf16.mxu0 %v6290_v27 }
 0x899   :  { %1801 = vmatprep.subr.bf16.mxu0 %v5931_v38 }
 0x89c   :  { %1802 = vmatpush1.bf16.msra.mxu0 %v5929_v41 }
 0x89d   :  { %1803 = vmatprep.subr.bf16.mxu0 %v5934_v43 }
 0x8a0   :  { %1804 = vmatpush1.bf16.msra.mxu0 %v5932_v46 }
 0x8a1   :  { %1805 = vmatprep.subr.bf16.mxu0 %v5937_v22  ;;  %v6299_v22 = vmov 2  }
 0x8a4   :  { %1806 = vmatpush1.bf16.msra.mxu0 %v5935_v36 }
 0x8a5   :  { %5592 = vmatprep.subr.bf16.mxu0 %v6288_v7 }
 0x8a7   :  { %4908 = vmatmul.mubr.msk.bf16.vlgmr.msra.gmra.mrb[44].mxu0 %vm57_vm0, %v6762_v24 }
 0x8a8   :  { %5608 = vmatprep.mubr.msk.bf16.mxu0 %vm6289_vm1, %v6288_v7  ;;  %5593 = vmatpush3.bf16.msra.mxu0 %v5943_v54 }
 0x8a9   :  { %5594 = vmatprep.subr.bf16.mxu0 %v6288_v7 }
 0x8ac   :  { %5595 = vmatpush3.bf16.msra.mxu0 %v5945_v60 }
 0x8ad   :  { %5596 = vmatprep.subr.bf16.mxu0 %v6288_v7 }
 0x8b0   :  { %5597 = vmatpush3.bf16.msra.mxu0 %v5947_v63 }
 0x8b1   :  { %5598 = vmatprep.subr.bf16.mxu0 %v6288_v7 }
 0x8b4   :  { %5599 = vmatpush3.bf16.msra.mxu0 %v5949_v29 }
 0x8b5   :  { %5600 = vmatprep.subr.bf16.mxu0 %v6288_v7 }
 0x8b8   :  { %5601 = vmatpush3.bf16.msra.mxu0 %v5953_v39  ;;  %v5950_v39 = vld [vmem:[%s7783_s10 + $0x80] ss:$8 sps:$4 sm:$0xff]  }
 0x8b9   :  { %5602 = vmatprep.subr.bf16.mxu0 %v6288_v7 }
 0x8bc   :  { %5603 = vmatpush3.bf16.msra.mxu0 %v5957_v2 }
 0x8bd   :  { %5604 = vmatprep.subr.bf16.mxu0 %v6288_v7 }
 0x8c0   :  { %5605 = vmatpush3.bf16.msra.mxu0 %v5961_v3  ;;  %v5956_v3 = vld [vmem:[%s7783_s10 + $0x94] ss:$8 sps:$4 sm:$0xff]  }
 0x8c1   :  { %5606 = vmatprep.subr.bf16.mxu0 %v6288_v7 }
 0x8c4   :  { %5607 = vmatpush3.bf16.msra.mxu0 %v5965_v0  ;;  %v5954_v0 = vld [vmem:[%s7783_s10 + $0x90] ss:$8 sps:$4 sm:$0xff]  }
 0x8c5   :  { %2255 = vmatprep.subr.bf16.mxu0 %v5968_v4  ;;  %v5960_v4 = vld [vmem:[%s7783_s10 + $0xa4] ss:$8 sps:$4 sm:$0xff]  }
 0x95a   :  { %v1424_v6 = vpop.f32.mrb[36].mxu0 }
 0x95b   :  { %v1425_v9 = vadd.f32 %v4853_v5, %v1424_v6  ;;  %v5570_v11 = vpop.f32.mrb[37].mxu0  ;;  %v5964_v6 = vld [vmem:[%s7783_s10 + $0xb4] ss:$8 sps:$4 sm:$0xff]  }
 0x95c   :  { %v1427_v12 = vpop.f32.mrb[38].mxu0 }
 0x95d   :  { %v4859_v40 = vmul.f32 -1.442695, %v1425_v9  ;;  %v1428_v13 = vadd.f32 %v4853_v5, %v1427_v12  ;;  %v5571_v14 = vpop.f32.mrb[39].mxu0  ;;  %v5958_v5 = vld [vmem:[%s7783_s10 + $0xa0] ss:$8 sps:$4 sm:$0xff]  }
 0x95f   :  { %6129 = vpow2.f32 %v4859_v40  ;;  %v4860_v16 = vmul.f32 -1.442695, %v1428_v13  ;;  %v5962_v40 = vld [vmem:[%s7783_s10 + $0xb0] ss:$8 sps:$4 sm:$0xff]  }
 0x961   :  { %6131 = vpow2.f32 %v4860_v16 }
 0x969   :  { %v6130_v17 = vpop.eup %6129 }
 0x96a   :  { %v1437_v18 = vadd.f32 1.0, %v6130_v17  ;;  %v1617_v19 = vpop.f32.mrb[40].mxu0  ;;  %v5966_v17 = vld [vmem:[%s7783_s10 + $0xc0] ss:$8 sps:$4 sm:$0xff]  }
 0x96b   :  { %v4882_v20 = vmul.f32 -1.442695, %v1617_v19  ;;  %v1619_v21 = vpop.f32.mrb[41].mxu0  ;;  %v6132_v28 = vpop.eup %6131 }
 0x96c   :  { %6133 = vrcp.f32 %v1437_v18  ;;  %v1621_v23 = vpop.f32.mrb[42].mxu0  ;;  %v1438_v30 = vadd.f32 1.0, %v6132_v28  ;;  %v5978_v28 = vld [vmem:[%s7784_s11 + $0x80] sm:$0xff]  }
 0x96d   :  { %6135 = vpow2.f32 %v4882_v20  ;;  %v4883_v25 = vmul.f32 -1.442695, %v1621_v23  ;;  %v1623_v26 = vpop.f32.mrb[43].mxu0  ;;  %v5969_v20 = vld [vmem:[%s7783_s10 + $0xd0] ss:$8 sps:$4 sm:$0xff]  }
 0x96f   :  { %6137 = vpow2.f32 %v4883_v25  ;;  %v5977_v25 = vld [vmem:[%s7783_s10 + $0xf4] ss:$8 sps:$4 sm:$0xff]  }
 0x970   :  { %6139 = vrcp.f32 %v1438_v30 }
 0x976   :  { %v6889_v32 = vpop.eup %6133 }
 0x977   :  { %v6136_v33 = vpop.eup %6135  ;;  %1471 = vperm.xlu1 %5880, %v6889_v32   ;;  %1445 = vperm.xlu0 %5879, %v6889_v32  }
 0x978   :  { %v1632_v15 = vadd.f32 1.0, %v6136_v33 }
 0x979   :  { %v6138_v34 = vpop.eup %6137 }
 0x97a   :  { %6141 = vrcp.f32 %v1632_v15  ;;  %v1633_v38 = vadd.f32 1.0, %v6138_v34  ;;  %v1833_v41 = vpop.f32.mrb[44].mxu0  ;;  %v6895_v49 = vpop.eup %6139 }
 0x97b   :  { %v4909_v43 = vmul.f32 -1.442695, %v1833_v41  ;;  %v1835_v46 = vpop.f32.mrb[45].mxu0  ;;  %5881 = vset.pattern.permute.xlu1 %v6299_v22 }
 0x97c   :  { %6143 = vrcp.f32 %v1633_v38  ;;  %v1837_v36 = vpop.f32.mrb[46].mxu0  ;;  %1496 = vperm.xlu1 %5881, %v6889_v32  }
 0x97d   :  { %6145 = vpow2.f32 %v4909_v43  ;;  %v4910_v31 = vmul.f32 -1.442695, %v1837_v36  ;;  %v1839_v48 = vpop.f32.mrb[47].mxu0 }
 0x97f   :  { %6147 = vpow2.f32 %v4910_v31 }
 0x980   :  { %5882 = vset.pattern.permute.xlu1 %v6290_v27 }
 0x981   :  { %1450 = vperm.xlu1 %5882, %v6895_v49  }
 0x984   :  { %v6142_v45 = vpop.eup %6141 }
 0x985   :  { %v1638_v52 = vmul.f32 %v6142_v45, %v1617_v19  ;;  %5883 = vset.pattern.permute.xlu1 %v6298_v50  ;;  %v5971_v19 = vld [vmem:[%s7783_s10 + $0xd4] ss:$8 sps:$4 sm:$0xff]  }
 0x986   :  { %v6144_v54 = vpop.eup %6143  ;;  %1475 = vperm.xlu1 %5883, %v6895_v49  }
 0x987   :  { %v6146_v59 = vpop.eup %6145  ;;  %v1640_v60 = vmul.f32 %v1638_v52, %v1619_v21  ;;  %v1639_v61 = vmul.f32 %v6144_v54, %v1621_v23  ;;  %v5974_v21 = vld [vmem:[%s7783_s10 + $0xe4] ss:$8 sps:$4 sm:$0xff]   ;;  %v5972_v23 = vld [vmem:[%s7783_s10 + $0xe0] ss:$8 sps:$4 sm:$0xff]   ;;  %v5980_v52 = vld [vmem:[%s7784_s11 + $0x90] sm:$0xff]  }
 0x988   :  { %v1848_v63 = vadd.f32 1.0, %v6146_v59 }
 0x989   :  { %v6148_v1 = vpop.eup %6147  ;;  %v1641_v29 = vmul.f32 %v1639_v61, %v1623_v26  ;;  %v5975_v26 = vld [vmem:[%s7783_s10 + $0xf0] ss:$8 sps:$4 sm:$0xff]  }
 0x98a   :  { %6149 = vrcp.f32 %v1848_v63  ;;  %v1849_v37 = vadd.f32 1.0, %v6148_v1  ;;  %5884 = vset.pattern.permute.xlu1 %v6299_v22  ;;  %v5981_v61 = vld [vmem:[%s7784_s11 + $0x98] sm:$0xff]  }
 0x98b   :  { %v1642_v2 = vpack.c.bf16 %v1641_v29, %v1640_v60  ;;  %1500 = vperm.xlu1 %5884, %v6895_v49  }
 0x98c   :  { %6151 = vrcp.f32 %v1849_v37  ;;  %v5982_v37 = vld [vmem:[%s7784_s11 + $0xa0] sm:$0xff]  }
 0x98d   :  { %5589 = vmatmul.mubr.bf16.vlgmr.msra.gmra.mrb[40].mxu1 %v1642_v2 }
 0x98e   :  { %2029 = vmatpush1.bf16.msra.mxu1 %v5950_v39  ;;  %2060 = vmatprep.mubr.bf16.mxu1 %v6290_v27 }
 0x98f   :  { %2030 = vmatprep.subr.bf16.mxu1 %v5956_v3  ;;  %5885 = vset.pattern.permute.xlu1 %v6298_v50 }
 0x992   :  { %2031 = vmatpush1.bf16.msra.mxu1 %v5954_v0 }
 0x993   :  { %2032 = vmatprep.subr.bf16.mxu1 %v5960_v4 }
 0x994   :  { %v6150_v9 = vpop.eup %6149 }
 0x995   :  { %v1854_v11 = vmul.f32 %v6150_v9, %v1833_v41  ;;  %v5979_v41 = vld [vmem:[%s7784_s11 + $0x88] sm:$0xff]  }
 0x996   :  { %v6152_v12 = vpop.eup %6151  ;;  %2033 = vmatpush1.bf16.msra.mxu1 %v5958_v5  ;;  %v5984_v5 = vld [vmem:[%s7784_s11 + $0xa8] sm:$0xff]  }
 0x997   :  { %v1856_v13 = vmul.f32 %v1854_v11, %v1835_v46  ;;  %v1855_v14 = vmul.f32 %v6152_v12, %v1837_v36  ;;  %2034 = vmatprep.subr.bf16.mxu1 %v5964_v6  ;;  %v5985_v6 = vld [vmem:[%s7784_s11 + $0xc8] sm:$0xff]  }
 0x999   :  { %v1857_v16 = vmul.f32 %v1855_v14, %v1839_v48 }
 0x99a   :  { %2035 = vmatpush1.bf16.msra.mxu1 %v5962_v40 }
 0x99b   :  { %v1858_v18 = vpack.c.bf16 %v1857_v16, %v1856_v13  ;;  %5612 = vmatprep.subr.bf16.mxu1 %v6288_v7  ;;  %v5986_v16 = vld [vmem:[%s7784_s11 + $0xb0] sm:$0xff]  }
 0x99d   :  { %4951 = vmatmul.mubr.msk.bf16.vlgmr.msra.gmra.mrb[44].mxu1 %vm57_vm0, %v6762_v24  ;;  %5609 = vmatmul.mubr.bf16.vlgmr.msra.gmra.mrb[48].mxu0 %v1858_v18 }
 0x99e   :  { %2256 = vmatpush1.bf16.msra.mxu0 %v5966_v17  ;;  %2287 = vmatprep.mubr.bf16.mxu0 %v6290_v27  ;;  %v5987_v17 = vld [vmem:[%s7784_s11 + $0xd0] sm:$0xff]  }
 0x99f   :  { %2257 = vmatprep.subr.bf16.mxu0 %v5971_v19  ;;  %5628 = vmatprep.mubr.msk.bf16.mxu1 %vm6289_vm1, %v6288_v7 }
 0x9a0   :  { %5613 = vmatpush3.bf16.msra.mxu1 %v5978_v28  ;;  %v5993_v28 = vld [vmem:[%s7784_s11 + $0xf8] sm:$0xff]  }
 0x9a1   :  { %5614 = vmatprep.subr.bf16.mxu1 %v6288_v7 }
 0x9a2   :  { %2258 = vmatpush1.bf16.msra.mxu0 %v5969_v20  ;;  %v5988_v20 = vld [vmem:[%s7784_s11 + $0xb8] sm:$0xff]  }
 0x9a3   :  { %2259 = vmatprep.subr.bf16.mxu0 %v5974_v21  ;;  %v5989_v21 = vld [vmem:[%s7784_s11 + $0xd8] sm:$0xff]  }
 0x9a4   :  { %5615 = vmatpush3.bf16.msra.mxu1 %v5979_v41 }
 0x9a5   :  { %5616 = vmatprep.subr.bf16.mxu1 %v6288_v7 }
 0x9a6   :  { %2260 = vmatpush1.bf16.msra.mxu0 %v5972_v23 }
 0x9a7   :  { %2261 = vmatprep.subr.bf16.mxu0 %v5977_v25  ;;  %v5991_v25 = vld [vmem:[%s7784_s11 + $0xe8] sm:$0xff]  }
 0x9a8   :  { %5617 = vmatpush3.bf16.msra.mxu1 %v5980_v52 }
 0x9a9   :  { %5618 = vmatprep.subr.bf16.mxu1 %v6288_v7 }
 0x9aa   :  { %2262 = vmatpush1.bf16.msra.mxu0 %v5975_v26  ;;  %v5992_v26 = vld [vmem:[%s7784_s11 + $0xf0] sm:$0xff]  }
 0x9ab   :  { %5632 = vmatprep.subr.bf16.mxu0 %v6288_v7 }
 0x9ac   :  { %5619 = vmatpush3.bf16.msra.mxu1 %v5981_v61 }
 0x9ad   :  { %4994 = vmatmul.mubr.msk.bf16.vlgmr.msra.gmra.mrb[52].mxu0 %vm57_vm0, %v6762_v24  ;;  %5620 = vmatprep.subr.bf16.mxu1 %v6288_v7 }
 0x9ae   :  { %5648 = vmatprep.mubr.msk.bf16.mxu0 %vm6289_vm1, %v6288_v7 }
 0x9b0   :  { %5621 = vmatpush3.bf16.msra.mxu1 %v5982_v37 }
 0x9b1   :  { %5622 = vmatprep.subr.bf16.mxu1 %v6288_v7 }
 0x9b4   :  { %5623 = vmatpush3.bf16.msra.mxu1 %v5984_v5 }
 0x9b5   :  { %5624 = vmatprep.subr.bf16.mxu1 %v6288_v7 }
 0x9b8   :  { %5625 = vmatpush3.bf16.msra.mxu1 %v5986_v16 }
 0x9b9   :  { %5626 = vmatprep.subr.bf16.mxu1 %v6288_v7 }
 0x9bc   :  { %5627 = vmatpush3.bf16.msra.mxu1 %v5988_v20 }
 0x9bd   :  { %5652 = vmatprep.subr.bf16.mxu1 %v6288_v7 }
 0x9f6   :  { %v1472_v30 = vpop.permute.xlu1 %1471  ;;  %v1446_v33 = vpop.permute.xlu0 %1445 }
 0x9f7   :  { %vm1478_vm11 = vcmp.gt.f32.partialorder %v1472_v30, %v6889_v32  ;;  %vm1484_vm12 = vcmp.ge.f32.partialorder %v1472_v30, %v6889_v32  ;;  %vm1453_vm13 = vcmp.gt.f32.partialorder %v1446_v33, %v6889_v32  ;;  %vm1459_vm14 = vcmp.ge.f32.partialorder %v1446_v33, %v6889_v32 }
 0x9f8   :  { %v4865_v24 = vsel %vm1478_vm11, 1.0, %v6288_v7  ;;  %v4867_v15 = vsel %vm1484_vm12, 1.0, %v6288_v7  ;;  %v4861_v34 = vsel %vm1453_vm13, 1.0, %v6288_v7  ;;  %v4863_v38 = vsel %vm1459_vm14, 1.0, %v6288_v7 }
 0x9f9   :  { %v1491_v43 = vsel %vm1490_vm9, %v4867_v15, %v4865_v24  ;;  %v1466_v46 = vsel %vm1465_vm10, %v4863_v38, %v4861_v34  ;;  %vm1524_vm13 = vcmask 23552  }
 0x9fa   :  { %v1493_v45 = vadd.f32 %v1491_v43, %v1466_v46 }
 0x9fb   :  { %v1497_v36 = vpop.permute.xlu1 %1496 }
 0x9fc   :  { %vm1503_vm11 = vcmp.gt.f32.partialorder %v1497_v36, %v6889_v32  ;;  %vm1509_vm12 = vcmp.ge.f32.partialorder %v1497_v36, %v6889_v32 }
 0x9fd   :  { %v4869_v31 = vsel %vm1503_vm11, 1.0, %v6288_v7  ;;  %v4871_v48 = vsel %vm1509_vm12, 1.0, %v6288_v7 }
 0x9fe   :  { %v1516_v54 = vsel %vm1515_vm15, %v4871_v48, %v4869_v31 }
 0x9ff   :  { %v1518_v59 = vadd.f32 %v1516_v54, %v1493_v45 }
 0xa00   :  { %v1451_v60 = vpop.permute.xlu1 %1450 }
 0xa01   :  { %vm1520_vm14 = vcmp.lt.f32.partialorder %v1518_v59, 2.0  ;;  %vm1454_vm11 = vcmp.gt.f32.partialorder %v1451_v60, %v6895_v49  ;;  %vm1460_vm12 = vcmp.ge.f32.partialorder %v1451_v60, %v6895_v49 }
 0xa02   :  { %v6995_v63 = vsel %vm1520_vm14, %v6889_v32, 0.0  ;;  %v5983_v32 = vld [vmem:[%s7784_s11 + $0xc0] sm:$0xff]   ;;  %v4862_v3 = vsel %vm1454_vm11, 1.0, %v6288_v7  ;;  %v4864_v0 = vsel %vm1460_vm12, 1.0, %v6288_v7 }
 0xa03   :  { %v1525_v1 = vsel %vm1524_vm13, %v6995_v63, 0.0  ;;  %5633 = vmatpush3.bf16.msra.mxu0 %v5983_v32  ;;  %v1467_v11 = vsel %vm1465_vm10, %v4864_v0, %v4862_v3 }
 0xa04   :  { %1526 = vadd.xlane.f32.xlu1 %v1525_v1  ;;  %5634 = vmatprep.subr.bf16.mxu0 %v6288_v7 }
 0xa05   :  { %v1476_v29 = vpop.permute.xlu1 %1475 }
 0xa06   :  { %vm1479_vm14 = vcmp.gt.f32.partialorder %v1476_v29, %v6895_v49  ;;  %vm1485_vm8 = vcmp.ge.f32.partialorder %v1476_v29, %v6895_v49 }
 0xa07   :  { %v4866_v39 = vsel %vm1479_vm14, 1.0, %v6288_v7  ;;  %v4868_v2 = vsel %vm1485_vm8, 1.0, %v6288_v7  ;;  %5635 = vmatpush3.bf16.msra.mxu0 %v5985_v6 }
 0xa08   :  { %v1492_v4 = vsel %vm1490_vm9, %v4868_v2, %v4866_v39  ;;  %5636 = vmatprep.subr.bf16.mxu0 %v6288_v7 }
 0xa09   :  { %v1494_v13 = vadd.f32 %v1492_v4, %v1467_v11 }
 0xa0a   :  { %v1501_v9 = vpop.permute.xlu1 %1500 }
 0xa0b   :  { %vm1504_vm8 = vcmp.gt.f32.partialorder %v1501_v9, %v6895_v49  ;;  %vm1510_vm11 = vcmp.ge.f32.partialorder %v1501_v9, %v6895_v49  ;;  %5637 = vmatpush3.bf16.msra.mxu0 %v5987_v17 }
 0xa0c   :  { %v4870_v12 = vsel %vm1504_vm8, 1.0, %v6288_v7  ;;  %v4872_v40 = vsel %vm1510_vm11, 1.0, %v6288_v7  ;;  %5638 = vmatprep.subr.bf16.mxu0 %v6288_v7 }
 0xa0d   :  { %v1517_v14 = vsel %vm1515_vm15, %v4872_v40, %v4870_v12 }
 0xa0e   :  { %v1519_v18 = vadd.f32 %v1517_v14, %v1494_v13 }
 0xa0f   :  { %5639 = vmatpush3.bf16.msra.mxu0 %v5989_v21 }
 0xa10   :  { %vm1521_vm12 = vcmp.lt.f32.partialorder %v1519_v18, 2.0  ;;  %5640 = vmatprep.subr.bf16.mxu0 %v6288_v7 }
 0xa11   :  { %v7043_v19 = vsel %vm1521_vm12, %v6895_v49, 0.0  ;;  %v5990_v49 = vld [vmem:[%s7784_s11 + $0xe0] sm:$0xff]  }
 0xa12   :  { %v1528_v23 = vsel %vm1524_vm13, %v7043_v19, 0.0 }
 0xa13   :  { %1529 = vadd.xlane.f32.xlu0 %v1528_v23  ;;  %5641 = vmatpush3.bf16.msra.mxu0 %v5990_v49 }
 0xa14   :  { %5642 = vmatprep.subr.bf16.mxu0 %v6288_v7 }
 0xa17   :  { %5643 = vmatpush3.bf16.msra.mxu0 %v5991_v25 }
 0xa18   :  { %5644 = vmatprep.subr.bf16.mxu0 %v6288_v7 }
 0xa1b   :  { %5645 = vmatpush3.bf16.msra.mxu0 %v5992_v26 }
 0xa1c   :  { %5646 = vmatprep.subr.bf16.mxu0 %v6288_v7 }
 0xa1f   :  { %5647 = vmatpush3.bf16.msra.mxu0 %v5993_v28 }
 0xa20   :  { %5670 = vmatprep.subr.bf16.mxu0 %v6288_v7 }
 0xa60   :  { %v7071_v30 = vpop.f32.mrb[40].mxu1 }
 0xa61   :  { %v5590_v33 = vpop.f32.mrb[41].mxu1 }
 0xa62   :  { %v7073_v24 = vpop.f32.mrb[42].mxu1 }
 0xa63   :  { %v5591_v15 = vpop.f32.mrb[43].mxu1 }
 0xa70   :  { %v2062_v34 = vpop.f32.mrb[44].mxu1  ;;  %v7075_v38 = vpop.f32.mrb[48].mxu0 }
 0xa71   :  { %v4952_v41 = vmul.f32 -1.442695, %v2062_v34  ;;  %v2064_v43 = vpop.f32.mrb[45].mxu1  ;;  %v5610_v46 = vpop.f32.mrb[49].mxu0 }
 0xa72   :  { %v2066_v36 = vpop.f32.mrb[46].mxu1  ;;  %v7077_v31 = vpop.f32.mrb[50].mxu0 }
 0xa73   :  { %6153 = vpow2.f32 %v4952_v41  ;;  %v4953_v48 = vmul.f32 -1.442695, %v2066_v36  ;;  %v2068_v45 = vpop.f32.mrb[47].mxu1  ;;  %v5611_v52 = vpop.f32.mrb[51].mxu0  ;;  %v1748_v41 = vadd.f32 %v7071_v30, %v6723_v57 }
 0xa75   :  { %6155 = vpow2.f32 %v4953_v48 }
 0xa7d   :  { %v6154_v54 = vpop.eup %6153 }
 0xa7e   :  { %v2077_v59 = vadd.f32 1.0, %v6154_v54 }
 0xa7f   :  { %v6156_v60 = vpop.eup %6155 }
 0xa80   :  { %6157 = vrcp.f32 %v2077_v59  ;;  %v2078_v61 = vadd.f32 1.0, %v6156_v60  ;;  %v2289_v1 = vpop.f32.mrb[52].mxu0 }
 0xa81   :  { %v4995_v29 = vmul.f32 -1.442695, %v2289_v1  ;;  %v2291_v37 = vpop.f32.mrb[53].mxu0 }
 0xa82   :  { %6159 = vrcp.f32 %v2078_v61  ;;  %v2293_v32 = vpop.f32.mrb[54].mxu0 }
 0xa83   :  { %6161 = vpow2.f32 %v4995_v29  ;;  %v4996_v39 = vmul.f32 -1.442695, %v2293_v32  ;;  %v2295_v2 = vpop.f32.mrb[55].mxu0 }
 0xa85   :  { %6163 = vpow2.f32 %v4996_v39 }
 0xa8a   :  { %v6158_v3 = vpop.eup %6157 }
 0xa8b   :  { %v2083_v0 = vmul.f32 %v6158_v3, %v2062_v34 }
 0xa8c   :  { %v6160_v4 = vpop.eup %6159 }
 0xa8d   :  { %v6162_v5 = vpop.eup %6161  ;;  %v2085_v6 = vmul.f32 %v2083_v0, %v2064_v43  ;;  %v2084_v9 = vmul.f32 %v6160_v4, %v2066_v36 }
 0xa8e   :  { %v2304_v11 = vadd.f32 1.0, %v6162_v5 }
 0xa8f   :  { %v6164_v12 = vpop.eup %6163  ;;  %v2086_v40 = vmul.f32 %v2084_v9, %v2068_v45 }
 0xa90   :  { %6165 = vrcp.f32 %v2304_v11  ;;  %v2305_v13 = vadd.f32 1.0, %v6164_v12  ;;  %v5994_v12 = vld [vmem:[%s7777_s4 + $0x20] sm:$0xff]  }
 0xa91   :  { %v2087_v14 = vpack.c.bf16 %v2086_v40, %v2085_v6  ;;  %v1527_v16 = vpop.xlane.xlu1 %1526  ;;  %v5995_v40 = vld [vmem:[%s7777_s4 + $0x28] sm:$0xff]  }
 0xa92   :  { %6167 = vrcp.f32 %v2305_v13  ;;  %v5996_v13 = vld [vmem:[%s7777_s4 + $0x30] sm:$0xff]  }
 0xa93   :  { %6169 = vrcp.f32 %v1527_v16  ;;  %5629 = vmatmul.mubr.bf16.vlgmr.msra.gmra.mrb[48].mxu1 %v2087_v14  ;;  %v5997_v14 = vld [vmem:[%s7777_s4 + $0x38] sm:$0xff]  }
 0xa94   :  { %5660 = vmatprep.mubr.msk.bf16.mxu1 %vm6289_vm1, %v6288_v7  ;;  %5653 = vmatpush3.bf16.msra.mxu1 %v5994_v12  ;;  %v6000_v16 = vld [vmem:[%s7778_s5 + $0x14] ss:$8 sps:$4 sm:$0xff]  }
 0xa95   :  { %5654 = vmatprep.subr.bf16.mxu1 %v6288_v7 }
 0xa98   :  { %5655 = vmatpush3.bf16.msra.mxu1 %v5995_v40 }
 0xa99   :  { %5656 = vmatprep.subr.bf16.mxu1 %v6288_v7 }
 0xa9a   :  { %v6166_v17 = vpop.eup %6165 }
 0xa9b   :  { %v2310_v18 = vmul.f32 %v6166_v17, %v2289_v1 }
 0xa9c   :  { %v6168_v20 = vpop.eup %6167  ;;  %5657 = vmatpush3.bf16.msra.mxu1 %v5996_v13 }
 0xa9d   :  { %v6170_v21 = vpop.eup %6169  ;;  %v2312_v23 = vmul.f32 %v2310_v18, %v2291_v37  ;;  %v2311_v49 = vmul.f32 %v6168_v20, %v2293_v32  ;;  %5658 = vmatprep.subr.bf16.mxu1 %v6288_v7 }
 0xa9e   :  { %v1532_v25 = vmul.f32 %v6170_v21, %v6995_v63 }
 0xa9f   :  { %v2313_v26 = vmul.f32 %v2311_v49, %v2295_v2 }
 0xaa0   :  { %2195 = vperm.xlu1 %5885, %v1532_v25   ;;  %1967 = vperm.xlu0 %5879, %v1532_v25   ;;  %v1530_v28 = vpop.xlane.xlu0 %1529 }
 0xaa1   :  { %v2314_v33 = vpack.c.bf16 %v2313_v26, %v2312_v23  ;;  %6171 = vrcp.f32 %v1530_v28  ;;  %5659 = vmatpush3.bf16.msra.mxu1 %v5997_v14 }
 0xaa2   :  { %2554 = vmatprep.subr.bf16.mxu1 %v6000_v16 }
 0xaa3   :  { %5649 = vmatmul.mubr.bf16.vlgmr.msra.gmra.mrb[56].mxu0 %v2314_v33  ;;  %v5022_v33 = vld [vmem:[%s7776_s3 + $0x1] ss:$0 sm:$0xff] }
 0xaa4   :  { %5886 = vset.pattern.permute.xlu1 %v6290_v27  ;;  %5887 = vset.pattern.permute.xlu0 %v6298_v50 }
 0xaa5   :  { %5672 = vmatprep.mubr.msk.bf16.mxu0 %vm6289_vm1, %v6288_v7 }
 0xaab   :  { %v6172_v15 = vpop.eup %6171 }
 0xaac   :  { %v1534_v34 = vmul.f32 %v6172_v15, %v7043_v19  ;;  %v1749_v19 = vadd.f32 %v7073_v24, %v6728_v62 }
 0xaae   :  { %1972 = vperm.xlu1 %5886, %v1534_v34   ;;  %2199 = vperm.xlu0 %5887, %v1534_v34  }
 0xab2   :  { %5888 = vset.pattern.permute.xlu1 %v6299_v22  ;;  %5889 = vset.pattern.permute.xlu0 %v6290_v27 }
 0xab3   :  { %2422 = vperm.xlu1 %5888, %v1532_v25  }
 0xab7   :  { %2426 = vperm.xlu1 %5888, %v1534_v34  }
 0xabb   :  { %5890 = vset.pattern.permute.xlu1 %v6298_v50 }
 0xb1f   :  { %v1968_v63 = vpop.permute.xlu0 %1967  ;;  %v2196_v36 = vpop.permute.xlu1 %2195 }
 0xb20   :  { %v1975_v43 = vmul.f32 %v1968_v63, %v7075_v38 }
 0xb22   :  { %v1977_v46 = vadd.f32 %v1975_v43, %v1748_v41  ;;  %v5998_v41 = vld [vmem:[%s7778_s5 + $0x10] ss:$8 sps:$4 sm:$0xff]  }
 0xb2d   :  { %v1973_v48 = vpop.permute.xlu1 %1972  ;;  %v2200_v61 = vpop.permute.xlu0 %2199 }
 0xb2e   :  { %v1976_v45 = vmul.f32 %v1973_v48, %v7077_v31 }
 0xb30   :  { %v1978_v52 = vadd.f32 %v1976_v45, %v1749_v19 }
 0xb32   :  { %v2423_v30 = vpop.permute.xlu1 %2422 }
 0xb36   :  { %v2427_v3 = vpop.permute.xlu1 %2426 }
 0xb66   :  { %v2187_v54 = vpop.f32.mrb[48].mxu1 }
 0xb67   :  { %v2202_v59 = vmul.f32 %v2196_v36, %v2187_v54  ;;  %v5630_v60 = vpop.f32.mrb[49].mxu1 }
 0xb68   :  { %v2190_v1 = vpop.f32.mrb[50].mxu1 }
 0xb69   :  { %v2204_v29 = vadd.f32 %v2202_v59, %v1977_v46  ;;  %v2203_v37 = vmul.f32 %v2200_v61, %v2190_v1  ;;  %v5631_v32 = vpop.f32.mrb[51].mxu1 }
 0xb6b   :  { %v2205_v57 = vadd.f32 %v2203_v37, %v1978_v52 }
 0xb76   :  { %v2414_v38 = vpop.f32.mrb[56].mxu0 }
 0xb77   :  { %v2429_v39 = vmul.f32 %v2423_v30, %v2414_v38  ;;  %v5650_v2 = vpop.f32.mrb[57].mxu0 }
 0xb78   :  { %v2417_v0 = vpop.f32.mrb[58].mxu0 }
 0xb79   :  { %v7096_v4 = vadd.f32 %v2429_v39, %v2204_v29  ;;  %v2430_v62 = vmul.f32 %v2427_v3, %v2417_v0  ;;  %v5651_v24 = vpop.f32.mrb[59].mxu0 }
 0xb7b   :  { %v7098_v31 = vadd.f32 %v2430_v62, %v2205_v57  ;;  %v2433_v5 = vmul.f32 %v7096_v4, %v7096_v4 }
 0xb7d   :  { %v2435_v6 = vsel %vm57_vm0, %v2433_v5, 0.0  ;;  %v2434_v9 = vmul.f32 %v7098_v31, %v7098_v31 }
 0xb7e   :  { %2436 = vadd.xlane.f32.xlu0 %v2435_v6 }
 0xb7f   :  { %v2438_v11 = vsel %vm57_vm0, %v2434_v9, 0.0 }
 0xb80   :  { %2439 = vadd.xlane.f32.xlu1 %v2438_v11 }
 0xc0b   :  { %v2437_v17 = vpop.xlane.xlu0 %2436 }
 0xc0c   :  { %v2441_v18 = vmul.f32 0.015625, %v2437_v17 }
 0xc0d   :  { %v2440_v20 = vpop.xlane.xlu1 %2439 }
 0xc0e   :  { %v2443_v21 = vadd.f32 1e-05, %v2441_v18  ;;  %v2442_v23 = vmul.f32 0.015625, %v2440_v20 }
 0xc10   :  { %6173 = vrsqrt.f32 %v2443_v21  ;;  %v2444_v49 = vadd.f32 1e-05, %v2442_v23 }
 0xc12   :  { %6175 = vrsqrt.f32 %v2444_v49 }
 0xc1a   :  { %v6174_v25 = vpop.eup %6173 }
 0xc1b   :  { %v2447_v26 = vmul.f32 %v6174_v25, %v7096_v4 }
 0xc1c   :  { %v6176_v28 = vpop.eup %6175 }
 0xc1d   :  { %v2448_v15 = vmul.f32 %v6176_v28, %v7098_v31  ;;  %v2457_v34 = vmul.f32 %v5022_v33, %v2447_v26  ;;  %v6263_v26 = vld [vmem:[%s7774_s1] sm:$0xff] }
 0xc1f   :  { %v2458_v63 = vmul.f32 %v5022_v33, %v2448_v15 }
 0xc21   :  { %v2459_v43 = vpack.c.bf16 %v2458_v63, %v2457_v34 }
 0xc23   :  { %5661 = vmatmul.mubr.msk.bf16.vlgmr.msra.gmra.mrb[52].mxu1 %vm57_vm0, %v2459_v43 }
 0xc24   :  { %2555 = vmatpush1.bf16.msra.mxu1 %v5998_v41  ;;  %2586 = vmatprep.mubr.bf16.mxu1 %v6290_v27 }
 0xc25   :  { %5664 = vmatprep.subr.bf16.mxu1 %v6288_v7 }
 0xcf6   :  { %v2530_v46 = vpop.f32.mrb[52].mxu1 }
 0xcf7   :  { %v5662_v36 = vpop.f32.mrb[53].mxu1 }
 0xcf8   :  { %v2533_v48 = vpop.f32.mrb[54].mxu1 }
 0xcf9   :  { %v2537_v19 = vpack.c.bf16 %v2533_v48, %v2530_v46  ;;  %v5663_v45 = vpop.f32.mrb[55].mxu1 }
 0xcfb   :  { %5040 = vmatmul.mubr.msk.bf16.vlgmr.msra.gmra.mrb[56].mxu1 %vm172_vm2, %v2537_v19 }
 0xcfc   :  { %5666 = vmatprep.mubr.msk.bf16.mxu1 %vm6289_vm1, %v6288_v7 }
 0xdce   :  { %v7138_v52 = vpop.f32.mrb[56].mxu1 }
 0xdcf   :  { %v7140_v54 = vpop.f32.mrb[57].mxu1  ;;  %v2725_v59 = vmul.f32 %v7138_v52, %v6438_v35  ;;  %v2849_v29 = vmul.f32 %v7138_v52, %v6458_v44  ;;  %v2976_v37 = vmul.f32 %v7138_v52, %v6466_v47  ;;  %v2975_v11 = vmul.f32 %v7138_v52, %v6494_v58 }
 0xdd0   :  { %v7144_v60 = vpop.f32.mrb[58].mxu1  ;;  %v2841_v61 = vmul.f32 %v7140_v54, %v6453_v42  ;;  %v2598_v38 = vmul.f32 %v7140_v54, %v6477_v51  ;;  %v2840_v2 = vmul.f32 %v7140_v54, %v6490_v56  ;;  %v2606_v19 = vmul.f32 %v6263_v26, %v7138_v52 }
 0xdd1   :  { %2727 = vrot.lane.b32.xlu0 %v2725_v59, %s6296_s2  ;;  %v7149_v1 = vpop.f32.mrb[59].mxu1  ;;  %v3219_v32 = vmul.f32 %v7144_v60, %v6438_v35  ;;  %v3343_v30 = vmul.f32 %v7144_v60, %v6458_v44  ;;  %v3470_v35 = vmul.f32 %v7144_v60, %v6466_v47  ;;  %v2724_v44 = vmul.f32 %v7138_v52, %v6490_v56 }
 0xdd2   :  { %2843 = vrot.lane.b32.xlu1 %v2841_v61, %s6292_s29  ;;  %v3335_v57 = vmul.f32 %v7149_v1, %v6453_v42  ;;  %v2607_v42 = vmul.f32 %v7138_v52, %v6483_v53  ;;  %v2848_v47 = vmul.f32 %v7138_v52, %v6488_v55  ;;  %v3092_v16 = vmul.f32 %v7149_v1, %v6477_v51 }
 0xdd3   :  { %v3218_v17 = vmul.f32 %v7144_v60, %v6490_v56  ;;  %v3334_v20 = vmul.f32 %v7149_v1, %v6490_v56  ;;  %v2597_v51 = vmul.f32 %v6263_v26, %v7140_v54  ;;  %v3101_v28 = vmul.f32 %v7144_v60, %v6483_v53 }
 0xdd4   :  { %v3342_v33 = vmul.f32 %v7144_v60, %v6488_v55  ;;  %v3469_v41 = vmul.f32 %v7144_v60, %v6494_v58 }
 0xdd5   :  { %2851 = vrot.lane.b32.xlu0 %v2849_v29, %s6296_s2 }
 0xdd6   :  { %2978 = vrot.lane.b32.xlu1 %v2976_v37, %s6296_s2 }
 0xdd9   :  { %3221 = vrot.lane.b32.xlu0 %v3219_v32, %s6296_s2 }
 0xdda   :  { %3337 = vrot.lane.b32.xlu1 %v3335_v57, %s6292_s29  ;;  %v3091_v57 = vmul.f32 %v6263_v26, %v7149_v1 }
 0xddd   :  { %3345 = vrot.lane.b32.xlu0 %v3343_v30, %s6296_s2 }
 0xdde   :  { %2600 = vrot.lane.b32.xlu1 %v2598_v38, %s6292_s29 }
 0xde1   :  { %3472 = vrot.lane.b32.xlu0 %v3470_v35, %s6296_s2 }
 0xde2   :  { %2609 = vrot.lane.b32.xlu1 %v2607_v42, %s6296_s2 }
 0xe43   :  { %v2728_v39 = vpop.permute.xlu0 %2727 }
 0xe44   :  { %v2730_v3 = vadd.f32 %v2728_v39, %v2724_v44  ;;  %v2844_v0 = vpop.permute.xlu1 %2843 }
 0xe45   :  { %v2846_v62 = vadd.f32 %v2844_v0, %v2840_v2  ;;  %v3100_v2 = vmul.f32 %v6263_v26, %v7144_v60 }
 0xe46   :  { %v2731_v24 = vpack.c.bf16 %v2730_v3, %v2730_v3 }
 0xe47   :  { %v2847_v5 = vpack.c.bf16 %v2846_v62, %v2846_v62  ;;  %v2852_v6 = vpop.permute.xlu0 %2851 }
 0xe48   :  { %v2854_v9 = vadd.f32 %v2852_v6, %v2848_v47  ;;  %v2979_v12 = vpop.permute.xlu1 %2978  ;;  %2733 = vrot.lane.b32.xlu0 %v2731_v24, %s6295_s17 }
 0xe49   :  { %2860 = vrot.lane.b32.xlu1 %v2847_v5, %s6295_s17  ;;  %v2981_v13 = vadd.f32 %v2979_v12, %v2975_v11 }
 0xe4a   :  { %v2855_v40 = vpack.c.bf16 %v2854_v9, %v2854_v9 }
 0xe4b   :  { %v3222_v14 = vpop.permute.xlu0 %3221  ;;  %v2982_v21 = vpack.c.bf16 %v2981_v13, %v2981_v13 }
 0xe4c   :  { %2857 = vrot.lane.b32.xlu0 %v2855_v40, %s6292_s29  ;;  %v3338_v18 = vpop.permute.xlu1 %3337  ;;  %v3224_v23 = vadd.f32 %v3222_v14, %v3218_v17 }
 0xe4d   :  { %3094 = vrot.lane.b32.xlu1 %v3092_v16, %s6292_s29  ;;  %v3340_v49 = vadd.f32 %v3338_v18, %v3334_v20 }
 0xe4e   :  { %v3225_v34 = vpack.c.bf16 %v3224_v23, %v3224_v23 }
 0xe4f   :  { %v3346_v25 = vpop.permute.xlu0 %3345  ;;  %v3341_v43 = vpack.c.bf16 %v3340_v49, %v3340_v49 }
 0xe50   :  { %2984 = vrot.lane.b32.xlu0 %v2982_v21, %s6291_s28  ;;  %v2601_v56 = vpop.permute.xlu1 %2600  ;;  %v3348_v63 = vadd.f32 %v3346_v25, %v3342_v33 }
 0xe51   :  { %v2603_v15 = vadd.f32 %v2601_v56, %v2597_v51  ;;  %3103 = vrot.lane.b32.xlu1 %v3101_v28, %s6296_s2 }
 0xe52   :  { %v3349_v45 = vpack.c.bf16 %v3348_v63, %v3348_v63 }
 0xe53   :  { %v2604_v46 = vpack.c.bf16 %v2603_v15, %v2603_v15  ;;  %v3473_v36 = vpop.permute.xlu0 %3472 }
 0xe54   :  { %v3475_v48 = vadd.f32 %v3473_v36, %v3469_v41  ;;  %3227 = vrot.lane.b32.xlu0 %v3225_v34, %s6295_s17  ;;  %v2610_v53 = vpop.permute.xlu1 %2609 }
 0xe55   :  { %v2618_v55 = vsel %vm172_vm2, %v2604_v46, 0  ;;  %3354 = vrot.lane.b32.xlu1 %v3341_v43, %s6295_s17  ;;  %v2612_v61 = vadd.f32 %v2610_v53, %v2606_v19 }
 0xe56   :  { %v3476_v59 = vpack.c.bf16 %v3475_v48, %v3475_v48  ;;  %5665 = vmatpush3.bf16.xpose.msra.mxu1 %v2618_v55 }
 0xe57   :  { %5676 = vmatprep.subr.bf16.mxu1 %v6288_v7  ;;  %v2613_v58 = vpack.c.bf16 %v2612_v61, %v2612_v61 }
 0xe58   :  { %3351 = vrot.lane.b32.xlu0 %v3349_v45, %s6292_s29 }
 0xe59   :  { %3478 = vrot.lane.b32.xlu1 %v3476_v59, %s6291_s28 }
 0xe5d   :  { %5667 = vmatmul.mubr.msk.bf16.vlgmr.msra.gmra.mrb[60].mxu1 %vm172_vm2, %v2613_v58 }
 0xe5e   :  { %5677 = vmatpush3.bf16.xpose.msra.mxu1 %v2618_v55  ;;  %5678 = vmatprep.mubr.msk.bf16.mxu1 %vm6289_vm1, %v6288_v7 }
 0xe5f   :  { %5688 = vmatprep.subr.bf16.mxu1 %v6288_v7 }
 0xeba   :  { %v2734_v52 = vpop.permute.xlu0 %2733 }
 0xebb   :  { %5679 = vmatmul.mubr.msk.bf16.vlgmr.msra.gmra.mrb[64].mxu1 %vm172_vm2, %v2734_v52  ;;  %v2861_v29 = vpop.permute.xlu1 %2860 }
 0xebc   :  { %v2866_v37 = vsel %vm172_vm2, %v2861_v29, 0  ;;  %5690 = vmatprep.mubr.msk.bf16.mxu1 %vm6289_vm1, %v6288_v7 }
 0xebd   :  { %5689 = vmatpush3.bf16.xpose.msra.mxu1 %v2866_v37 }
 0xebe   :  { %5700 = vmatprep.subr.bf16.mxu1 %v6288_v7  ;;  %v2858_v30 = vpop.permute.xlu0 %2857 }
 0xebf   :  { %v3095_v32 = vpop.permute.xlu1 %3094 }
 0xec0   :  { %v3097_v38 = vadd.f32 %v3095_v32, %v3091_v57 }
 0xec2   :  { %v3098_v35 = vpack.c.bf16 %v3097_v38, %v3097_v38  ;;  %v2985_v42 = vpop.permute.xlu0 %2984 }
 0xec3   :  { %v3104_v44 = vpop.permute.xlu1 %3103 }
 0xec4   :  { %5691 = vmatmul.mubr.msk.bf16.vlgmr.msra.gmra.mrb[68].mxu1 %vm172_vm2, %v2858_v30  ;;  %v3112_v39 = vsel %vm172_vm2, %v3098_v35, 0  ;;  %v3106_v3 = vadd.f32 %v3104_v44, %v3100_v2 }
 0xec5   :  { %5701 = vmatpush3.bf16.xpose.msra.mxu1 %v2866_v37  ;;  %5702 = vmatprep.mubr.msk.bf16.mxu1 %vm6289_vm1, %v6288_v7 }
 0xec6   :  { %5712 = vmatprep.subr.bf16.mxu1 %v6288_v7  ;;  %v3107_v0 = vpack.c.bf16 %v3106_v3, %v3106_v3  ;;  %v3228_v60 = vpop.permute.xlu0 %3227 }
 0xec7   :  { %v3355_v62 = vpop.permute.xlu1 %3354 }
 0xec8   :  { %v3360_v24 = vsel %vm172_vm2, %v3355_v62, 0 }
 0xeca   :  { %v3352_v47 = vpop.permute.xlu0 %3351 }
 0xecb   :  { %v3479_v5 = vpop.permute.xlu1 %3478 }
 0xecc   :  { %5703 = vmatmul.mubr.msk.bf16.vlgmr.msra.gmra.mrb[72].mxu1 %vm172_vm2, %v2985_v42 }
 0xecd   :  { %5713 = vmatpush3.bf16.xpose.msra.mxu1 %v3112_v39  ;;  %5714 = vmatprep.mubr.msk.bf16.mxu1 %vm6289_vm1, %v6288_v7 }
 0xece   :  { %5724 = vmatprep.subr.bf16.mxu1 %v6288_v7 }
 0xed4   :  { %5715 = vmatmul.mubr.msk.bf16.vlgmr.msra.gmra.mrb[76].mxu1 %vm172_vm2, %v3107_v0 }
 0xed5   :  { %5725 = vmatpush3.bf16.xpose.msra.mxu1 %v3112_v39  ;;  %5726 = vmatprep.mubr.msk.bf16.mxu1 %vm6289_vm1, %v6288_v7 }
 0xed6   :  { %5736 = vmatprep.subr.bf16.mxu1 %v6288_v7 }
 0xedc   :  { %5727 = vmatmul.mubr.msk.bf16.vlgmr.msra.gmra.mrb[80].mxu1 %vm172_vm2, %v3228_v60 }
 0xedd   :  { %5737 = vmatpush3.bf16.xpose.msra.mxu1 %v3360_v24  ;;  %5738 = vmatprep.mubr.msk.bf16.mxu1 %vm6289_vm1, %v6288_v7 }
 0xede   :  { %5748 = vmatprep.subr.bf16.mxu1 %v6288_v7 }
 0xee4   :  { %5739 = vmatmul.mubr.msk.bf16.vlgmr.msra.gmra.mrb[84].mxu1 %vm172_vm2, %v3352_v47 }
 0xee5   :  { %5749 = vmatpush3.bf16.xpose.msra.mxu1 %v3360_v24  ;;  %5750 = vmatprep.mubr.msk.bf16.mxu1 %vm6289_vm1, %v6288_v7 }
 0xee6   :  { %5760 = vmatprep.subr.bf16.mxu1 %v6288_v7 }
 0xeec   :  { %5751 = vmatmul.mubr.msk.bf16.vlgmr.msra.gmra.mrb[88].mxu1 %vm172_vm2, %v3479_v5 }
 0xeed   :  { %5768 = vmatprep.mubr.msk.bf16.mxu1 %vm6289_vm1, %v6288_v7 }
 0xf30   :  { %v2654_v6 = vpop.f32.mrb[60].mxu1 }
 0xf31   :  { %v2660_v9 = vmul.f32 0.25, %v2654_v6  ;;  %v5668_v11 = vpop.f32.mrb[61].mxu1 }
 0xf32   :  { %v2657_v12 = vpop.f32.mrb[62].mxu1 }
 0xf33   :  { %v5669_v40 = vpop.f32.mrb[63].mxu1  ;;  %v2661_v13 = vsel %vm6571_vm3, %v2660_v9, -inf }
 0xf34   :  { %v2662_v14 = vsel %vm291_vm4, %v2661_v13, -inf }
 0xf35   :  { %2663 = vmax.xlane.f32.xlu0 %v2662_v14 }
 0xf8e   :  { %v2772_v16 = vpop.f32.mrb[64].mxu1 }
 0xf8f   :  { %v2778_v17 = vmul.f32 0.25, %v2772_v16  ;;  %v5680_v18 = vpop.f32.mrb[65].mxu1 }
 0xf90   :  { %v2775_v20 = vpop.f32.mrb[66].mxu1 }
 0xf91   :  { %v2779_v21 = vsel %vm6571_vm3, %v2778_v17, -inf  ;;  %v5681_v23 = vpop.f32.mrb[67].mxu1 }
 0xf92   :  { %v2780_v49 = vsel %vm291_vm4, %v2779_v21, -inf }
 0xf93   :  { %2781 = vmax.xlane.f32.xlu1 %v2780_v49 }
 0xf97   :  { %v2902_v25 = vpop.f32.mrb[68].mxu1 }
 0xf98   :  { %v2908_v26 = vmul.f32 0.25, %v2902_v25  ;;  %v5692_v51 = vpop.f32.mrb[69].mxu1 }
 0xf99   :  { %v2905_v28 = vpop.f32.mrb[70].mxu1 }
 0xf9a   :  { %v5693_v33 = vpop.f32.mrb[71].mxu1  ;;  %v2909_v56 = vsel %vm6571_vm3, %v2908_v26, -inf }
 0xf9b   :  { %v2910_v15 = vsel %vm291_vm4, %v2909_v56, -inf }
 0xf9c   :  { %2911 = vmax.xlane.f32.xlu0 %v2910_v15 }
 0xf9f   :  { %v3023_v34 = vpop.f32.mrb[72].mxu1 }
 0xfa0   :  { %v3029_v63 = vmul.f32 0.25, %v3023_v34  ;;  %v5704_v41 = vpop.f32.mrb[73].mxu1 }
 0xfa1   :  { %v3026_v43 = vpop.f32.mrb[74].mxu1 }
 0xfa2   :  { %v5705_v46 = vpop.f32.mrb[75].mxu1  ;;  %v3030_v36 = vsel %vm6571_vm3, %v3029_v63, -inf }
 0xfa3   :  { %v3031_v48 = vsel %vm291_vm4, %v3030_v36, -inf }
 0xfa4   :  { %3032 = vmax.xlane.f32.xlu0 %v3031_v48 }
 0xfa7   :  { %v3148_v53 = vpop.f32.mrb[76].mxu1 }
 0xfa8   :  { %v3154_v55 = vmul.f32 0.25, %v3148_v53  ;;  %v5716_v19 = vpop.f32.mrb[77].mxu1 }
 0xfa9   :  { %v3151_v45 = vpop.f32.mrb[78].mxu1 }
 0xfaa   :  { %v3155_v59 = vsel %vm6571_vm3, %v3154_v55, -inf  ;;  %v5717_v61 = vpop.f32.mrb[79].mxu1 }
 0xfab   :  { %v3156_v58 = vsel %vm291_vm4, %v3155_v59, -inf }
 0xfac   :  { %3157 = vmax.xlane.f32.xlu1 %v3156_v58 }
 0xfaf   :  { %v3266_v52 = vpop.f32.mrb[80].mxu1 }
 0xfb0   :  { %v3272_v29 = vmul.f32 0.25, %v3266_v52  ;;  %v5728_v37 = vpop.f32.mrb[81].mxu1 }
 0xfb1   :  { %v3269_v32 = vpop.f32.mrb[82].mxu1 }
 0xfb2   :  { %v5729_v57 = vpop.f32.mrb[83].mxu1  ;;  %v7266_v30 = vsel %vm6571_vm3, %v3272_v29, -inf }
 0xfb3   :  { %v3274_v38 = vsel %vm291_vm4, %v7266_v30, -inf  ;;  %v3099_v57 = vpack.c.bf16 %v7149_v1, %v7149_v1 }
 0xfb4   :  { %3275 = vmax.xlane.f32.xlu0 %v3274_v38 }
 0xfb7   :  { %v3396_v35 = vpop.f32.mrb[84].mxu1 }
 0xfb8   :  { %v3402_v42 = vmul.f32 0.25, %v3396_v35  ;;  %v5740_v44 = vpop.f32.mrb[85].mxu1 }
 0xfb9   :  { %v3399_v39 = vpop.f32.mrb[86].mxu1 }
 0xfba   :  { %v3403_v2 = vsel %vm6571_vm3, %v3402_v42, -inf  ;;  %v5741_v3 = vpop.f32.mrb[87].mxu1 }
 0xfbb   :  { %v3404_v0 = vsel %vm291_vm4, %v3403_v2, -inf }
 0xfbc   :  { %3405 = vmax.xlane.f32.xlu1 %v3404_v0 }
 0xfbf   :  { %v3517_v62 = vpop.f32.mrb[88].mxu1 }
 0xfc0   :  { %v3523_v60 = vmul.f32 0.25, %v3517_v62  ;;  %v5752_v24 = vpop.f32.mrb[89].mxu1 }
 0xfc1   :  { %v3520_v47 = vpop.f32.mrb[90].mxu1 }
 0xfc2   :  { %v2664_v5 = vpop.xlane.xlu0 %2663  ;;  %v5753_v6 = vpop.f32.mrb[91].mxu1  ;;  %v3524_v9 = vsel %vm6571_vm3, %v3523_v60, -inf }
 0xfc3   :  { %v2665_v11 = vsub.f32 %v2661_v13, %v2664_v5  ;;  %v3525_v12 = vsel %vm291_vm4, %v3524_v9, -inf }
 0xfc4   :  { %3526 = vmax.xlane.f32.xlu0 %v3525_v12 }
 0xfc5   :  { %v2666_v40 = vmul.f32 1.442695, %v2665_v11 }
 0xfc7   :  { %6177 = vpow2.f32 %v2666_v40 }
 0xfd1   :  { %v7276_v14 = vpop.eup %6177 }
 0xfd2   :  { %v2668_v16 = vsel %vm291_vm4, %v7276_v14, 0.0 }
 0xfd3   :  { %2669 = vadd.xlane.f32.xlu1 %v2668_v16 }
0x1020   :  { %v2782_v17 = vpop.xlane.xlu1 %2781 }
0x1021   :  { %v2783_v18 = vsub.f32 %v2779_v21, %v2782_v17 }
0x1023   :  { %v2784_v20 = vmul.f32 1.442695, %v2783_v18 }
0x1025   :  { %6179 = vpow2.f32 %v2784_v20 }
0x1029   :  { %v2912_v23 = vpop.xlane.xlu0 %2911 }
0x102a   :  { %v2913_v49 = vsub.f32 %v2909_v56, %v2912_v23 }
0x102c   :  { %v2914_v10 = vmul.f32 1.442695, %v2913_v49 }
0x102e   :  { %6181 = vpow2.f32 %v2914_v10 }
0x102f   :  { %v7280_v13 = vpop.eup %6179 }
0x1030   :  { %v2786_v25 = vsel %vm291_vm4, %v7280_v13, 0.0 }
0x1031   :  { %v3033_v26 = vpop.xlane.xlu0 %3032  ;;  %2787 = vadd.xlane.f32.xlu0 %v2786_v25 }
0x1032   :  { %v3034_v51 = vsub.f32 %v3030_v36, %v3033_v26  ;;  %v2605_v36 = vpack.c.bf16 %v7140_v54, %v7140_v54 }
0x1034   :  { %v3035_v28 = vmul.f32 1.442695, %v3034_v51 }
0x1036   :  { %6183 = vpow2.f32 %v3035_v28 }
0x1038   :  { %v7284_v33 = vpop.eup %6181 }
0x1039   :  { %v3158_v15 = vpop.xlane.xlu1 %3157  ;;  %v2916_v21 = vsel %vm291_vm4, %v7284_v33, 0.0 }
0x103a   :  { %v3159_v34 = vsub.f32 %v3155_v59, %v3158_v15  ;;  %2917 = vadd.xlane.f32.xlu1 %v2916_v21 }
0x103c   :  { %v3160_v56 = vmul.f32 1.442695, %v3159_v34 }
0x103e   :  { %6185 = vpow2.f32 %v3160_v56 }
0x1040   :  { %v7288_v63 = vpop.eup %6183 }
0x1041   :  { %v3037_v41 = vsel %vm291_vm4, %v7288_v63, 0.0  ;;  %v3276_v19 = vpop.xlane.xlu0 %3275 }
0x1042   :  { %3038 = vadd.xlane.f32.xlu0 %v3037_v41  ;;  %v3277_v45 = vsub.f32 %v7266_v30, %v3276_v19 }
0x1044   :  { %v3278_v58 = vmul.f32 1.442695, %v3277_v45 }
0x1048   :  { %v7292_v43 = vpop.eup %6185 }
0x1049   :  { %v3162_v46 = vsel %vm291_vm4, %v7292_v43, 0.0  ;;  %v3406_v48 = vpop.xlane.xlu1 %3405 }
0x104a   :  { %3163 = vadd.xlane.f32.xlu0 %v3162_v46  ;;  %v3407_v53 = vsub.f32 %v3403_v2, %v3406_v48 }
0x104b   :  { %2675 = vrot.lane.b32.xlu1 %v2605_v36, %s6296_s2 }
0x104c   :  { %v3408_v55 = vmul.f32 1.442695, %v3407_v53 }
0x104e   :  { %6187 = vpow2.f32 %v3408_v55 }
0x104f   :  { %6189 = vpow2.f32 %v3278_v58 }
0x1051   :  { %v3527_v59 = vpop.xlane.xlu0 %3526 }
0x1052   :  { %v3528_v52 = vsub.f32 %v3524_v9, %v3527_v59 }
0x1054   :  { %v3529_v29 = vmul.f32 1.442695, %v3528_v52 }
0x1056   :  { %6191 = vpow2.f32 %v3529_v29 }
0x1058   :  { %v7301_v61 = vpop.eup %6187 }
0x1059   :  { %v3410_v54 = vsel %vm291_vm4, %v7301_v61, 0.0  ;;  %v7305_v37 = vpop.eup %6189 }
0x105a   :  { %v3280_v32 = vsel %vm291_vm4, %v7305_v37, 0.0 }
0x1060   :  { %2922 = vrot.lane.b32.xlu0 %v2605_v36, %s6293_s15  ;;  %v7311_v30 = vpop.eup %6191  ;;  %v2670_v35 = vpop.xlane.xlu1 %2669 }
0x1061   :  { %v3531_v38 = vsel %vm291_vm4, %v7311_v30, 0.0  ;;  %6193 = vrcp.f32 %v2670_v35 }
0x106b   :  { %v6194_v44 = vpop.eup %6193 }
0x106c   :  { %v2672_v2 = vmul.f32 %v6194_v44, %v7276_v14 }
0x106e   :  { %v2673_v0 = vpack.c.bf16 %v2672_v2, %v2672_v2  ;;  %v6002_v2 = vld [vmem:[%s7779_s6 + $0x28] sm:$0xff]  }
0x106f   :  { %3411 = vadd.xlane.f32.xlu1 %v3410_v54 }
0x107f   :  { %3281 = vadd.xlane.f32.xlu0 %v3280_v32 }
0x1080   :  { %3169 = vrot.lane.b32.xlu1 %v3099_v57, %s6296_s2 }
0x1083   :  { %3532 = vadd.xlane.f32.xlu0 %v3531_v38 }
0x1099   :  { %3416 = vrot.lane.b32.xlu0 %v3099_v57, %s6293_s15 }
0x10be   :  { %v2788_v42 = vpop.xlane.xlu0 %2787 }
0x10bf   :  { %6195 = vrcp.f32 %v2788_v42 }
0x10c7   :  { %v2918_v39 = vpop.xlane.xlu1 %2917 }
0x10c8   :  { %6197 = vrcp.f32 %v2918_v39  ;;  %v6001_v39 = vld [vmem:[%s7779_s6 + $0x20] sm:$0xff]  }
0x10c9   :  { %v6196_v62 = vpop.eup %6195  ;;  %5761 = vmatpush3.bf16.msra.mxu1 %v6001_v39 }
0x10ca   :  { %v2790_v60 = vmul.f32 %v6196_v62, %v7280_v13  ;;  %5762 = vmatprep.subr.bf16.mxu1 %v6288_v7 }
0x10cb   :  { %v2676_v1 = vpop.permute.xlu1 %2675 }
0x10cc   :  { %v2681_v3 = vsel %vm310_vm5, %v2676_v1, 0  ;;  %v2791_v47 = vpack.c.bf16 %v2790_v60, %v2790_v60  ;;  %v6003_v60 = vld [vmem:[%s7779_s6 + $0x30] sm:$0xff]  }
0x10cd   :  { %5671 = vmatpush3.bf16.msra.mxu0 %v2681_v3  ;;  %5763 = vmatpush3.bf16.msra.mxu1 %v6002_v2 }
0x10ce   :  { %5682 = vmatprep.subr.bf16.mxu0 %v6288_v7  ;;  %5764 = vmatprep.subr.bf16.mxu1 %v6288_v7 }
0x10cf   :  { %v3039_v24 = vpop.xlane.xlu0 %3038 }
0x10d0   :  { %5673 = vmatmul.mubr.msk.bf16.vlgmr.msra.gmra.mrb[60].mxu0 %vm291_vm4, %v2673_v0  ;;  %6199 = vrcp.f32 %v3039_v24  ;;  %v6004_v24 = vld [vmem:[%s7779_s6 + $0x38] sm:$0xff]  }
0x10d1   :  { %5683 = vmatpush3.bf16.msra.mxu0 %v2681_v3  ;;  %5684 = vmatprep.mubr.msk.bf16.mxu0 %vm6289_vm1, %v6288_v7 }
0x10d2   :  { %5694 = vmatprep.subr.bf16.mxu0 %v6288_v7  ;;  %v6198_v5 = vpop.eup %6197  ;;  %5765 = vmatpush3.bf16.msra.mxu1 %v6003_v60  ;;  %v6029_v60 = vld [vmem:[%s7783_s10 + $0x164] ss:$8 sps:$4 sm:$0xff]  }
0x10d3   :  { %v2920_v9 = vmul.f32 %v6198_v5, %v7284_v33  ;;  %5766 = vmatprep.subr.bf16.mxu1 %v6288_v7 }
0x10d5   :  { %v2921_v40 = vpack.c.bf16 %v2920_v9, %v2920_v9 }
0x10d6   :  { %5767 = vmatpush3.bf16.msra.mxu1 %v6004_v24  ;;  %v6027_v24 = vld [vmem:[%s7783_s10 + $0x160] ss:$8 sps:$4 sm:$0xff]  }
0x10d7   :  { %v3164_v6 = vpop.xlane.xlu0 %3163 }
0x10d8   :  { %5685 = vmatmul.mubr.msk.bf16.vlgmr.msra.gmra.mrb[64].mxu0 %vm291_vm4, %v2791_v47  ;;  %6201 = vrcp.f32 %v3164_v6 }
0x10d9   :  { %5696 = vmatprep.mubr.msk.bf16.mxu0 %vm6289_vm1, %v6288_v7 }
0x10da   :  { %v6200_v14 = vpop.eup %6199 }
0x10db   :  { %v2923_v11 = vpop.permute.xlu0 %2922  ;;  %v3041_v16 = vmul.f32 %v6200_v14, %v7288_v63 }
0x10dc   :  { %v2928_v12 = vsel %vm310_vm5, %v2923_v11, 0 }
0x10dd   :  { %5695 = vmatpush3.bf16.msra.mxu0 %v2928_v12  ;;  %v3042_v17 = vpack.c.bf16 %v3041_v16, %v3041_v16 }
0x10de   :  { %5706 = vmatprep.subr.bf16.mxu0 %v6288_v7 }
0x10e0   :  { %5697 = vmatmul.mubr.msk.bf16.vlgmr.msra.gmra.mrb[68].mxu0 %vm291_vm4, %v2921_v40 }
0x10e1   :  { %5707 = vmatpush3.bf16.msra.mxu0 %v2928_v12  ;;  %5708 = vmatprep.mubr.msk.bf16.mxu0 %vm6289_vm1, %v6288_v7 }
0x10e2   :  { %5718 = vmatprep.subr.bf16.mxu0 %v6288_v7  ;;  %v6202_v18 = vpop.eup %6201 }
0x10e3   :  { %v3166_v23 = vmul.f32 %v6202_v18, %v7292_v43 }
0x10e5   :  { %v3167_v13 = vpack.c.bf16 %v3166_v23, %v3166_v23 }
0x10e8   :  { %5709 = vmatmul.mubr.msk.bf16.vlgmr.msra.gmra.mrb[72].mxu0 %vm291_vm4, %v3042_v17 }
0x10e9   :  { %5720 = vmatprep.mubr.msk.bf16.mxu0 %vm6289_vm1, %v6288_v7 }
0x10fc   :  { %v3412_v20 = vpop.xlane.xlu1 %3411 }
0x1100   :  { %v3170_v49 = vpop.permute.xlu1 %3169 }
0x1101   :  { %v3175_v10 = vsel %vm310_vm5, %v3170_v49, 0 }
0x1102   :  { %5719 = vmatpush3.bf16.msra.mxu0 %v3175_v10 }
0x1103   :  { %5730 = vmatprep.subr.bf16.mxu0 %v6288_v7 }
0x1105   :  { %5721 = vmatmul.mubr.msk.bf16.vlgmr.msra.gmra.mrb[76].mxu0 %vm291_vm4, %v3167_v13 }
0x1106   :  { %5731 = vmatpush3.bf16.msra.mxu0 %v3175_v10  ;;  %5732 = vmatprep.mubr.msk.bf16.mxu0 %vm6289_vm1, %v6288_v7 }
0x1107   :  { %5742 = vmatprep.subr.bf16.mxu0 %v6288_v7 }
0x110c   :  { %v3282_v25 = vpop.xlane.xlu0 %3281 }
0x110d   :  { %6203 = vrcp.f32 %v3282_v25 }
0x110e   :  { %6205 = vrcp.f32 %v3412_v20 }
0x1110   :  { %v3533_v26 = vpop.xlane.xlu0 %3532 }
0x1111   :  { %6207 = vrcp.f32 %v3533_v26 }
0x1114   :  { %v3417_v33 = vpop.permute.xlu0 %3416 }
0x1115   :  { %v3422_v34 = vsel %vm310_vm5, %v3417_v33, 0 }
0x1117   :  { %v6204_v51 = vpop.eup %6203 }
0x1118   :  { %v3284_v28 = vmul.f32 %v6204_v51, %v7305_v37  ;;  %v6206_v21 = vpop.eup %6205 }
0x1119   :  { %v3414_v56 = vmul.f32 %v6206_v21, %v7301_v61 }
0x111a   :  { %v3285_v15 = vpack.c.bf16 %v3284_v28, %v3284_v28 }
0x111b   :  { %v3415_v63 = vpack.c.bf16 %v3414_v56, %v3414_v56  ;;  %v6208_v41 = vpop.eup %6207 }
0x111c   :  { %5733 = vmatmul.mubr.msk.bf16.vlgmr.msra.gmra.mrb[80].mxu0 %vm291_vm4, %v3285_v15  ;;  %v3535_v43 = vmul.f32 %v6208_v41, %v7311_v30 }
0x111d   :  { %5743 = vmatpush3.bf16.msra.mxu0 %v3422_v34  ;;  %5744 = vmatprep.mubr.msk.bf16.mxu0 %vm6289_vm1, %v6288_v7 }
0x111e   :  { %5754 = vmatprep.subr.bf16.mxu0 %v6288_v7  ;;  %v3536_v46 = vpack.c.bf16 %v3535_v43, %v3535_v43  ;;  %v6008_v43 = vld [vmem:[%s7781_s8 + $0x20] sm:$0xff]  }
0x1124   :  { %5745 = vmatmul.mubr.msk.bf16.vlgmr.msra.gmra.mrb[84].mxu0 %vm291_vm4, %v3415_v63 }
0x1125   :  { %5755 = vmatpush3.bf16.msra.mxu0 %v3422_v34  ;;  %5756 = vmatprep.mubr.msk.bf16.mxu0 %vm6289_vm1, %v6288_v7 }
0x1126   :  { %5772 = vmatprep.subr.bf16.mxu0 %v6288_v7 }
0x112c   :  { %5757 = vmatmul.mubr.msk.bf16.vlgmr.msra.gmra.mrb[88].mxu0 %vm291_vm4, %v3536_v46  ;;  %v6011_v46 = vld [vmem:[%s7783_s10 + $0x114] ss:$8 sps:$4 sm:$0xff]  }
0x112d   :  { %5780 = vmatprep.mubr.msk.bf16.mxu0 %vm6289_vm1, %v6288_v7  ;;  %5773 = vmatpush3.bf16.msra.mxu0 %v6008_v43 }
0x112e   :  { %5774 = vmatprep.subr.bf16.mxu0 %v6288_v7 }
0x11a3   :  { %v2717_v36 = vpop.f32.mrb[60].mxu0 }
0x11a4   :  { %2723 = vst.msk [vmem:[#allocation2] sm:$0xff] %vm172_vm2, %v2717_v36  ;;  %v5674_v48 = vpop.f32.mrb[61].mxu0  ;;  %v6009_v36 = vld [vmem:[%s7783_s10 + $0x110] ss:$8 sps:$4 sm:$0xff]  }
0x11a5   :  { %v2720_v53 = vpop.f32.mrb[62].mxu0  ;;  %v6012_v48 = vld [vmem:[%s7781_s8 + $0x28] sm:$0xff]  }
0x11a6   :  { %v5675_v55 = vpop.f32.mrb[63].mxu0  ;;  %5775 = vmatpush3.bf16.msra.mxu0 %v6012_v48  ;;  %v6013_v53 = vld [vmem:[%s7783_s10 + $0x120] ss:$8 sps:$4 sm:$0xff]  }
0x11a7   :  { %v6015_v55 = vld [vmem:[%s7783_s10 + $0x124] ss:$8 sps:$4 sm:$0xff]   ;;  %5776 = vmatprep.subr.bf16.mxu0 %v6288_v7 }
0x11ab   :  { %v2829_v19 = vpop.f32.mrb[64].mxu0 }
0x11ac   :  { %2836 = vrot.lane.b32.xlu1 %v2829_v19, %s6297_s18  ;;  %v5686_v45 = vpop.f32.mrb[65].mxu0  ;;  %v6016_v19 = vld [vmem:[%s7781_s8 + $0x30] sm:$0xff]  }
0x11ad   :  { %v2832_v59 = vpop.f32.mrb[66].mxu0  ;;  %v6019_v45 = vld [vmem:[%s7783_s10 + $0x134] ss:$8 sps:$4 sm:$0xff]   ;;  %5777 = vmatpush3.bf16.msra.mxu0 %v6016_v19 }
0x11ae   :  { %v5687_v61 = vpop.f32.mrb[67].mxu0  ;;  %v6017_v59 = vld [vmem:[%s7783_s10 + $0x130] ss:$8 sps:$4 sm:$0xff]   ;;  %5778 = vmatprep.subr.bf16.mxu0 %v6288_v7 }
0x11af   :  { %v6020_v61 = vld [vmem:[%s7781_s8 + $0x38] sm:$0xff]  }
0x11b1   :  { %5779 = vmatpush3.bf16.msra.mxu0 %v6020_v61 }
0x11b2   :  { %5784 = vmatprep.subr.bf16.mxu0 %v6288_v7 }
0x11b3   :  { %v2964_v58 = vpop.f32.mrb[68].mxu0 }
0x11b4   :  { %2971 = vrot.lane.b32.xlu1 %v2964_v58, %s6294_s16  ;;  %v5698_v52 = vpop.f32.mrb[69].mxu0  ;;  %v6023_v58 = vld [vmem:[%s7783_s10 + $0x144] ss:$8 sps:$4 sm:$0xff]  }
0x11b5   :  { %v2967_v54 = vpop.f32.mrb[70].mxu0 }
0x11b6   :  { %v5699_v29 = vpop.f32.mrb[71].mxu0 }
0x11bb   :  { %v3080_v37 = vpop.f32.mrb[72].mxu0 }
0x11bc   :  { %3087 = vrot.lane.b32.xlu0 %v3080_v37, %s6293_s15  ;;  %v5710_v32 = vpop.f32.mrb[73].mxu0 }
0x11bd   :  { %v3083_v57 = vpop.f32.mrb[74].mxu0 }
0x11be   :  { %v5711_v30 = vpop.f32.mrb[75].mxu0 }
0x11d8   :  { %v3211_v38 = vpop.f32.mrb[76].mxu0 }
0x11d9   :  { %3217 = vst.msk [vmem:[#allocation2 + $0x8] sm:$0xff] %vm172_vm2, %v3211_v38  ;;  %v5722_v35 = vpop.f32.mrb[77].mxu0  ;;  %vm7790_vm2 = vcmask 523648  }
0x11da   :  { %v3214_v42 = vpop.f32.mrb[78].mxu0  ;;  %vm7791_vm3 = vmmov %vm7790_vm2 }
0x11db   :  { %v5723_v44 = vpop.f32.mrb[79].mxu0  ;;  %v5071_v42 = vld [vmem:[%s7780_s7 + $0x1] ss:$0 sm:$0xff]  ;;  %s6300_s7 = smov [#allocation3]  }
0x11dc   :  { %s4811_s22 = sshll.u32 %s6300_s7, 4  ;;  %s4812_s22 = int_to_ptr.vmem [resolvable:$true] %s4811_s22 }
0x11dd   :  { %s6264_s23 = scalar_lea.vmem %s4812_s22, 256  ;;  %p6269_p1 = scmp.lt.s32.totalorder %s4812_s22, %s4812_s22 }
0x11de   :  { %p6265_p0 = scmp.ne.s32.totalorder %s4812_s22, %s6264_s23  ;;  %p6270_p2 = scmp.lt.s32.totalorder %s6264_s23, %s6264_s23 }
0x11e0   :  { %p6271_p3 = por %p6270_p2, %p6269_p1 }
0x11e2   :  { %p6272_p4 = pnand %p6271_p3, %p6265_p0 }
0x11ef   :  { %v3323_v1 = vpop.f32.mrb[80].mxu0 }
0x11f0   :  { %3330 = vrot.lane.b32.xlu1 %v3323_v1, %s6297_s18  ;;  %v5734_v3 = vpop.f32.mrb[81].mxu0  ;;  %v6021_v1 = vld [vmem:[%s7783_s10 + $0x140] ss:$8 sps:$4 sm:$0xff]  }
0x11f1   :  { %v3326_v0 = vpop.f32.mrb[82].mxu0 }
0x11f2   :  { %v5735_v62 = vpop.f32.mrb[83].mxu0  ;;  %v6026_v0 = vld [vmem:[%s7783_s10 + $0x154] ss:$8 sps:$4 sm:$0xff]  }
0x11f3   :  { %v6024_v62 = vld [vmem:[%s7783_s10 + $0x150] ss:$8 sps:$4 sm:$0xff]  }
0x11f7   :  { %v3458_v47 = vpop.f32.mrb[84].mxu0 }
0x11f8   :  { %3465 = vrot.lane.b32.xlu1 %v3458_v47, %s6294_s16  ;;  %v5746_v5 = vpop.f32.mrb[85].mxu0  ;;  %v6032_v47 = vld [vmem:[%s7783_s10 + $0x174] ss:$8 sps:$4 sm:$0xff]  }
0x11f9   :  { %v3461_v6 = vpop.f32.mrb[86].mxu0  ;;  %v6030_v5 = vld [vmem:[%s7783_s10 + $0x170] ss:$8 sps:$4 sm:$0xff]  }
0x11fa   :  { %v5747_v9 = vpop.f32.mrb[87].mxu0  ;;  %v6033_v6 = vld [vmem:[%s7784_s11 + $0x100] sm:$0xff]  }
0x11fb   :  { %v6034_v9 = vld [vmem:[%s7784_s11 + $0x108] sm:$0xff]  }
0x11ff   :  { %v3574_v11 = vpop.f32.mrb[88].mxu0 }
0x1200   :  { %3581 = vrot.lane.b32.xlu1 %v3574_v11, %s6293_s15  ;;  %v5758_v12 = vpop.f32.mrb[89].mxu0  ;;  %v6035_v11 = vld [vmem:[%s7784_s11 + $0x110] sm:$0xff]  }
0x1201   :  { %v3577_v40 = vpop.f32.mrb[90].mxu0  ;;  %v6036_v12 = vld [vmem:[%s7784_s11 + $0x118] sm:$0xff]  }
0x1202   :  { %v5759_v14 = vpop.f32.mrb[91].mxu0  ;;  %v6037_v40 = vld [vmem:[%s7784_s11 + $0x140] sm:$0xff]  }
0x1203   :  { %v6038_v14 = vld [vmem:[%s7784_s11 + $0x120] sm:$0xff]  }
0x121e   :  { %v2837_v16 = vpop.permute.xlu1 %2836 }
0x121f   :  { %2839 = vst.msk [vmem:[#allocation2] sm:$0xff] %vm477_vm6, %v2837_v16  ;;  %v6039_v16 = vld [vmem:[%s7784_s11 + $0x148] sm:$0xff]  }
0x1226   :  { %v2972_v17 = vpop.permute.xlu1 %2971 }
0x1227   :  { %2974 = vst.msk [vmem:[#allocation2] sm:$0xff] %vm622_vm7, %v2972_v17  ;;  %v6040_v17 = vld [vmem:[%s7784_s11 + $0x128] sm:$0xff]  }
0x122e   :  { %v3088_v18 = vpop.permute.xlu0 %3087 }
0x122f   :  { %3090 = vst.msk [vmem:[#allocation2] sm:$0xff] %vm7790_vm2, %v3088_v18  ;;  %v6041_v18 = vld [vmem:[%s7784_s11 + $0x150] sm:$0xff]  }
0x1236   :  { %v3585_v10 = vld [vmem:[#allocation2] sm:$0xff] }
0x1262   :  { %v3331_v20 = vpop.permute.xlu1 %3330 }
0x1263   :  { %3333 = vst.msk [vmem:[#allocation2 + $0x8] sm:$0xff] %vm477_vm6, %v3331_v20  ;;  %v6042_v20 = vld [vmem:[%s7784_s11 + $0x130] sm:$0xff]  }
0x126a   :  { %v3466_v23 = vpop.permute.xlu1 %3465 }
0x126b   :  { %3468 = vst.msk [vmem:[#allocation2 + $0x8] sm:$0xff] %vm622_vm7, %v3466_v23  ;;  %v6043_v23 = vld [vmem:[%s7784_s11 + $0x158] sm:$0xff]  }
0x1272   :  { %v3582_v49 = vpop.permute.xlu1 %3581 }
0x1273   :  { %3584 = vst.msk [vmem:[#allocation2 + $0x8] sm:$0xff] %vm7791_vm3, %v3582_v49  ;;  %v6044_v49 = vld [vmem:[%s7784_s11 + $0x138] sm:$0xff]  }
0x127a   :  { %v3586_v13 = vld [vmem:[#allocation2 + $0x8] sm:$0xff] }
0x127b   :  { %v3587_v25 = vpack.c.bf16 %v3586_v13, %v3585_v10  ;;  %v6045_v10 = vld [vmem:[%s7784_s11 + $0x160] sm:$0xff]  }
0x127c   :  { %v6048_v13 = vld [vmem:[%s7783_s10 + $0x184] ss:$8 sps:$4 sm:$0xff]  }
0x127d   :  { %5769 = vmatmul.mubr.msk.bf16.vlgmr.msra.gmra.mrb[92].mxu1 %vm57_vm0, %v3587_v25  ;;  %v6049_v25 = vld [vmem:[%s7784_s11 + $0x168] sm:$0xff]  }
0x127e   :  { %3960 = vmatprep.mubr.bf16.mxu1 %v6290_v27 }
0x1350   :  { %v3658_v26 = vpop.f32.mrb[92].mxu1 }
0x1351   :  { %v7393_v51 = vadd.f32 %v3658_v26, %v7096_v4  ;;  %v5770_v28 = vpop.f32.mrb[93].mxu1  ;;  %v6007_v4 = vld [vmem:[%s7783_s10 + $0x104] ss:$8 sps:$4 sm:$0xff]   ;;  %v6053_v26 = vld [vmem:[%s7784_s11 + $0x170] sm:$0xff]  }
0x1352   :  { %v3661_v33 = vpop.f32.mrb[94].mxu1  ;;  %3928 = vmatprep.subr.bf16.mxu1 %v6007_v4  ;;  %v6057_v28 = vld [vmem:[%s7784_s11 + $0x178] sm:$0xff]  }
0x1353   :  { %v7396_v15 = vadd.f32 %v3661_v33, %v7098_v31  ;;  %v5771_v21 = vpop.f32.mrb[95].mxu1  ;;  %v3667_v34 = vmul.f32 %v7393_v51, %v7393_v51  ;;  %v6005_v31 = vld [vmem:[%s7783_s10 + $0x100] ss:$8 sps:$4 sm:$0xff]   ;;  %v6063_v33 = vld [vmem:[%s7783_s10 + $0x1c4] ss:$8 sps:$4 sm:$0xff]  }
0x1354   :  { %3929 = vmatpush1.bf16.msra.mxu1 %v6005_v31  ;;  %v5081_v21 = vld [vmem:[%s7782_s9 + $0x1] ss:$0 sm:$0xff] }
0x1355   :  { %v3669_v56 = vsel %vm57_vm0, %v3667_v34, 0.0  ;;  %v3668_v63 = vmul.f32 %v7396_v15, %v7396_v15  ;;  %3930 = vmatprep.subr.bf16.mxu1 %v6011_v46 }
0x1356   :  { %3670 = vadd.xlane.f32.xlu0 %v3669_v56 }
0x1357   :  { %v3672_v41 = vsel %vm57_vm0, %v3668_v63, 0.0 }
0x1358   :  { %3673 = vadd.xlane.f32.xlu1 %v3672_v41  ;;  %3931 = vmatpush1.bf16.msra.mxu1 %v6009_v36 }
0x1359   :  { %3932 = vmatprep.subr.bf16.mxu1 %v6015_v55 }
0x135c   :  { %3933 = vmatpush1.bf16.msra.mxu1 %v6013_v53 }
0x135d   :  { %3934 = vmatprep.subr.bf16.mxu1 %v6019_v45 }
0x1360   :  { %3935 = vmatpush1.bf16.msra.mxu1 %v6017_v59 }
0x1361   :  { %4145 = vmatprep.subr.bf16.mxu1 %v6023_v58 }
0x13e3   :  { %v3671_v52 = vpop.xlane.xlu0 %3670 }
0x13e4   :  { %v3675_v54 = vmul.f32 0.015625, %v3671_v52 }
0x13e5   :  { %v3674_v29 = vpop.xlane.xlu1 %3673 }
0x13e6   :  { %v3677_v37 = vadd.f32 1e-05, %v3675_v54  ;;  %v3676_v32 = vmul.f32 0.015625, %v3674_v29 }
0x13e8   :  { %6209 = vrsqrt.f32 %v3677_v37  ;;  %v3678_v57 = vadd.f32 1e-05, %v3676_v32 }
0x13ea   :  { %6211 = vrsqrt.f32 %v3678_v57 }
0x13f2   :  { %v6210_v30 = vpop.eup %6209 }
0x13f3   :  { %v3681_v38 = vmul.f32 %v6210_v30, %v7393_v51 }
0x13f4   :  { %v6212_v35 = vpop.eup %6211 }
0x13f5   :  { %v3682_v44 = vmul.f32 %v6212_v35, %v7396_v15  ;;  %v3691_v39 = vmul.f32 %v5071_v42, %v3681_v38 }
0x13f7   :  { %v3692_v2 = vmul.f32 %v5071_v42, %v3682_v44 }
0x13f9   :  { %v7455_v3 = vpack.c.bf16 %v3692_v2, %v3691_v39 }
0x13fb   :  { %5781 = vmatmul.mubr.msk.bf16.vlgmr.msra.gmra.mrb[92].mxu0 %vm57_vm0, %v7455_v3  ;;  %5117 = vmatmul.mubr.msk.bf16.vlgmr.msra.gmra.mrb[96].mxu1 %vm57_vm0, %v7455_v3 }
0x13fc   :  { %4146 = vmatpush1.bf16.msra.mxu1 %v6021_v1  ;;  %4177 = vmatprep.mubr.bf16.mxu1 %v6290_v27 }
0x13fd   :  { %4147 = vmatprep.subr.bf16.mxu1 %v6026_v0  ;;  %5800 = vmatprep.mubr.msk.bf16.mxu0 %vm6289_vm1, %v6288_v7 }
0x13fe   :  { %5785 = vmatpush3.bf16.msra.mxu0 %v6033_v6 }
0x13ff   :  { %5786 = vmatprep.subr.bf16.mxu0 %v6288_v7 }
0x1400   :  { %4148 = vmatpush1.bf16.msra.mxu1 %v6024_v62 }
0x1401   :  { %4149 = vmatprep.subr.bf16.mxu1 %v6029_v60 }
0x1402   :  { %5787 = vmatpush3.bf16.msra.mxu0 %v6034_v9 }
0x1403   :  { %5788 = vmatprep.subr.bf16.mxu0 %v6288_v7 }
0x1404   :  { %4150 = vmatpush1.bf16.msra.mxu1 %v6027_v24 }
0x1405   :  { %4151 = vmatprep.subr.bf16.mxu1 %v6032_v47 }
0x1406   :  { %5789 = vmatpush3.bf16.msra.mxu0 %v6035_v11  ;;  %v6046_v11 = vld [vmem:[%s7783_s10 + $0x180] ss:$8 sps:$4 sm:$0xff]  }
0x1407   :  { %5790 = vmatprep.subr.bf16.mxu0 %v6288_v7 }
0x1408   :  { %4152 = vmatpush1.bf16.msra.mxu1 %v6030_v5 }
0x1409   :  { %5804 = vmatprep.subr.bf16.mxu1 %v6288_v7 }
0x140a   :  { %5791 = vmatpush3.bf16.msra.mxu0 %v6036_v12 }
0x140b   :  { %5160 = vmatmul.mubr.msk.bf16.vlgmr.msra.gmra.mrb[100].mxu1 %vm57_vm0, %v7455_v3  ;;  %5792 = vmatprep.subr.bf16.mxu0 %v6288_v7 }
0x140c   :  { %5820 = vmatprep.mubr.msk.bf16.mxu1 %vm6289_vm1, %v6288_v7  ;;  %5805 = vmatpush3.bf16.msra.mxu1 %v6037_v40  ;;  %v6052_v40 = vld [vmem:[%s7783_s10 + $0x194] ss:$8 sps:$4 sm:$0xff]  }
0x140d   :  { %5806 = vmatprep.subr.bf16.mxu1 %v6288_v7 }
0x140e   :  { %5793 = vmatpush3.bf16.msra.mxu0 %v6038_v14  ;;  %v6050_v14 = vld [vmem:[%s7783_s10 + $0x190] ss:$8 sps:$4 sm:$0xff]  }
0x140f   :  { %5794 = vmatprep.subr.bf16.mxu0 %v6288_v7 }
0x1410   :  { %5807 = vmatpush3.bf16.msra.mxu1 %v6039_v16 }
0x1411   :  { %5808 = vmatprep.subr.bf16.mxu1 %v6288_v7 }
0x1412   :  { %5795 = vmatpush3.bf16.msra.mxu0 %v6040_v17  ;;  %v6056_v17 = vld [vmem:[%s7783_s10 + $0x1a4] ss:$8 sps:$4 sm:$0xff]  }
0x1413   :  { %5796 = vmatprep.subr.bf16.mxu0 %v6288_v7 }
0x1414   :  { %5809 = vmatpush3.bf16.msra.mxu1 %v6041_v18  ;;  %v6054_v18 = vld [vmem:[%s7783_s10 + $0x1a0] ss:$8 sps:$4 sm:$0xff]  }
0x1415   :  { %5810 = vmatprep.subr.bf16.mxu1 %v6288_v7 }
0x1416   :  { %5797 = vmatpush3.bf16.msra.mxu0 %v6042_v20  ;;  %v6060_v20 = vld [vmem:[%s7783_s10 + $0x1b4] ss:$8 sps:$4 sm:$0xff]  }
0x1417   :  { %5798 = vmatprep.subr.bf16.mxu0 %v6288_v7 }
0x1418   :  { %5811 = vmatpush3.bf16.msra.mxu1 %v6043_v23 }
0x1419   :  { %5812 = vmatprep.subr.bf16.mxu1 %v6288_v7 }
0x141a   :  { %5799 = vmatpush3.bf16.msra.mxu0 %v6044_v49 }
0x141b   :  { %4374 = vmatprep.subr.bf16.mxu0 %v6048_v13  ;;  %v6058_v13 = vld [vmem:[%s7783_s10 + $0x1b0] ss:$8 sps:$4 sm:$0xff]  }
0x141c   :  { %5813 = vmatpush3.bf16.msra.mxu1 %v6045_v10 }
0x141d   :  { %5814 = vmatprep.subr.bf16.mxu1 %v6288_v7 }
0x1420   :  { %5815 = vmatpush3.bf16.msra.mxu1 %v6049_v25 }
0x1421   :  { %5816 = vmatprep.subr.bf16.mxu1 %v6288_v7 }
0x1424   :  { %5817 = vmatpush3.bf16.msra.mxu1 %v6053_v26 }
0x1425   :  { %5818 = vmatprep.subr.bf16.mxu1 %v6288_v7 }
0x1428   :  { %5819 = vmatpush3.bf16.msra.mxu1 %v6057_v28 }
0x1429   :  { %4601 = vmatprep.subr.bf16.mxu1 %v6063_v33  ;;  %v6061_v33 = vld [vmem:[%s7783_s10 + $0x1c0] ss:$8 sps:$4 sm:$0xff]  }
0x14ce   :  { %v3772_v34 = vpop.f32.mrb[92].mxu0  ;;  %v3962_v56 = vpop.f32.mrb[96].mxu1 }
0x14cf   :  { %v3773_v63 = vadd.f32 %v5081_v21, %v3772_v34  ;;  %v5118_v41 = vmul.f32 -1.442695, %v3962_v56  ;;  %v5782_v4 = vpop.f32.mrb[93].mxu0  ;;  %v3964_v31 = vpop.f32.mrb[97].mxu1  ;;  %v6066_v34 = vld [vmem:[%s7783_s10 + $0x1d4] ss:$8 sps:$4 sm:$0xff]  }
0x14d0   :  { %v3775_v43 = vpop.f32.mrb[94].mxu0  ;;  %v3966_v46 = vpop.f32.mrb[98].mxu1  ;;  %v6072_v4 = vld [vmem:[%s7783_s10 + $0x1f4] ss:$8 sps:$4 sm:$0xff]  }
0x14d1   :  { %v5087_v36 = vmul.f32 -1.442695, %v3773_v63  ;;  %6213 = vpow2.f32 %v5118_v41  ;;  %v3776_v48 = vadd.f32 %v5081_v21, %v3775_v43  ;;  %v5119_v53 = vmul.f32 -1.442695, %v3966_v46  ;;  %v5783_v55 = vpop.f32.mrb[95].mxu0  ;;  %v3968_v19 = vpop.f32.mrb[99].mxu1 }
0x14d2   :  { %v6069_v63 = vld [vmem:[%s7783_s10 + $0x1e4] ss:$8 sps:$4 sm:$0xff]   ;;  %v6067_v41 = vld [vmem:[%s7783_s10 + $0x1e0] ss:$8 sps:$4 sm:$0xff]  }
0x14d3   :  { %6215 = vpow2.f32 %v5087_v36  ;;  %v5088_v45 = vmul.f32 -1.442695, %v3776_v48  ;;  %v6074_v43 = vld [vmem:[%s7784_s11 + $0x188] sm:$0xff]   ;;  %v6077_v36 = vld [vmem:[%s7784_s11 + $0x1c0] sm:$0xff]  }
0x14d4   :  { %6217 = vpow2.f32 %v5119_v53  ;;  %v6078_v55 = vld [vmem:[%s7784_s11 + $0x1a0] sm:$0xff]  }
0x14d5   :  { %6219 = vpow2.f32 %v5088_v45 }
0x14db   :  { %v6214_v59 = vpop.eup %6213 }
0x14dc   :  { %v3977_v61 = vadd.f32 1.0, %v6214_v59 }
0x14dd   :  { %v6216_v58 = vpop.eup %6215 }
0x14de   :  { %v6218_v52 = vpop.eup %6217  ;;  %v3785_v54 = vadd.f32 1.0, %v6216_v58  ;;  %6221 = vrcp.f32 %v3977_v61  ;;  %v4179_v29 = vpop.f32.mrb[100].mxu1  ;;  %v6079_v58 = vld [vmem:[%s7784_s11 + $0x1c8] sm:$0xff]  }
0x14df   :  { %v3978_v37 = vadd.f32 1.0, %v6218_v52  ;;  %v5161_v32 = vmul.f32 -1.442695, %v4179_v29  ;;  %v4181_v57 = vpop.f32.mrb[101].mxu1  ;;  %v6220_v42 = vpop.eup %6219 }
0x14e0   :  { %6223 = vrcp.f32 %v3785_v54  ;;  %v4183_v30 = vpop.f32.mrb[102].mxu1  ;;  %v3786_v44 = vadd.f32 1.0, %v6220_v42  ;;  %v6082_v42 = vld [vmem:[%s7784_s11 + $0x1b0] sm:$0xff]  }
0x14e1   :  { %6225 = vrcp.f32 %v3978_v37  ;;  %v5162_v38 = vmul.f32 -1.442695, %v4183_v30  ;;  %v4185_v35 = vpop.f32.mrb[103].mxu1 }
0x14e2   :  { %6227 = vpow2.f32 %v5161_v32 }
0x14e3   :  { %6229 = vpow2.f32 %v5162_v38  ;;  %v6081_v38 = vld [vmem:[%s7784_s11 + $0x1d0] sm:$0xff]  }
0x14e4   :  { %6231 = vrcp.f32 %v3786_v44 }
0x14e8   :  { %v6222_v39 = vpop.eup %6221 }
0x14e9   :  { %v3983_v2 = vmul.f32 %v6222_v39, %v3962_v56  ;;  %v6064_v56 = vld [vmem:[%s7783_s10 + $0x1d0] ss:$8 sps:$4 sm:$0xff]  }
0x14ea   :  { %v7558_v1 = vpop.eup %6223 }
0x14eb   :  { %v6226_v0 = vpop.eup %6225  ;;  %v3985_v62 = vmul.f32 %v3983_v2, %v3964_v31  ;;  %3818 = vperm.xlu1 %5890, %v7558_v1   ;;  %3793 = vperm.xlu0 %5889, %v7558_v1   ;;  %v6070_v31 = vld [vmem:[%s7783_s10 + $0x1f0] ss:$8 sps:$4 sm:$0xff]  }
0x14ec   :  { %v3984_v60 = vmul.f32 %v6226_v0, %v3966_v46  ;;  %v6228_v24 = vpop.eup %6227  ;;  %v6076_v46 = vld [vmem:[%s7784_s11 + $0x198] sm:$0xff]  }
0x14ed   :  { %v6230_v47 = vpop.eup %6229  ;;  %v4194_v6 = vadd.f32 1.0, %v6228_v24  ;;  %v6083_v2 = vld [vmem:[%s7784_s11 + $0x1d8] sm:$0xff]  }
0x14ee   :  { %v3986_v5 = vmul.f32 %v3984_v60, %v3968_v19  ;;  %v4195_v9 = vadd.f32 1.0, %v6230_v47  ;;  %v7574_v16 = vpop.eup %6231 }
0x14ef   :  { %5891 = vset.pattern.permute.xlu1 %v6299_v22  ;;  %6233 = vrcp.f32 %v4194_v6 }
0x14f0   :  { %v3987_v12 = vpack.c.bf16 %v3986_v5, %v3985_v62  ;;  %3842 = vperm.xlu1 %5891, %v7558_v1   ;;  %6235 = vrcp.f32 %v4195_v9  ;;  %v6084_v62 = vld [vmem:[%s7784_s11 + $0x1b8] sm:$0xff]  }
0x14f2   :  { %5801 = vmatmul.mubr.bf16.vlgmr.msra.gmra.mrb[96].mxu0 %v3987_v12  ;;  %v6086_v12 = vld [vmem:[%s7784_s11 + $0x1e8] sm:$0xff]  }
0x14f3   :  { %4375 = vmatpush1.bf16.msra.mxu0 %v6046_v11  ;;  %4406 = vmatprep.mubr.bf16.mxu0 %v6290_v27 }
0x14f4   :  { %5892 = vset.pattern.permute.xlu1 %v6290_v27  ;;  %4376 = vmatprep.subr.bf16.mxu0 %v6052_v40 }
0x14f5   :  { %3798 = vperm.xlu1 %5892, %v7574_v16  }
0x14f7   :  { %4377 = vmatpush1.bf16.msra.mxu0 %v6050_v14 }
0x14f8   :  { %4378 = vmatprep.subr.bf16.mxu0 %v6056_v17 }
0x14f9   :  { %5893 = vset.pattern.permute.xlu1 %v6298_v50  ;;  %v6234_v23 = vpop.eup %6233 }
0x14fa   :  { %3822 = vperm.xlu1 %5893, %v7574_v16   ;;  %v6236_v49 = vpop.eup %6235  ;;  %v4200_v10 = vmul.f32 %v6234_v23, %v4179_v29  ;;  %v6080_v29 = vld [vmem:[%s7784_s11 + $0x1a8] sm:$0xff]  }
0x14fb   :  { %4379 = vmatpush1.bf16.msra.mxu0 %v6054_v18  ;;  %v4201_v25 = vmul.f32 %v6236_v49, %v4183_v30  ;;  %v6087_v49 = vld [vmem:[%s7784_s11 + $0x1f0] sm:$0xff]  }
0x14fc   :  { %4380 = vmatprep.subr.bf16.mxu0 %v6060_v20  ;;  %v4202_v26 = vmul.f32 %v4200_v10, %v4181_v57 }
0x14fd   :  { %v4203_v28 = vmul.f32 %v4201_v25, %v4185_v35  ;;  %v6088_v25 = vld [vmem:[%s7784_s11 + $0x1f8] sm:$0xff]  }
0x14fe   :  { %5894 = vset.pattern.permute.xlu1 %v6299_v22 }
0x14ff   :  { %4381 = vmatpush1.bf16.msra.mxu0 %v6058_v13  ;;  %3846 = vperm.xlu1 %5894, %v7574_v16   ;;  %v4204_v21 = vpack.c.bf16 %v4203_v28, %v4202_v26 }
0x1500   :  { %5824 = vmatprep.subr.bf16.mxu0 %v6288_v7 }
0x1501   :  { %5821 = vmatmul.mubr.bf16.vlgmr.msra.gmra.mrb[104].mxu1 %v4204_v21 }
0x1502   :  { %5203 = vmatmul.mubr.msk.bf16.vlgmr.msra.gmra.mrb[100].mxu0 %vm57_vm0, %v7455_v3  ;;  %4602 = vmatpush1.bf16.msra.mxu1 %v6061_v33 }
0x1503   :  { %4633 = vmatprep.mubr.bf16.mxu1 %v6290_v27  ;;  %4603 = vmatprep.subr.bf16.mxu1 %v6066_v34 }
0x1504   :  { %5840 = vmatprep.mubr.msk.bf16.mxu0 %vm6289_vm1, %v6288_v7  ;;  %5895 = vset.pattern.permute.xlu1 %v6290_v27  ;;  %v6073_v27 = vld [vmem:[%s7784_s11 + $0x180] sm:$0xff]  }
0x1505   :  { %5825 = vmatpush3.bf16.msra.mxu0 %v6073_v27 }
0x1506   :  { %4604 = vmatpush1.bf16.msra.mxu1 %v6064_v56  ;;  %5826 = vmatprep.subr.bf16.mxu0 %v6288_v7 }
0x1507   :  { %4605 = vmatprep.subr.bf16.mxu1 %v6069_v63 }
0x1509   :  { %5827 = vmatpush3.bf16.msra.mxu0 %v6074_v43 }
0x150a   :  { %4606 = vmatpush1.bf16.msra.mxu1 %v6067_v41  ;;  %5828 = vmatprep.subr.bf16.mxu0 %v6288_v7 }
0x150b   :  { %4607 = vmatprep.subr.bf16.mxu1 %v6072_v4 }
0x150e   :  { %4608 = vmatpush1.bf16.msra.mxu1 %v6070_v31 }
0x150f   :  { %5844 = vmatprep.subr.bf16.mxu1 %v6288_v7 }
0x1511   :  { %5246 = vmatmul.mubr.msk.bf16.vlgmr.msra.gmra.mrb[108].mxu1 %vm57_vm0, %v7455_v3  ;;  %v6075_v3 = vld [vmem:[%s7784_s11 + $0x190] sm:$0xff]  }
0x1512   :  { %5860 = vmatprep.mubr.msk.bf16.mxu1 %vm6289_vm1, %v6288_v7  ;;  %5829 = vmatpush3.bf16.msra.mxu0 %v6075_v3 }
0x1513   :  { %5830 = vmatprep.subr.bf16.mxu0 %v6288_v7  ;;  %5845 = vmatpush3.bf16.msra.mxu1 %v6077_v36 }
0x1514   :  { %5846 = vmatprep.subr.bf16.mxu1 %v6288_v7 }
0x1516   :  { %5831 = vmatpush3.bf16.msra.mxu0 %v6076_v46 }
0x1517   :  { %5832 = vmatprep.subr.bf16.mxu0 %v6288_v7  ;;  %5847 = vmatpush3.bf16.msra.mxu1 %v6079_v58 }
0x1518   :  { %5848 = vmatprep.subr.bf16.mxu1 %v6288_v7 }
0x151a   :  { %5833 = vmatpush3.bf16.msra.mxu0 %v6078_v55 }
0x151b   :  { %5834 = vmatprep.subr.bf16.mxu0 %v6288_v7  ;;  %5849 = vmatpush3.bf16.msra.mxu1 %v6081_v38 }
0x151c   :  { %5850 = vmatprep.subr.bf16.mxu1 %v6288_v7 }
0x151e   :  { %5835 = vmatpush3.bf16.msra.mxu0 %v6080_v29 }
0x151f   :  { %5836 = vmatprep.subr.bf16.mxu0 %v6288_v7  ;;  %5851 = vmatpush3.bf16.msra.mxu1 %v6083_v2 }
0x1520   :  { %5852 = vmatprep.subr.bf16.mxu1 %v6288_v7 }
0x1522   :  { %5837 = vmatpush3.bf16.msra.mxu0 %v6082_v42 }
0x1523   :  { %5838 = vmatprep.subr.bf16.mxu0 %v6288_v7 }
0x1526   :  { %5839 = vmatpush3.bf16.msra.mxu0 %v6084_v62 }
0x156a   :  { %v3819_v48 = vpop.permute.xlu1 %3818  ;;  %v3794_v53 = vpop.permute.xlu0 %3793 }
0x156b   :  { %vm3825_vm1 = vcmp.gt.f32.partialorder %v3819_v48, %v7558_v1  ;;  %vm3831_vm4 = vcmp.ge.f32.partialorder %v3819_v48, %v7558_v1  ;;  %vm3801_vm5 = vcmp.gt.f32.partialorder %v3794_v53, %v7558_v1  ;;  %vm3807_vm6 = vcmp.ge.f32.partialorder %v3794_v53, %v7558_v1 }
0x156c   :  { %v5093_v19 = vsel %vm3825_vm1, 1.0, %v6288_v7  ;;  %v5095_v45 = vsel %vm3831_vm4, 1.0, %v6288_v7  ;;  %v5089_v59 = vsel %vm3801_vm5, 1.0, %v6288_v7  ;;  %v5091_v61 = vsel %vm3807_vm6, 1.0, %v6288_v7 }
0x156d   :  { %v3837_v52 = vsel %vm1490_vm9, %v5095_v45, %v5093_v19  ;;  %v3813_v54 = vsel %vm1465_vm10, %v5091_v61, %v5089_v59 }
0x156e   :  { %v3839_v32 = vadd.f32 %v3837_v52, %v3813_v54 }
0x156f   :  { %v3843_v37 = vpop.permute.xlu1 %3842 }
0x1570   :  { %vm3849_vm7 = vcmp.gt.f32.partialorder %v3843_v37, %v7558_v1  ;;  %vm3855_vm14 = vcmp.ge.f32.partialorder %v3843_v37, %v7558_v1 }
0x1571   :  { %v5097_v57 = vsel %vm3849_vm7, 1.0, %v6288_v7  ;;  %v5099_v30 = vsel %vm3855_vm14, 1.0, %v6288_v7 }
0x1572   :  { %v3861_v35 = vsel %vm1515_vm15, %v5099_v30, %v5097_v57 }
0x1573   :  { %v3863_v44 = vadd.f32 %v3861_v35, %v3839_v32 }
0x1574   :  { %v3799_v39 = vpop.permute.xlu1 %3798 }
0x1575   :  { %vm3865_vm8 = vcmp.lt.f32.partialorder %v3863_v44, 2.0  ;;  %vm3802_vm11 = vcmp.gt.f32.partialorder %v3799_v39, %v7574_v16  ;;  %vm3808_vm12 = vcmp.ge.f32.partialorder %v3799_v39, %v7574_v16 }
0x1576   :  { %v7689_v0 = vsel %vm3865_vm8, %v7558_v1, 0.0  ;;  %v6085_v1 = vld [vmem:[%s7784_s11 + $0x1e0] sm:$0xff]   ;;  %v5090_v6 = vsel %vm3802_vm11, 1.0, %v6288_v7  ;;  %v5092_v9 = vsel %vm3808_vm12, 1.0, %v6288_v7 }
0x1577   :  { %v3869_v60 = vsel %vm1524_vm13, %v7689_v0, 0.0  ;;  %5853 = vmatpush3.bf16.msra.mxu1 %v6085_v1  ;;  %v3814_v14 = vsel %vm1465_vm10, %v5092_v9, %v5090_v6 }
0x1578   :  { %3870 = vadd.xlane.f32.xlu1 %v3869_v60  ;;  %5854 = vmatprep.subr.bf16.mxu1 %v6288_v7 }
0x1579   :  { %v3823_v24 = vpop.permute.xlu1 %3822 }
0x157a   :  { %vm3826_vm2 = vcmp.gt.f32.partialorder %v3823_v24, %v7574_v16  ;;  %vm3832_vm3 = vcmp.ge.f32.partialorder %v3823_v24, %v7574_v16 }
0x157b   :  { %v5094_v47 = vsel %vm3826_vm2, 1.0, %v6288_v7  ;;  %v5096_v5 = vsel %vm3832_vm3, 1.0, %v6288_v7  ;;  %5855 = vmatpush3.bf16.msra.mxu1 %v6086_v12 }
0x157c   :  { %v3838_v11 = vsel %vm1490_vm9, %v5096_v5, %v5094_v47  ;;  %5856 = vmatprep.subr.bf16.mxu1 %v6288_v7 }
0x157d   :  { %v3840_v17 = vadd.f32 %v3838_v11, %v3814_v14 }
0x157e   :  { %v3847_v40 = vpop.permute.xlu1 %3846 }
0x157f   :  { %vm3850_vm1 = vcmp.gt.f32.partialorder %v3847_v40, %v7574_v16  ;;  %vm3856_vm4 = vcmp.ge.f32.partialorder %v3847_v40, %v7574_v16  ;;  %5857 = vmatpush3.bf16.msra.mxu1 %v6087_v49 }
0x1580   :  { %v5098_v18 = vsel %vm3850_vm1, 1.0, %v6288_v7  ;;  %v5100_v20 = vsel %vm3856_vm4, 1.0, %v6288_v7  ;;  %5858 = vmatprep.subr.bf16.mxu1 %v6288_v7 }
0x1581   :  { %v3862_v23 = vsel %vm1515_vm15, %v5100_v20, %v5098_v18 }
0x1582   :  { %v3864_v10 = vadd.f32 %v3862_v23, %v3840_v17 }
0x1583   :  { %5859 = vmatpush3.bf16.msra.mxu1 %v6088_v25 }
0x1584   :  { %vm3866_vm9 = vcmp.lt.f32.partialorder %v3864_v10, 2.0 }
0x1585   :  { %v7728_v13 = vsel %vm3866_vm9, %v7574_v16, 0.0 }
0x1586   :  { %v3872_v8 = vsel %vm1524_vm13, %v7728_v13, 0.0 }
0x1587   :  { %3873 = vadd.xlane.f32.xlu0 %v3872_v8 }
0x15c5   :  { %v7735_v26 = vpop.f32.mrb[96].mxu0 }
0x15c6   :  { %v5802_v28 = vpop.f32.mrb[97].mxu0 }
0x15c7   :  { %v7737_v33 = vpop.f32.mrb[98].mxu0 }
0x15c8   :  { %v5803_v21 = vpop.f32.mrb[99].mxu0  ;;  %v4095_v18 = vadd.f32 %v7737_v33, %v7396_v15 }
0x15d4   :  { %v7739_v34 = vpop.f32.mrb[104].mxu1 }
0x15d5   :  { %v4408_v7 = vpop.f32.mrb[100].mxu0  ;;  %v5822_v56 = vpop.f32.mrb[105].mxu1 }
0x15d6   :  { %v5204_v16 = vmul.f32 -1.442695, %v4408_v7  ;;  %v4410_v63 = vpop.f32.mrb[101].mxu0  ;;  %v7741_v41 = vpop.f32.mrb[106].mxu1 }
0x15d7   :  { %v4412_v4 = vpop.f32.mrb[102].mxu0  ;;  %v5823_v27 = vpop.f32.mrb[107].mxu1 }
0x15d8   :  { %6237 = vpow2.f32 %v5204_v16  ;;  %v5205_v31 = vmul.f32 -1.442695, %v4412_v4  ;;  %v4414_v43 = vpop.f32.mrb[103].mxu0 }
0x15da   :  { %6239 = vpow2.f32 %v5205_v31 }
0x15e2   :  { %v6238_v3 = vpop.eup %6237 }
0x15e3   :  { %v4423_v46 = vadd.f32 1.0, %v6238_v3 }
0x15e4   :  { %v6240_v36 = vpop.eup %6239  ;;  %v4635_v53 = vpop.f32.mrb[108].mxu1 }
0x15e5   :  { %6241 = vrcp.f32 %v4423_v46  ;;  %v4424_v48 = vadd.f32 1.0, %v6240_v36  ;;  %v5247_v55 = vmul.f32 -1.442695, %v4635_v53  ;;  %v4637_v19 = vpop.f32.mrb[109].mxu1 }
0x15e6   :  { %v4639_v45 = vpop.f32.mrb[110].mxu1 }
0x15e7   :  { %6243 = vrcp.f32 %v4424_v48  ;;  %v5248_v59 = vmul.f32 -1.442695, %v4639_v45  ;;  %v4641_v61 = vpop.f32.mrb[111].mxu1 }
0x15e8   :  { %6245 = vpow2.f32 %v5247_v55 }
0x15e9   :  { %6247 = vpow2.f32 %v5248_v59 }
0x15ef   :  { %v6242_v58 = vpop.eup %6241 }
0x15f0   :  { %v4429_v52 = vmul.f32 %v6242_v58, %v4408_v7 }
0x15f1   :  { %v6244_v54 = vpop.eup %6243 }
0x15f2   :  { %v6246_v29 = vpop.eup %6245  ;;  %v4431_v37 = vmul.f32 %v4429_v52, %v4410_v63  ;;  %v4430_v32 = vmul.f32 %v6244_v54, %v4412_v4 }
0x15f3   :  { %v4650_v57 = vadd.f32 1.0, %v6246_v29  ;;  %v6248_v30 = vpop.eup %6247 }
0x15f4   :  { %v4432_v38 = vmul.f32 %v4430_v32, %v4414_v43  ;;  %v4651_v35 = vadd.f32 1.0, %v6248_v30 }
0x15f5   :  { %6249 = vrcp.f32 %v4650_v57 }
0x15f6   :  { %v4433_v42 = vpack.c.bf16 %v4432_v38, %v4431_v37  ;;  %6251 = vrcp.f32 %v4651_v35 }
0x15f8   :  { %5841 = vmatmul.mubr.bf16.vlgmr.msra.gmra.mrb[104].mxu0 %v4433_v42 }
0x15ff   :  { %v6250_v44 = vpop.eup %6249 }
0x1600   :  { %v4656_v39 = vmul.f32 %v6250_v44, %v4635_v53  ;;  %v6252_v2 = vpop.eup %6251 }
0x1601   :  { %v4657_v60 = vmul.f32 %v6252_v2, %v4639_v45 }
0x1602   :  { %v4658_v62 = vmul.f32 %v4656_v39, %v4637_v19 }
0x1603   :  { %v4659_v24 = vmul.f32 %v4657_v60, %v4641_v61  ;;  %v5273_v61 = vld [vmem:[%s7785_s12] ss:$0 sm:$0xff] }
0x1605   :  { %v3871_v1 = vpop.xlane.xlu1 %3870  ;;  %v4660_v47 = vpack.c.bf16 %v4659_v24, %v4658_v62 }
0x1606   :  { %6253 = vrcp.f32 %v3871_v1 }
0x1607   :  { %5861 = vmatmul.mubr.bf16.vlgmr.msra.gmra.mrb[112].mxu1 %v4660_v47 }
0x1610   :  { %v6254_v5 = vpop.eup %6253 }
0x1611   :  { %v3876_v6 = vmul.f32 %v6254_v5, %v7689_v0  ;;  %v4094_v0 = vadd.f32 %v7735_v26, %v7393_v51 }
0x1613   :  { %4313 = vperm.xlu1 %5895, %v3876_v6  }
0x1614   :  { %v3874_v9 = vpop.xlane.xlu0 %3873 }
0x1615   :  { %6255 = vrcp.f32 %v3874_v9 }
0x1617   :  { %5896 = vset.pattern.permute.xlu1 %v6298_v50 }
0x1618   :  { %4541 = vperm.xlu1 %5896, %v3876_v6  }
0x161f   :  { %v6256_v11 = vpop.eup %6255 }
0x1620   :  { %v3878_v12 = vmul.f32 %v6256_v11, %v7728_v13 }
0x1622   :  { %4318 = vperm.xlu0 %5889, %v3878_v12   ;;  %4545 = vperm.xlu1 %5896, %v3878_v12  }
0x1626   :  { %5897 = vset.pattern.permute.xlu0 %v6299_v22  ;;  %5898 = vset.pattern.permute.xlu1 %v6299_v22 }
0x1627   :  { %4768 = vperm.xlu0 %5897, %v3876_v6   ;;  %4772 = vperm.xlu1 %5898, %v3878_v12  }
0x1692   :  { %v4314_v40 = vpop.permute.xlu1 %4313 }
0x1693   :  { %v4321_v14 = vmul.f32 %v4314_v40, %v7739_v34 }
0x1695   :  { %v4323_v17 = vadd.f32 %v4321_v14, %v4094_v0 }
0x1697   :  { %v4542_v49 = vpop.permute.xlu1 %4541 }
0x16a1   :  { %v4319_v50 = vpop.permute.xlu0 %4318  ;;  %v4546_v25 = vpop.permute.xlu1 %4545 }
0x16a2   :  { %v4322_v20 = vmul.f32 %v4319_v50, %v7741_v41 }
0x16a4   :  { %v4324_v23 = vadd.f32 %v4322_v20, %v4095_v18 }
0x16a6   :  { %v4769_v26 = vpop.permute.xlu0 %4768  ;;  %v4773_v63 = vpop.permute.xlu1 %4772 }
0x16cb   :  { %v4533_v10 = vpop.f32.mrb[104].mxu0 }
0x16cc   :  { %v4548_v13 = vmul.f32 %v4542_v49, %v4533_v10  ;;  %v5842_v22 = vpop.f32.mrb[105].mxu0 }
0x16cd   :  { %v4536_v8 = vpop.f32.mrb[106].mxu0 }
0x16ce   :  { %v4550_v28 = vadd.f32 %v4548_v13, %v4323_v17  ;;  %v4549_v21 = vmul.f32 %v4546_v25, %v4536_v8  ;;  %v5843_v7 = vpop.f32.mrb[107].mxu0 }
0x16d0   :  { %v4551_v51 = vadd.f32 %v4549_v21, %v4324_v23 }
0x16da   :  { %v4760_v34 = vpop.f32.mrb[112].mxu1 }
0x16db   :  { %v4775_v16 = vmul.f32 %v4769_v26, %v4760_v34  ;;  %v5862_v56 = vpop.f32.mrb[113].mxu1 }
0x16dc   :  { %v4763_v4 = vpop.f32.mrb[114].mxu1 }
0x16dd   :  { %v4777_v15 = vadd.f32 %v4775_v16, %v4550_v28  ;;  %v4776_v33 = vmul.f32 %v4773_v63, %v4763_v4  ;;  %v5863_v41 = vpop.f32.mrb[115].mxu1 }
0x16df   :  { %v4778_v31 = vadd.f32 %v4776_v33, %v4551_v51  ;;  %v4779_v27 = vmul.f32 %v4777_v15, %v4777_v15 }
0x16e1   :  { %v4781_v43 = vsel %vm57_vm0, %v4779_v27, 0.0  ;;  %v4780_v3 = vmul.f32 %v4778_v31, %v4778_v31 }
0x16e2   :  { %4782 = vadd.xlane.f32.xlu1 %v4781_v43 }
0x16e3   :  { %v4784_v46 = vsel %vm57_vm0, %v4780_v3, 0.0 }
0x16e4   :  { %4785 = vadd.xlane.f32.xlu0 %v4784_v46 }
0x176f   :  { %v4783_v36 = vpop.xlane.xlu1 %4782 }
0x1770   :  { %v4787_v48 = vmul.f32 0.015625, %v4783_v36 }
0x1771   :  { %v4786_v53 = vpop.xlane.xlu0 %4785 }
0x1772   :  { %v4789_v55 = vadd.f32 1e-05, %v4787_v48  ;;  %v4788_v19 = vmul.f32 0.015625, %v4786_v53 }
0x1774   :  { %6257 = vrsqrt.f32 %v4789_v55  ;;  %v4790_v45 = vadd.f32 1e-05, %v4788_v19 }
0x1776   :  { %6259 = vrsqrt.f32 %v4790_v45 }
0x177e   :  { %v6258_v59 = vpop.eup %6257 }
0x177f   :  { %v4793_v58 = vmul.f32 %v6258_v59, %v4777_v15 }
0x1780   :  { %v6260_v52 = vpop.eup %6259 }
0x1781   :  { %v4794_v54 = vmul.f32 %v6260_v52, %v4778_v31  ;;  %v4802_v29 = vmul.f32 %v5273_v61, %v4793_v58 }
0x1783   :  { %v4803_v37 = vmul.f32 %v5273_v61, %v4794_v54  ;;  %4804 = vst.msk [vmem:[#allocation3] sm:$0xff] %vm57_vm0, %v4802_v29 }
0x1785   :  { %4805 = vst.msk [vmem:[#allocation3 + $0x8] sm:$0xff] %vm57_vm0, %v4803_v37 }
0x1786   :  { %6275 = shalt.err (!%p6272_p4)
}
0x1787   :  { %s6276_s4 = scalar_lea.hbm %s7786_s13, 256 }
0x1788   :  { %p6277_p5 = scmp.ne.s32.totalorder %s7786_s13, %s6276_s4  ;;  %p6280_p6 = scmp.lt.u32.totalorder %s6276_s4, %s7786_s13 }
0x178a   :  { %p6282_p7 = pnand %p6280_p6, %p6277_p5 }
0x178c   :  { %6285 = shalt.err (!%p6282_p7)
}
0x178d   :  { %s6301_s5 = smov 128   ;;  %s6302_s1 = smov 8  }
0x178e   :  { %4817 = dma.vmem_to_hbm [thread:$0]  %s4812_s22, 256, %s7786_s13, [#allocation4], %s6301_s5, %s6301_s5, %s6302_s1  }
0x178f   :  { %6286 = dma.done.wait [#allocation4], 256  }
0x1790   :  { %6287 = vsyncadd [#allocation4], 4294967040 }
0x1791   :  { %4821 = vsyncpa [#allocation4], 1 }

</bundles_post_ra>
